<compile_context>
chip_gen: v5e
topology: v5e:2x2
jax: 0.10.0
libtpu: 0.0.40
codegen_flags: <defaults>
</compile_context>

<pallas_src>
import jax
import jax.numpy as jnp
from jax.experimental import pallas as pl
from jax.experimental.pallas import tpu as pltpu


# ---------------------------------------------------------------------------
# Fused Pallas kernel: stacked bidirectional LSTM encoder, all layers in one call.
# ---------------------------------------------------------------------------
def _make_encoder_kernel(nlayers, T, Bp, H):
    TWO_B = 2 * Bp

    def kernel(lens2_ref, x_ref, *rest):
        w_refs = rest[:3 * nlayers]
        io_ref = rest[3 * nlayers]        # (T, Bp, 2H): final output AND inter-layer buffer
        xw_scr = rest[3 * nlayers + 1]    # (T, 2Bp, 4H): hoisted input projections

        lens2 = lens2_ref[...]            # (2Bp, 1) int32: [fwd lens ; bwd lens], 0 = pad row
        row = jax.lax.broadcasted_iota(jnp.int32, (TWO_B, 1), 0)
        is_fwd_row = row < Bp             # rows 0:Bp forward dir, Bp:2Bp backward dir
        lane = jax.lax.broadcasted_iota(jnp.int32, (TWO_B, 4 * H), 1)
        is_g_gate = (lane >= 2 * H) & (lane < 3 * H)   # tanh-gate lanes (i, f, g, o order)

        def run_layer(in_ref, wih_ref, b_ref, whh_ref):
            # ---- hoisted input projection: ONE (T*Bp, D_l) @ (D_l, 8H) MXU matmul ----
            x2d = in_ref[...].reshape(T * Bp, in_ref.shape[-1])
            xw = jnp.dot(x2d, wih_ref[...],
                         preferred_element_type=jnp.float32) + b_ref[...]
            xw3 = xw.reshape(T, Bp, 8 * H)
            # block t: rows 0:Bp = fwd proj at t, rows Bp:2Bp = bwd proj (natural order yet)
            xw_scr[:, 0:Bp, :] = xw3[:, :, 0:4 * H]
            xw_scr[:, Bp:TWO_B, :] = xw3[:, :, 4 * H:8 * H]

            # ---- one-time in-place time reversal of the bwd rows (amortized over T) ----
            def rev_body(s, carry):
                tb = T - 1 - s
                blk_a = xw_scr[s]                       # full (2Bp, 4H) tile loads
                blk_b = xw_scr[tb]
                xw_scr[s] = jnp.where(is_fwd_row, blk_a, blk_b)
                xw_scr[tb] = jnp.where(is_fwd_row, blk_b, blk_a)
                return carry

            jax.lax.fori_loop(0, T // 2, rev_body, 0)

            whh = whh_ref[...]                          # (H, 8H) = [whh_fwd | whh_bwd]

            def step(s, carry):
                h, c = carry                            # (2Bp, H); rows 0:Bp fwd, Bp:2Bp bwd
                tb = T - 1 - s
                xw_blk = xw_scr[s]                      # single contiguous (2Bp, 4H) load
                # single fused recurrent matmul; direction select is vreg-aligned (4H = 128)
                hw = jnp.dot(h, whh, preferred_element_type=jnp.float32)   # (2Bp, 8H)
                g = xw_blk + jnp.where(is_fwd_row, hw[:, 0:4 * H], hw[:, 4 * H:8 * H])
                # single-tanh gate trick: sigmoid(x) = 0.5 * (tanh(x / 2) + 1)
                th = jnp.tanh(jnp.where(is_g_gate, g, 0.5 * g))
                act = jnp.where(is_g_gate, th, 0.5 * th + 0.5)
                i_g = act[:, 0:H]
                f_g = act[:, H:2 * H]
                g_g = act[:, 2 * H:3 * H]
                o_g = act[:, 3 * H:4 * H]
                c_new = f_g * c + i_g * g_g
                h_new = o_g * jnp.tanh(c_new)
                # packed-sequence semantics: fwd rows valid if s < len, bwd rows if tb < len
                t_vec = jnp.where(is_fwd_row, s, tb)
                m = t_vec < lens2
                h_out = jnp.where(m, h_new, 0.0)        # zeros at padded steps / pad rows
                io_ref[s, :, 0:H] = h_out[0:Bp]         # forward hidden at time s
                io_ref[tb, :, H:2 * H] = h_out[Bp:TWO_B]  # backward hidden at time T-1-s
                # freeze state past the valid length (pack_padded_sequence semantics)
                return (jnp.where(m, h_new, h), jnp.where(m, c_new, c))

            h0 = jnp.zeros((TWO_B, H), jnp.float32)
            c0 = jnp.zeros((TWO_B, H), jnp.float32)
            jax.lax.fori_loop(0, T, step, (h0, c0), unroll=min(T, 8))

        in_ref = x_ref
        for l in range(nlayers):
            wih_ref, b_ref, whh_ref = w_refs[3 * l:3 * l + 3]
            run_layer(in_ref, wih_ref, b_ref, whh_ref)
            in_ref = io_ref                             # next layer reads activations by ref

    return kernel


def blstm_encoder_pallas(xs, xlens, kernel_params):
    """Stacked bidirectional LSTM with packed-padded-sequence semantics.

    xs:    (B, T, D) float32 (batch_first, like PyTorch)
    xlens: (B,) int32 valid lengths
    Returns (B, T, 2H) float32; padded steps are zero (pad_packed_sequence).
    """
    B, T, D = xs.shape
    H = kernel_params[0][2].shape[0]          # whh_cat has shape (H, 8H)
    nlayers = len(kernel_params)
    Bp = ((B + 3) // 4) * 4                   # 2*Bp multiple of 8 -> full-sublane vregs

    x_tbd = jnp.transpose(xs, (1, 0, 2))      # single boundary transpose
    if Bp != B:
        x_tbd = jnp.pad(x_tbd, ((0, 0), (0, Bp - B), (0, 0)))
    x2d = x_tbd.reshape(T * Bp, D)

    lens = xlens.astype(jnp.int32)
    if Bp != B:
        lens = jnp.pad(lens, (0, Bp - B))     # pad rows -> length 0 (always masked)
    lens2 = jnp.concatenate([lens, lens]).reshape(2 * Bp, 1)

    args = [lens2, x2d]
    for (wih_st, b_st, whh_cat) in kernel_params:
        args += [wih_st, b_st, whh_cat]

    # whole-utterance VMEM footprint (padded) -> explicit scoped-VMEM limit
    def _pad(n, m):
        return (n + m - 1) // m * m
    f32b = 4
    xw_bytes = T * 2 * Bp * 4 * H * f32b
    io_bytes = T * _pad(Bp, 8) * _pad(2 * H, 128) * f32b
    x_bytes = _pad(T * Bp, 8) * _pad(D, 128) * f32b
    vmem_limit = int(min(max(32 * 1024 * 1024, 2 * (xw_bytes + io_bytes + x_bytes)),
                         112 * 1024 * 1024))

    kernel = _make_encoder_kernel(nlayers, T, Bp, H)
    y = pl.pallas_call(
        kernel,
        out_shape=jax.ShapeDtypeStruct((T, Bp, 2 * H), jnp.float32),
        in_specs=[pl.BlockSpec(memory_space=pltpu.MemorySpace.VMEM)] * len(args),
        out_specs=pl.BlockSpec(memory_space=pltpu.MemorySpace.VMEM),
        scratch_shapes=[pltpu.VMEM((T, 2 * Bp, 4 * H), jnp.float32)],
        compiler_params=pltpu.CompilerParams(vmem_limit_bytes=vmem_limit),
    )(*args)

    return jnp.transpose(y[:, :B, :], (1, 0, 2))


def rnn_encoder_forward(xs, xlens, kernel_params):
    """RNNEncoder.forward (fast_impl path, task='ys'); dropout is identity at inference."""
    eouts = {k: {'xs': None, 'xlens': None} for k in
             ['ys', 'ys.ctc', 'ys_sub1', 'ys_sub1.ctc', 'ys_sub2', 'ys_sub2.ctc']}
    eouts['ys']['xs'] = blstm_encoder_pallas(xs, xlens, kernel_params)
    eouts['ys']['xlens'] = xlens
    return eouts


# ---------------------------------------------------------------------------
# Pure-JAX reference (independent formulation: explicit per-example reversal).
# ---------------------------------------------------------------------------
def _reverse_valid(x_btd, xlens):
    T = x_btd.shape[1]
    t_idx = jnp.arange(T)[None, :]
    lens = xlens[:, None]
    idx = jnp.where(t_idx < lens, lens - 1 - t_idx, t_idx)
    return jnp.take_along_axis(x_btd, idx[:, :, None], axis=1)


def _lstm_layer_ref(x_tbd, mask_tb1, wih_t, whh_t, b_row):
    H = whh_t.shape[0]

    def step(carry, inp):
        h, c = carry
        xt, m = inp
        g = xt @ wih_t + h @ whh_t + b_row
        i = jax.nn.sigmoid(g[:, 0:H])
        f = jax.nn.sigmoid(g[:, H:2 * H])
        gg = jnp.tanh(g[:, 2 * H:3 * H])
        o = jax.nn.sigmoid(g[:, 3 * H:4 * H])
        c_new = f * c + i * gg
        h_new = o * jnp.tanh(c_new)
        y = h_new * m
        return (jnp.where(m > 0, h_new, h), jnp.where(m > 0, c_new, c)), y

    B = x_tbd.shape[1]
    init = (jnp.zeros((B, H), jnp.float32), jnp.zeros((B, H), jnp.float32))
    _, ys = jax.lax.scan(step, init, (x_tbd, mask_tb1))
    return ys


def blstm_encoder_ref(xs, xlens, ref_params):
    B, T, _ = xs.shape
    mask_bt = (jnp.arange(T)[None, :] < xlens[:, None]).astype(jnp.float32)
    mask_tb1 = mask_bt.T[:, :, None]
    h = xs
    for (wih_f, whh_f, b_f, wih_b, whh_b, b_b) in ref_params:
        y_f = _lstm_layer_ref(jnp.transpose(h, (1, 0, 2)), mask_tb1, wih_f, whh_f, b_f)
        y_f = jnp.transpose(y_f, (1, 0, 2))
        h_rev = _reverse_valid(h, xlens)
        y_b = _lstm_layer_ref(jnp.transpose(h_rev, (1, 0, 2)), mask_tb1, wih_b, whh_b, b_b)
        y_b = _reverse_valid(jnp.transpose(y_b, (1, 0, 2)), xlens)
        h = jnp.concatenate([y_f, y_b], axis=-1) * mask_bt[:, :, None]
    return h


# ---------------------------------------------------------------------------
# Parameter init (PyTorch nn.LSTM bidirectional shapes).
# ---------------------------------------------------------------------------
def init_params(key, input_dim, nunits, nlayers):
    H = nunits
    bound = 1.0 / float(H) ** 0.5
    kernel_params, ref_params = [], []
    in_dim = input_dim
    for _ in range(nlayers):
        dirs = []
        for _ in range(2):  # forward, backward
            key, k1, k2, k3, k4 = jax.random.split(key, 5)
            w_ih = jax.random.uniform(k1, (4 * H, in_dim), jnp.float32, -bound, bound)
            w_hh = jax.random.uniform(k2, (4 * H, H), jnp.float32, -bound, bound)
            b_ih = jax.random.uniform(k3, (4 * H,), jnp.float32, -bound, bound)
            b_hh = jax.random.uniform(k4, (4 * H,), jnp.float32, -bound, bound)
            dirs.append((w_ih, w_hh, b_ih, b_hh))
        (wif, whf, bif, bhf), (wib, whb, bib, bhb) = dirs
        # fused-kernel form: both directions stacked
        wih_st = jnp.concatenate([wif.T, wib.T], axis=1)             # (in_dim, 8H)
        b_st = jnp.concatenate([bif + bhf, bib + bhb])[None, :]      # (1, 8H)
        whh_cat = jnp.concatenate([whf.T, whb.T], axis=1)            # (H, 8H)
        kernel_params.append((wih_st, b_st, whh_cat))
        # reference form (per direction)
        ref_params.append((wif.T, whf.T, (bif + bhf)[None, :],
                           wib.T, whb.T, (bib + bhb)[None, :]))
        in_dim = 2 * H
    return kernel_params, ref_params


if __name__ == "__main__":
    B, T, D, H, L = 2, 8, 16, 32, 2

    key = jax.random.PRNGKey(0)
    kx, kp = jax.random.split(key)
    xs = jax.random.normal(kx, (B, T, D), jnp.float32)
    xlens = jnp.array([8, 6], jnp.int32)          # sorted descending (pack requirement)
    kernel_params, ref_params = init_params(kp, D, H, L)

    # TODO(synk): CNN front-end (CNNEncoder) and the non-fast-impl branches
    # (projection / subsample / residual / nin / sub-task layers) are not exercised
    # by this configuration (fast_impl path).

    eouts = rnn_encoder_forward(xs, xlens, kernel_params)
    out = jax.block_until_ready(eouts['ys']['xs'])
    assert out.shape == (B, T, 2 * H)

    ref = blstm_encoder_ref(xs, xlens, ref_params)
    assert jnp.allclose(out, ref, atol=1e-4, rtol=1e-4), "mismatch vs reference"

    print("KERNEL_OK")
</pallas_src>

<mosaic_0001>
module attributes {stable_mosaic.version = 11 : i64} {
  func.func @kernel(%arg0: memref<8x1xi32, #tpu.memory_space<vmem>>, %arg1: memref<32x16xf32, #tpu.memory_space<vmem>>, %arg2: memref<16x256xf32, #tpu.memory_space<vmem>>, %arg3: memref<1x256xf32, #tpu.memory_space<vmem>>, %arg4: memref<32x256xf32, #tpu.memory_space<vmem>>, %arg5: memref<64x256xf32, #tpu.memory_space<vmem>>, %arg6: memref<1x256xf32, #tpu.memory_space<vmem>>, %arg7: memref<32x256xf32, #tpu.memory_space<vmem>>, %arg8: memref<8x4x64xf32, #tpu.memory_space<vmem>>, %arg9: memref<8x8x128xf32, #tpu.memory_space<vmem>>) attributes {dimension_semantics = [], scalar_prefetch = 0 : i64, scratch_operands = 1 : i64, tpu.core_type = #tpu.core_type<tc>} {
    %c0 = arith.constant 0 : index
    %c0_0 = arith.constant 0 : index
    %0 = vector.load %arg0[%c0, %c0_0] : memref<8x1xi32, #tpu.memory_space<vmem>>, vector<8x1xi32>
    %1 = tpu.iota {dimensions = array<i32: 0>} : vector<8x1xi32>
    %c4_i32 = arith.constant 4 : i32
    %2 = vector.broadcast %c4_i32 : i32 to vector<8x1xi32>
    %3 = arith.cmpi slt, %1, %2 : vector<8x1xi32>
    %4 = tpu.iota {dimensions = array<i32: 1>} : vector<8x128xi32>
    %c64_i32 = arith.constant 64 : i32
    %5 = vector.broadcast %c64_i32 : i32 to vector<8x128xi32>
    %6 = arith.cmpi sge, %4, %5 : vector<8x128xi32>
    %c96_i32 = arith.constant 96 : i32
    %7 = vector.broadcast %c96_i32 : i32 to vector<8x128xi32>
    %8 = arith.cmpi slt, %4, %7 : vector<8x128xi32>
    %9 = arith.andi %6, %8 : vector<8x128xi1>
    %c0_1 = arith.constant 0 : index
    %c0_2 = arith.constant 0 : index
    %10 = vector.load %arg1[%c0_1, %c0_2] : memref<32x16xf32, #tpu.memory_space<vmem>>, vector<32x16xf32>
    %c0_3 = arith.constant 0 : index
    %c0_4 = arith.constant 0 : index
    %11 = vector.load %arg2[%c0_3, %c0_4] : memref<16x256xf32, #tpu.memory_space<vmem>>, vector<16x256xf32>
    %cst = arith.constant dense<0.000000e+00> : vector<32x256xf32>
    %12 = tpu.matmul %10, %11, %cst {dimension_numbers = #tpu.dot_dimension_numbers<[1], [0], [0], [1], [0, 0, 1, 1], [], []>} : vector<32x16xf32>, vector<16x256xf32>, vector<32x256xf32> -> vector<32x256xf32>
    %c0_5 = arith.constant 0 : index
    %c0_6 = arith.constant 0 : index
    %13 = vector.load %arg3[%c0_5, %c0_6] : memref<1x256xf32, #tpu.memory_space<vmem>>, vector<1x256xf32>
    %14 = vector.broadcast %13 : vector<1x256xf32> to vector<32x256xf32>
    %15 = arith.addf %12, %14 : vector<32x256xf32>
    %16 = vector.shape_cast %15 : vector<32x256xf32> to vector<8x4x256xf32>
    %17 = vector.extract_strided_slice %16 {offsets = [0, 0, 0], sizes = [8, 4, 128], strides = [1, 1, 1]} : vector<8x4x256xf32> to vector<8x4x128xf32>
    %c0_7 = arith.constant 0 : index
    %c0_8 = arith.constant 0 : index
    %c0_9 = arith.constant 0 : index
    %18 = vector.load %arg9[%c0_7, %c0_8, %c0_9] : memref<8x8x128xf32, #tpu.memory_space<vmem>>, vector<8x4x128xf32>
    tpu.vector_store %arg9[%c0_7, %c0_8, %c0_9], %17 {strides = array<i32>} : memref<8x8x128xf32, #tpu.memory_space<vmem>>, vector<8x4x128xf32>,
    %19 = vector.extract_strided_slice %16 {offsets = [0, 0, 128], sizes = [8, 4, 128], strides = [1, 1, 1]} : vector<8x4x256xf32> to vector<8x4x128xf32>
    %c0_10 = arith.constant 0 : index
    %c4 = arith.constant 4 : index
    %c0_11 = arith.constant 0 : index
    %20 = vector.load %arg9[%c0_10, %c4, %c0_11] : memref<8x8x128xf32, #tpu.memory_space<vmem>>, vector<8x4x128xf32>
    tpu.vector_store %arg9[%c0_10, %c4, %c0_11], %19 {strides = array<i32>} : memref<8x8x128xf32, #tpu.memory_space<vmem>>, vector<8x4x128xf32>,
    %c0_i32 = arith.constant 0 : i32
    %c4_i32_12 = arith.constant 4 : i32
    %21 = arith.addi %c0_i32, %c4_i32_12 : i32
    %c1_i32 = arith.constant 1 : i32
    scf.for %arg10 = %c0_i32 to %21 step %c1_i32  : i32 {
      %c7_i32_243 = arith.constant 7 : i32
      %889 = arith.subi %c7_i32_243, %arg10 : i32
      %890 = arith.index_cast %arg10 : i32 to index
      %c0_244 = arith.constant 0 : index
      %c0_245 = arith.constant 0 : index
      %891 = vector.load %arg9[%890, %c0_244, %c0_245] : memref<8x8x128xf32, #tpu.memory_space<vmem>>, vector<1x8x128xf32>
      %892 = vector.shape_cast %891 : vector<1x8x128xf32> to vector<8x128xf32>
      %893 = arith.index_cast %889 : i32 to index
      %c0_246 = arith.constant 0 : index
      %c0_247 = arith.constant 0 : index
      %894 = vector.load %arg9[%893, %c0_246, %c0_247] : memref<8x8x128xf32, #tpu.memory_space<vmem>>, vector<1x8x128xf32>
      %895 = vector.shape_cast %894 : vector<1x8x128xf32> to vector<8x128xf32>
      %896 = vector.shape_cast %3 : vector<8x1xi1> to vector<8x1xi1>
      %897 = vector.broadcast %896 : vector<8x1xi1> to vector<8x128xi1>
      %898 = arith.select %897, %892, %895 : vector<8x128xi1>, vector<8x128xf32>
      %899 = arith.index_cast %arg10 : i32 to index
      %c0_248 = arith.constant 0 : index
      %c0_249 = arith.constant 0 : index
      %900 = vector.load %arg9[%899, %c0_248, %c0_249] : memref<8x8x128xf32, #tpu.memory_space<vmem>>, vector<1x8x128xf32>
      %901 = vector.shape_cast %900 : vector<1x8x128xf32> to vector<8x128xf32>
      %902 = vector.shape_cast %898 : vector<8x128xf32> to vector<1x8x128xf32>
      tpu.vector_store %arg9[%899, %c0_248, %c0_249], %902 {strides = array<i32>} : memref<8x8x128xf32, #tpu.memory_space<vmem>>, vector<1x8x128xf32>,
      %903 = vector.shape_cast %3 : vector<8x1xi1> to vector<8x1xi1>
      %904 = vector.broadcast %903 : vector<8x1xi1> to vector<8x128xi1>
      %905 = arith.select %904, %895, %892 : vector<8x128xi1>, vector<8x128xf32>
      %906 = arith.index_cast %889 : i32 to index
      %c0_250 = arith.constant 0 : index
      %c0_251 = arith.constant 0 : index
      %907 = vector.load %arg9[%906, %c0_250, %c0_251] : memref<8x8x128xf32, #tpu.memory_space<vmem>>, vector<1x8x128xf32>
      %908 = vector.shape_cast %907 : vector<1x8x128xf32> to vector<8x128xf32>
      %909 = vector.shape_cast %905 : vector<8x128xf32> to vector<1x8x128xf32>
      tpu.vector_store %arg9[%906, %c0_250, %c0_251], %909 {strides = array<i32>} : memref<8x8x128xf32, #tpu.memory_space<vmem>>, vector<1x8x128xf32>,
    }
    %c4_i32_13 = arith.constant 4 : i32
    %c0_14 = arith.constant 0 : index
    %c0_15 = arith.constant 0 : index
    %22 = vector.load %arg4[%c0_14, %c0_15] : memref<32x256xf32, #tpu.memory_space<vmem>>, vector<32x256xf32>
    %cst_16 = arith.constant 0.000000e+00 : f32
    %23 = vector.broadcast %cst_16 : f32 to vector<8x32xf32>
    %cst_17 = arith.constant 0.000000e+00 : f32
    %24 = vector.broadcast %cst_17 : f32 to vector<8x32xf32>
    %c0_i32_18 = arith.constant 0 : i32
    %c7_i32 = arith.constant 7 : i32
    %25 = arith.subi %c7_i32, %c0_i32_18 : i32
    %26 = arith.index_cast %c0_i32_18 : i32 to index
    %c0_19 = arith.constant 0 : index
    %c0_20 = arith.constant 0 : index
    %27 = vector.load %arg9[%26, %c0_19, %c0_20] : memref<8x8x128xf32, #tpu.memory_space<vmem>>, vector<1x8x128xf32>
    %28 = vector.shape_cast %27 : vector<1x8x128xf32> to vector<8x128xf32>
    %cst_21 = arith.constant dense<0.000000e+00> : vector<8x256xf32>
    %29 = tpu.matmul %23, %22, %cst_21 {dimension_numbers = #tpu.dot_dimension_numbers<[1], [0], [0], [1], [0, 0, 1, 1], [], []>} : vector<8x32xf32>, vector<32x256xf32>, vector<8x256xf32> -> vector<8x256xf32>
    %30 = vector.extract_strided_slice %29 {offsets = [0, 0], sizes = [8, 128], strides = [1, 1]} : vector<8x256xf32> to vector<8x128xf32>
    %31 = vector.extract_strided_slice %29 {offsets = [0, 128], sizes = [8, 128], strides = [1, 1]} : vector<8x256xf32> to vector<8x128xf32>
    %32 = vector.shape_cast %3 : vector<8x1xi1> to vector<8x1xi1>
    %33 = vector.broadcast %32 : vector<8x1xi1> to vector<8x128xi1>
    %34 = arith.select %33, %30, %31 : vector<8x128xi1>, vector<8x128xf32>
    %35 = arith.addf %28, %34 : vector<8x128xf32>
    %cst_22 = arith.constant 5.000000e-01 : f32
    %36 = vector.broadcast %cst_22 : f32 to vector<8x128xf32>
    %37 = arith.mulf %36, %35 : vector<8x128xf32>
    %38 = arith.select %9, %35, %37 : vector<8x128xi1>, vector<8x128xf32>
    %39 = math.tanh %38 : vector<8x128xf32>
    %cst_23 = arith.constant 5.000000e-01 : f32
    %40 = vector.broadcast %cst_23 : f32 to vector<8x128xf32>
    %41 = arith.mulf %40, %39 : vector<8x128xf32>
    %cst_24 = arith.constant 5.000000e-01 : f32
    %42 = vector.broadcast %cst_24 : f32 to vector<8x128xf32>
    %43 = arith.addf %41, %42 : vector<8x128xf32>
    %44 = arith.select %9, %39, %43 : vector<8x128xi1>, vector<8x128xf32>
    %45 = vector.extract_strided_slice %44 {offsets = [0, 0], sizes = [8, 32], strides = [1, 1]} : vector<8x128xf32> to vector<8x32xf32>
    %46 = vector.extract_strided_slice %44 {offsets = [0, 32], sizes = [8, 32], strides = [1, 1]} : vector<8x128xf32> to vector<8x32xf32>
    %47 = vector.extract_strided_slice %44 {offsets = [0, 64], sizes = [8, 32], strides = [1, 1]} : vector<8x128xf32> to vector<8x32xf32>
    %48 = vector.extract_strided_slice %44 {offsets = [0, 96], sizes = [8, 32], strides = [1, 1]} : vector<8x128xf32> to vector<8x32xf32>
    %49 = arith.mulf %46, %24 : vector<8x32xf32>
    %50 = arith.mulf %45, %47 : vector<8x32xf32>
    %51 = arith.addf %49, %50 : vector<8x32xf32>
    %52 = math.tanh %51 : vector<8x32xf32>
    %53 = arith.mulf %48, %52 : vector<8x32xf32>
    %54 = vector.broadcast %c0_i32_18 : i32 to vector<8x1xi32>
    %55 = vector.broadcast %25 : i32 to vector<8x1xi32>
    %56 = arith.select %3, %54, %55 : vector<8x1xi1>, vector<8x1xi32>
    %57 = arith.cmpi slt, %56, %0 : vector<8x1xi32>
    %cst_25 = arith.constant 0.000000e+00 : f32
    %58 = vector.shape_cast %57 : vector<8x1xi1> to vector<8x1xi1>
    %59 = vector.broadcast %58 : vector<8x1xi1> to vector<8x32xi1>
    %60 = vector.broadcast %cst_25 : f32 to vector<8x32xf32>
    %61 = arith.select %59, %53, %60 : vector<8x32xi1>, vector<8x32xf32>
    %62 = vector.extract_strided_slice %61 {offsets = [0, 0], sizes = [4, 32], strides = [1, 1]} : vector<8x32xf32> to vector<4x32xf32>
    %63 = arith.index_cast %c0_i32_18 : i32 to index
    %c0_26 = arith.constant 0 : index
    %c0_27 = arith.constant 0 : index
    %64 = vector.load %arg8[%63, %c0_26, %c0_27] : memref<8x4x64xf32, #tpu.memory_space<vmem>>, vector<1x4x32xf32>
    %65 = vector.shape_cast %64 : vector<1x4x32xf32> to vector<4x32xf32>
    %66 = vector.shape_cast %62 : vector<4x32xf32> to vector<1x4x32xf32>
    tpu.vector_store %arg8[%63, %c0_26, %c0_27], %66 {strides = array<i32>} : memref<8x4x64xf32, #tpu.memory_space<vmem>>, vector<1x4x32xf32>,
    %67 = vector.extract_strided_slice %61 {offsets = [4, 0], sizes = [4, 32], strides = [1, 1]} : vector<8x32xf32> to vector<4x32xf32>
    %68 = arith.index_cast %25 : i32 to index
    %c0_28 = arith.constant 0 : index
    %c32 = arith.constant 32 : index
    %69 = vector.load %arg8[%68, %c0_28, %c32] : memref<8x4x64xf32, #tpu.memory_space<vmem>>, vector<1x4x32xf32>
    %70 = vector.shape_cast %69 : vector<1x4x32xf32> to vector<4x32xf32>
    %71 = vector.shape_cast %67 : vector<4x32xf32> to vector<1x4x32xf32>
    tpu.vector_store %arg8[%68, %c0_28, %c32], %71 {strides = array<i32>} : memref<8x4x64xf32, #tpu.memory_space<vmem>>, vector<1x4x32xf32>,
    %72 = vector.shape_cast %57 : vector<8x1xi1> to vector<8x1xi1>
    %73 = vector.broadcast %72 : vector<8x1xi1> to vector<8x32xi1>
    %74 = arith.select %73, %53, %23 : vector<8x32xi1>, vector<8x32xf32>
    %75 = vector.shape_cast %57 : vector<8x1xi1> to vector<8x1xi1>
    %76 = vector.broadcast %75 : vector<8x1xi1> to vector<8x32xi1>
    %77 = arith.select %76, %51, %24 : vector<8x32xi1>, vector<8x32xf32>
    %c1_i32_29 = arith.constant 1 : i32
    %c7_i32_30 = arith.constant 7 : i32
    %78 = arith.subi %c7_i32_30, %c1_i32_29 : i32
    %79 = arith.index_cast %c1_i32_29 : i32 to index
    %c0_31 = arith.constant 0 : index
    %c0_32 = arith.constant 0 : index
    %80 = vector.load %arg9[%79, %c0_31, %c0_32] : memref<8x8x128xf32, #tpu.memory_space<vmem>>, vector<1x8x128xf32>
    %81 = vector.shape_cast %80 : vector<1x8x128xf32> to vector<8x128xf32>
    %cst_33 = arith.constant dense<0.000000e+00> : vector<8x256xf32>
    %82 = tpu.matmul %74, %22, %cst_33 {dimension_numbers = #tpu.dot_dimension_numbers<[1], [0], [0], [1], [0, 0, 1, 1], [], []>} : vector<8x32xf32>, vector<32x256xf32>, vector<8x256xf32> -> vector<8x256xf32>
    %83 = vector.extract_strided_slice %82 {offsets = [0, 0], sizes = [8, 128], strides = [1, 1]} : vector<8x256xf32> to vector<8x128xf32>
    %84 = vector.extract_strided_slice %82 {offsets = [0, 128], sizes = [8, 128], strides = [1, 1]} : vector<8x256xf32> to vector<8x128xf32>
    %85 = vector.shape_cast %3 : vector<8x1xi1> to vector<8x1xi1>
    %86 = vector.broadcast %85 : vector<8x1xi1> to vector<8x128xi1>
    %87 = arith.select %86, %83, %84 : vector<8x128xi1>, vector<8x128xf32>
    %88 = arith.addf %81, %87 : vector<8x128xf32>
    %cst_34 = arith.constant 5.000000e-01 : f32
    %89 = vector.broadcast %cst_34 : f32 to vector<8x128xf32>
    %90 = arith.mulf %89, %88 : vector<8x128xf32>
    %91 = arith.select %9, %88, %90 : vector<8x128xi1>, vector<8x128xf32>
    %92 = math.tanh %91 : vector<8x128xf32>
    %cst_35 = arith.constant 5.000000e-01 : f32
    %93 = vector.broadcast %cst_35 : f32 to vector<8x128xf32>
    %94 = arith.mulf %93, %92 : vector<8x128xf32>
    %cst_36 = arith.constant 5.000000e-01 : f32
    %95 = vector.broadcast %cst_36 : f32 to vector<8x128xf32>
    %96 = arith.addf %94, %95 : vector<8x128xf32>
    %97 = arith.select %9, %92, %96 : vector<8x128xi1>, vector<8x128xf32>
    %98 = vector.extract_strided_slice %97 {offsets = [0, 0], sizes = [8, 32], strides = [1, 1]} : vector<8x128xf32> to vector<8x32xf32>
    %99 = vector.extract_strided_slice %97 {offsets = [0, 32], sizes = [8, 32], strides = [1, 1]} : vector<8x128xf32> to vector<8x32xf32>
    %100 = vector.extract_strided_slice %97 {offsets = [0, 64], sizes = [8, 32], strides = [1, 1]} : vector<8x128xf32> to vector<8x32xf32>
    %101 = vector.extract_strided_slice %97 {offsets = [0, 96], sizes = [8, 32], strides = [1, 1]} : vector<8x128xf32> to vector<8x32xf32>
    %102 = arith.mulf %99, %77 : vector<8x32xf32>
    %103 = arith.mulf %98, %100 : vector<8x32xf32>
    %104 = arith.addf %102, %103 : vector<8x32xf32>
    %105 = math.tanh %104 : vector<8x32xf32>
    %106 = arith.mulf %101, %105 : vector<8x32xf32>
    %107 = vector.broadcast %c1_i32_29 : i32 to vector<8x1xi32>
    %108 = vector.broadcast %78 : i32 to vector<8x1xi32>
    %109 = arith.select %3, %107, %108 : vector<8x1xi1>, vector<8x1xi32>
    %110 = arith.cmpi slt, %109, %0 : vector<8x1xi32>
    %cst_37 = arith.constant 0.000000e+00 : f32
    %111 = vector.shape_cast %110 : vector<8x1xi1> to vector<8x1xi1>
    %112 = vector.broadcast %111 : vector<8x1xi1> to vector<8x32xi1>
    %113 = vector.broadcast %cst_37 : f32 to vector<8x32xf32>
    %114 = arith.select %112, %106, %113 : vector<8x32xi1>, vector<8x32xf32>
    %115 = vector.extract_strided_slice %114 {offsets = [0, 0], sizes = [4, 32], strides = [1, 1]} : vector<8x32xf32> to vector<4x32xf32>
    %116 = arith.index_cast %c1_i32_29 : i32 to index
    %c0_38 = arith.constant 0 : index
    %c0_39 = arith.constant 0 : index
    %117 = vector.load %arg8[%116, %c0_38, %c0_39] : memref<8x4x64xf32, #tpu.memory_space<vmem>>, vector<1x4x32xf32>
    %118 = vector.shape_cast %117 : vector<1x4x32xf32> to vector<4x32xf32>
    %119 = vector.shape_cast %115 : vector<4x32xf32> to vector<1x4x32xf32>
    tpu.vector_store %arg8[%116, %c0_38, %c0_39], %119 {strides = array<i32>} : memref<8x4x64xf32, #tpu.memory_space<vmem>>, vector<1x4x32xf32>,
    %120 = vector.extract_strided_slice %114 {offsets = [4, 0], sizes = [4, 32], strides = [1, 1]} : vector<8x32xf32> to vector<4x32xf32>
    %121 = arith.index_cast %78 : i32 to index
    %c0_40 = arith.constant 0 : index
    %c32_41 = arith.constant 32 : index
    %122 = vector.load %arg8[%121, %c0_40, %c32_41] : memref<8x4x64xf32, #tpu.memory_space<vmem>>, vector<1x4x32xf32>
    %123 = vector.shape_cast %122 : vector<1x4x32xf32> to vector<4x32xf32>
    %124 = vector.shape_cast %120 : vector<4x32xf32> to vector<1x4x32xf32>
    tpu.vector_store %arg8[%121, %c0_40, %c32_41], %124 {strides = array<i32>} : memref<8x4x64xf32, #tpu.memory_space<vmem>>, vector<1x4x32xf32>,
    %125 = vector.shape_cast %110 : vector<8x1xi1> to vector<8x1xi1>
    %126 = vector.broadcast %125 : vector<8x1xi1> to vector<8x32xi1>
    %127 = arith.select %126, %106, %74 : vector<8x32xi1>, vector<8x32xf32>
    %128 = vector.shape_cast %110 : vector<8x1xi1> to vector<8x1xi1>
    %129 = vector.broadcast %128 : vector<8x1xi1> to vector<8x32xi1>
    %130 = arith.select %129, %104, %77 : vector<8x32xi1>, vector<8x32xf32>
    %c2_i32 = arith.constant 2 : i32
    %c7_i32_42 = arith.constant 7 : i32
    %131 = arith.subi %c7_i32_42, %c2_i32 : i32
    %132 = arith.index_cast %c2_i32 : i32 to index
    %c0_43 = arith.constant 0 : index
    %c0_44 = arith.constant 0 : index
    %133 = vector.load %arg9[%132, %c0_43, %c0_44] : memref<8x8x128xf32, #tpu.memory_space<vmem>>, vector<1x8x128xf32>
    %134 = vector.shape_cast %133 : vector<1x8x128xf32> to vector<8x128xf32>
    %cst_45 = arith.constant dense<0.000000e+00> : vector<8x256xf32>
    %135 = tpu.matmul %127, %22, %cst_45 {dimension_numbers = #tpu.dot_dimension_numbers<[1], [0], [0], [1], [0, 0, 1, 1], [], []>} : vector<8x32xf32>, vector<32x256xf32>, vector<8x256xf32> -> vector<8x256xf32>
    %136 = vector.extract_strided_slice %135 {offsets = [0, 0], sizes = [8, 128], strides = [1, 1]} : vector<8x256xf32> to vector<8x128xf32>
    %137 = vector.extract_strided_slice %135 {offsets = [0, 128], sizes = [8, 128], strides = [1, 1]} : vector<8x256xf32> to vector<8x128xf32>
    %138 = vector.shape_cast %3 : vector<8x1xi1> to vector<8x1xi1>
    %139 = vector.broadcast %138 : vector<8x1xi1> to vector<8x128xi1>
    %140 = arith.select %139, %136, %137 : vector<8x128xi1>, vector<8x128xf32>
    %141 = arith.addf %134, %140 : vector<8x128xf32>
    %cst_46 = arith.constant 5.000000e-01 : f32
    %142 = vector.broadcast %cst_46 : f32 to vector<8x128xf32>
    %143 = arith.mulf %142, %141 : vector<8x128xf32>
    %144 = arith.select %9, %141, %143 : vector<8x128xi1>, vector<8x128xf32>
    %145 = math.tanh %144 : vector<8x128xf32>
    %cst_47 = arith.constant 5.000000e-01 : f32
    %146 = vector.broadcast %cst_47 : f32 to vector<8x128xf32>
    %147 = arith.mulf %146, %145 : vector<8x128xf32>
    %cst_48 = arith.constant 5.000000e-01 : f32
    %148 = vector.broadcast %cst_48 : f32 to vector<8x128xf32>
    %149 = arith.addf %147, %148 : vector<8x128xf32>
    %150 = arith.select %9, %145, %149 : vector<8x128xi1>, vector<8x128xf32>
    %151 = vector.extract_strided_slice %150 {offsets = [0, 0], sizes = [8, 32], strides = [1, 1]} : vector<8x128xf32> to vector<8x32xf32>
    %152 = vector.extract_strided_slice %150 {offsets = [0, 32], sizes = [8, 32], strides = [1, 1]} : vector<8x128xf32> to vector<8x32xf32>
    %153 = vector.extract_strided_slice %150 {offsets = [0, 64], sizes = [8, 32], strides = [1, 1]} : vector<8x128xf32> to vector<8x32xf32>
    %154 = vector.extract_strided_slice %150 {offsets = [0, 96], sizes = [8, 32], strides = [1, 1]} : vector<8x128xf32> to vector<8x32xf32>
    %155 = arith.mulf %152, %130 : vector<8x32xf32>
    %156 = arith.mulf %151, %153 : vector<8x32xf32>
    %157 = arith.addf %155, %156 : vector<8x32xf32>
    %158 = math.tanh %157 : vector<8x32xf32>
    %159 = arith.mulf %154, %158 : vector<8x32xf32>
    %160 = vector.broadcast %c2_i32 : i32 to vector<8x1xi32>
    %161 = vector.broadcast %131 : i32 to vector<8x1xi32>
    %162 = arith.select %3, %160, %161 : vector<8x1xi1>, vector<8x1xi32>
    %163 = arith.cmpi slt, %162, %0 : vector<8x1xi32>
    %cst_49 = arith.constant 0.000000e+00 : f32
    %164 = vector.shape_cast %163 : vector<8x1xi1> to vector<8x1xi1>
    %165 = vector.broadcast %164 : vector<8x1xi1> to vector<8x32xi1>
    %166 = vector.broadcast %cst_49 : f32 to vector<8x32xf32>
    %167 = arith.select %165, %159, %166 : vector<8x32xi1>, vector<8x32xf32>
    %168 = vector.extract_strided_slice %167 {offsets = [0, 0], sizes = [4, 32], strides = [1, 1]} : vector<8x32xf32> to vector<4x32xf32>
    %169 = arith.index_cast %c2_i32 : i32 to index
    %c0_50 = arith.constant 0 : index
    %c0_51 = arith.constant 0 : index
    %170 = vector.load %arg8[%169, %c0_50, %c0_51] : memref<8x4x64xf32, #tpu.memory_space<vmem>>, vector<1x4x32xf32>
    %171 = vector.shape_cast %170 : vector<1x4x32xf32> to vector<4x32xf32>
    %172 = vector.shape_cast %168 : vector<4x32xf32> to vector<1x4x32xf32>
    tpu.vector_store %arg8[%169, %c0_50, %c0_51], %172 {strides = array<i32>} : memref<8x4x64xf32, #tpu.memory_space<vmem>>, vector<1x4x32xf32>,
    %173 = vector.extract_strided_slice %167 {offsets = [4, 0], sizes = [4, 32], strides = [1, 1]} : vector<8x32xf32> to vector<4x32xf32>
    %174 = arith.index_cast %131 : i32 to index
    %c0_52 = arith.constant 0 : index
    %c32_53 = arith.constant 32 : index
    %175 = vector.load %arg8[%174, %c0_52, %c32_53] : memref<8x4x64xf32, #tpu.memory_space<vmem>>, vector<1x4x32xf32>
    %176 = vector.shape_cast %175 : vector<1x4x32xf32> to vector<4x32xf32>
    %177 = vector.shape_cast %173 : vector<4x32xf32> to vector<1x4x32xf32>
    tpu.vector_store %arg8[%174, %c0_52, %c32_53], %177 {strides = array<i32>} : memref<8x4x64xf32, #tpu.memory_space<vmem>>, vector<1x4x32xf32>,
    %178 = vector.shape_cast %163 : vector<8x1xi1> to vector<8x1xi1>
    %179 = vector.broadcast %178 : vector<8x1xi1> to vector<8x32xi1>
    %180 = arith.select %179, %159, %127 : vector<8x32xi1>, vector<8x32xf32>
    %181 = vector.shape_cast %163 : vector<8x1xi1> to vector<8x1xi1>
    %182 = vector.broadcast %181 : vector<8x1xi1> to vector<8x32xi1>
    %183 = arith.select %182, %157, %130 : vector<8x32xi1>, vector<8x32xf32>
    %c3_i32 = arith.constant 3 : i32
    %c7_i32_54 = arith.constant 7 : i32
    %184 = arith.subi %c7_i32_54, %c3_i32 : i32
    %185 = arith.index_cast %c3_i32 : i32 to index
    %c0_55 = arith.constant 0 : index
    %c0_56 = arith.constant 0 : index
    %186 = vector.load %arg9[%185, %c0_55, %c0_56] : memref<8x8x128xf32, #tpu.memory_space<vmem>>, vector<1x8x128xf32>
    %187 = vector.shape_cast %186 : vector<1x8x128xf32> to vector<8x128xf32>
    %cst_57 = arith.constant dense<0.000000e+00> : vector<8x256xf32>
    %188 = tpu.matmul %180, %22, %cst_57 {dimension_numbers = #tpu.dot_dimension_numbers<[1], [0], [0], [1], [0, 0, 1, 1], [], []>} : vector<8x32xf32>, vector<32x256xf32>, vector<8x256xf32> -> vector<8x256xf32>
    %189 = vector.extract_strided_slice %188 {offsets = [0, 0], sizes = [8, 128], strides = [1, 1]} : vector<8x256xf32> to vector<8x128xf32>
    %190 = vector.extract_strided_slice %188 {offsets = [0, 128], sizes = [8, 128], strides = [1, 1]} : vector<8x256xf32> to vector<8x128xf32>
    %191 = vector.shape_cast %3 : vector<8x1xi1> to vector<8x1xi1>
    %192 = vector.broadcast %191 : vector<8x1xi1> to vector<8x128xi1>
    %193 = arith.select %192, %189, %190 : vector<8x128xi1>, vector<8x128xf32>
    %194 = arith.addf %187, %193 : vector<8x128xf32>
    %cst_58 = arith.constant 5.000000e-01 : f32
    %195 = vector.broadcast %cst_58 : f32 to vector<8x128xf32>
    %196 = arith.mulf %195, %194 : vector<8x128xf32>
    %197 = arith.select %9, %194, %196 : vector<8x128xi1>, vector<8x128xf32>
    %198 = math.tanh %197 : vector<8x128xf32>
    %cst_59 = arith.constant 5.000000e-01 : f32
    %199 = vector.broadcast %cst_59 : f32 to vector<8x128xf32>
    %200 = arith.mulf %199, %198 : vector<8x128xf32>
    %cst_60 = arith.constant 5.000000e-01 : f32
    %201 = vector.broadcast %cst_60 : f32 to vector<8x128xf32>
    %202 = arith.addf %200, %201 : vector<8x128xf32>
    %203 = arith.select %9, %198, %202 : vector<8x128xi1>, vector<8x128xf32>
    %204 = vector.extract_strided_slice %203 {offsets = [0, 0], sizes = [8, 32], strides = [1, 1]} : vector<8x128xf32> to vector<8x32xf32>
    %205 = vector.extract_strided_slice %203 {offsets = [0, 32], sizes = [8, 32], strides = [1, 1]} : vector<8x128xf32> to vector<8x32xf32>
    %206 = vector.extract_strided_slice %203 {offsets = [0, 64], sizes = [8, 32], strides = [1, 1]} : vector<8x128xf32> to vector<8x32xf32>
    %207 = vector.extract_strided_slice %203 {offsets = [0, 96], sizes = [8, 32], strides = [1, 1]} : vector<8x128xf32> to vector<8x32xf32>
    %208 = arith.mulf %205, %183 : vector<8x32xf32>
    %209 = arith.mulf %204, %206 : vector<8x32xf32>
    %210 = arith.addf %208, %209 : vector<8x32xf32>
    %211 = math.tanh %210 : vector<8x32xf32>
    %212 = arith.mulf %207, %211 : vector<8x32xf32>
    %213 = vector.broadcast %c3_i32 : i32 to vector<8x1xi32>
    %214 = vector.broadcast %184 : i32 to vector<8x1xi32>
    %215 = arith.select %3, %213, %214 : vector<8x1xi1>, vector<8x1xi32>
    %216 = arith.cmpi slt, %215, %0 : vector<8x1xi32>
    %cst_61 = arith.constant 0.000000e+00 : f32
    %217 = vector.shape_cast %216 : vector<8x1xi1> to vector<8x1xi1>
    %218 = vector.broadcast %217 : vector<8x1xi1> to vector<8x32xi1>
    %219 = vector.broadcast %cst_61 : f32 to vector<8x32xf32>
    %220 = arith.select %218, %212, %219 : vector<8x32xi1>, vector<8x32xf32>
    %221 = vector.extract_strided_slice %220 {offsets = [0, 0], sizes = [4, 32], strides = [1, 1]} : vector<8x32xf32> to vector<4x32xf32>
    %222 = arith.index_cast %c3_i32 : i32 to index
    %c0_62 = arith.constant 0 : index
    %c0_63 = arith.constant 0 : index
    %223 = vector.load %arg8[%222, %c0_62, %c0_63] : memref<8x4x64xf32, #tpu.memory_space<vmem>>, vector<1x4x32xf32>
    %224 = vector.shape_cast %223 : vector<1x4x32xf32> to vector<4x32xf32>
    %225 = vector.shape_cast %221 : vector<4x32xf32> to vector<1x4x32xf32>
    tpu.vector_store %arg8[%222, %c0_62, %c0_63], %225 {strides = array<i32>} : memref<8x4x64xf32, #tpu.memory_space<vmem>>, vector<1x4x32xf32>,
    %226 = vector.extract_strided_slice %220 {offsets = [4, 0], sizes = [4, 32], strides = [1, 1]} : vector<8x32xf32> to vector<4x32xf32>
    %227 = arith.index_cast %184 : i32 to index
    %c0_64 = arith.constant 0 : index
    %c32_65 = arith.constant 32 : index
    %228 = vector.load %arg8[%227, %c0_64, %c32_65] : memref<8x4x64xf32, #tpu.memory_space<vmem>>, vector<1x4x32xf32>
    %229 = vector.shape_cast %228 : vector<1x4x32xf32> to vector<4x32xf32>
    %230 = vector.shape_cast %226 : vector<4x32xf32> to vector<1x4x32xf32>
    tpu.vector_store %arg8[%227, %c0_64, %c32_65], %230 {strides = array<i32>} : memref<8x4x64xf32, #tpu.memory_space<vmem>>, vector<1x4x32xf32>,
    %231 = vector.shape_cast %216 : vector<8x1xi1> to vector<8x1xi1>
    %232 = vector.broadcast %231 : vector<8x1xi1> to vector<8x32xi1>
    %233 = arith.select %232, %212, %180 : vector<8x32xi1>, vector<8x32xf32>
    %234 = vector.shape_cast %216 : vector<8x1xi1> to vector<8x1xi1>
    %235 = vector.broadcast %234 : vector<8x1xi1> to vector<8x32xi1>
    %236 = arith.select %235, %210, %183 : vector<8x32xi1>, vector<8x32xf32>
    %c4_i32_66 = arith.constant 4 : i32
    %c7_i32_67 = arith.constant 7 : i32
    %237 = arith.subi %c7_i32_67, %c4_i32_66 : i32
    %238 = arith.index_cast %c4_i32_66 : i32 to index
    %c0_68 = arith.constant 0 : index
    %c0_69 = arith.constant 0 : index
    %239 = vector.load %arg9[%238, %c0_68, %c0_69] : memref<8x8x128xf32, #tpu.memory_space<vmem>>, vector<1x8x128xf32>
    %240 = vector.shape_cast %239 : vector<1x8x128xf32> to vector<8x128xf32>
    %cst_70 = arith.constant dense<0.000000e+00> : vector<8x256xf32>
    %241 = tpu.matmul %233, %22, %cst_70 {dimension_numbers = #tpu.dot_dimension_numbers<[1], [0], [0], [1], [0, 0, 1, 1], [], []>} : vector<8x32xf32>, vector<32x256xf32>, vector<8x256xf32> -> vector<8x256xf32>
    %242 = vector.extract_strided_slice %241 {offsets = [0, 0], sizes = [8, 128], strides = [1, 1]} : vector<8x256xf32> to vector<8x128xf32>
    %243 = vector.extract_strided_slice %241 {offsets = [0, 128], sizes = [8, 128], strides = [1, 1]} : vector<8x256xf32> to vector<8x128xf32>
    %244 = vector.shape_cast %3 : vector<8x1xi1> to vector<8x1xi1>
    %245 = vector.broadcast %244 : vector<8x1xi1> to vector<8x128xi1>
    %246 = arith.select %245, %242, %243 : vector<8x128xi1>, vector<8x128xf32>
    %247 = arith.addf %240, %246 : vector<8x128xf32>
    %cst_71 = arith.constant 5.000000e-01 : f32
    %248 = vector.broadcast %cst_71 : f32 to vector<8x128xf32>
    %249 = arith.mulf %248, %247 : vector<8x128xf32>
    %250 = arith.select %9, %247, %249 : vector<8x128xi1>, vector<8x128xf32>
    %251 = math.tanh %250 : vector<8x128xf32>
    %cst_72 = arith.constant 5.000000e-01 : f32
    %252 = vector.broadcast %cst_72 : f32 to vector<8x128xf32>
    %253 = arith.mulf %252, %251 : vector<8x128xf32>
    %cst_73 = arith.constant 5.000000e-01 : f32
    %254 = vector.broadcast %cst_73 : f32 to vector<8x128xf32>
    %255 = arith.addf %253, %254 : vector<8x128xf32>
    %256 = arith.select %9, %251, %255 : vector<8x128xi1>, vector<8x128xf32>
    %257 = vector.extract_strided_slice %256 {offsets = [0, 0], sizes = [8, 32], strides = [1, 1]} : vector<8x128xf32> to vector<8x32xf32>
    %258 = vector.extract_strided_slice %256 {offsets = [0, 32], sizes = [8, 32], strides = [1, 1]} : vector<8x128xf32> to vector<8x32xf32>
    %259 = vector.extract_strided_slice %256 {offsets = [0, 64], sizes = [8, 32], strides = [1, 1]} : vector<8x128xf32> to vector<8x32xf32>
    %260 = vector.extract_strided_slice %256 {offsets = [0, 96], sizes = [8, 32], strides = [1, 1]} : vector<8x128xf32> to vector<8x32xf32>
    %261 = arith.mulf %258, %236 : vector<8x32xf32>
    %262 = arith.mulf %257, %259 : vector<8x32xf32>
    %263 = arith.addf %261, %262 : vector<8x32xf32>
    %264 = math.tanh %263 : vector<8x32xf32>
    %265 = arith.mulf %260, %264 : vector<8x32xf32>
    %266 = vector.broadcast %c4_i32_66 : i32 to vector<8x1xi32>
    %267 = vector.broadcast %237 : i32 to vector<8x1xi32>
    %268 = arith.select %3, %266, %267 : vector<8x1xi1>, vector<8x1xi32>
    %269 = arith.cmpi slt, %268, %0 : vector<8x1xi32>
    %cst_74 = arith.constant 0.000000e+00 : f32
    %270 = vector.shape_cast %269 : vector<8x1xi1> to vector<8x1xi1>
    %271 = vector.broadcast %270 : vector<8x1xi1> to vector<8x32xi1>
    %272 = vector.broadcast %cst_74 : f32 to vector<8x32xf32>
    %273 = arith.select %271, %265, %272 : vector<8x32xi1>, vector<8x32xf32>
    %274 = vector.extract_strided_slice %273 {offsets = [0, 0], sizes = [4, 32], strides = [1, 1]} : vector<8x32xf32> to vector<4x32xf32>
    %275 = arith.index_cast %c4_i32_66 : i32 to index
    %c0_75 = arith.constant 0 : index
    %c0_76 = arith.constant 0 : index
    %276 = vector.load %arg8[%275, %c0_75, %c0_76] : memref<8x4x64xf32, #tpu.memory_space<vmem>>, vector<1x4x32xf32>
    %277 = vector.shape_cast %276 : vector<1x4x32xf32> to vector<4x32xf32>
    %278 = vector.shape_cast %274 : vector<4x32xf32> to vector<1x4x32xf32>
    tpu.vector_store %arg8[%275, %c0_75, %c0_76], %278 {strides = array<i32>} : memref<8x4x64xf32, #tpu.memory_space<vmem>>, vector<1x4x32xf32>,
    %279 = vector.extract_strided_slice %273 {offsets = [4, 0], sizes = [4, 32], strides = [1, 1]} : vector<8x32xf32> to vector<4x32xf32>
    %280 = arith.index_cast %237 : i32 to index
    %c0_77 = arith.constant 0 : index
    %c32_78 = arith.constant 32 : index
    %281 = vector.load %arg8[%280, %c0_77, %c32_78] : memref<8x4x64xf32, #tpu.memory_space<vmem>>, vector<1x4x32xf32>
    %282 = vector.shape_cast %281 : vector<1x4x32xf32> to vector<4x32xf32>
    %283 = vector.shape_cast %279 : vector<4x32xf32> to vector<1x4x32xf32>
    tpu.vector_store %arg8[%280, %c0_77, %c32_78], %283 {strides = array<i32>} : memref<8x4x64xf32, #tpu.memory_space<vmem>>, vector<1x4x32xf32>,
    %284 = vector.shape_cast %269 : vector<8x1xi1> to vector<8x1xi1>
    %285 = vector.broadcast %284 : vector<8x1xi1> to vector<8x32xi1>
    %286 = arith.select %285, %265, %233 : vector<8x32xi1>, vector<8x32xf32>
    %287 = vector.shape_cast %269 : vector<8x1xi1> to vector<8x1xi1>
    %288 = vector.broadcast %287 : vector<8x1xi1> to vector<8x32xi1>
    %289 = arith.select %288, %263, %236 : vector<8x32xi1>, vector<8x32xf32>
    %c5_i32 = arith.constant 5 : i32
    %c7_i32_79 = arith.constant 7 : i32
    %290 = arith.subi %c7_i32_79, %c5_i32 : i32
    %291 = arith.index_cast %c5_i32 : i32 to index
    %c0_80 = arith.constant 0 : index
    %c0_81 = arith.constant 0 : index
    %292 = vector.load %arg9[%291, %c0_80, %c0_81] : memref<8x8x128xf32, #tpu.memory_space<vmem>>, vector<1x8x128xf32>
    %293 = vector.shape_cast %292 : vector<1x8x128xf32> to vector<8x128xf32>
    %cst_82 = arith.constant dense<0.000000e+00> : vector<8x256xf32>
    %294 = tpu.matmul %286, %22, %cst_82 {dimension_numbers = #tpu.dot_dimension_numbers<[1], [0], [0], [1], [0, 0, 1, 1], [], []>} : vector<8x32xf32>, vector<32x256xf32>, vector<8x256xf32> -> vector<8x256xf32>
    %295 = vector.extract_strided_slice %294 {offsets = [0, 0], sizes = [8, 128], strides = [1, 1]} : vector<8x256xf32> to vector<8x128xf32>
    %296 = vector.extract_strided_slice %294 {offsets = [0, 128], sizes = [8, 128], strides = [1, 1]} : vector<8x256xf32> to vector<8x128xf32>
    %297 = vector.shape_cast %3 : vector<8x1xi1> to vector<8x1xi1>
    %298 = vector.broadcast %297 : vector<8x1xi1> to vector<8x128xi1>
    %299 = arith.select %298, %295, %296 : vector<8x128xi1>, vector<8x128xf32>
    %300 = arith.addf %293, %299 : vector<8x128xf32>
    %cst_83 = arith.constant 5.000000e-01 : f32
    %301 = vector.broadcast %cst_83 : f32 to vector<8x128xf32>
    %302 = arith.mulf %301, %300 : vector<8x128xf32>
    %303 = arith.select %9, %300, %302 : vector<8x128xi1>, vector<8x128xf32>
    %304 = math.tanh %303 : vector<8x128xf32>
    %cst_84 = arith.constant 5.000000e-01 : f32
    %305 = vector.broadcast %cst_84 : f32 to vector<8x128xf32>
    %306 = arith.mulf %305, %304 : vector<8x128xf32>
    %cst_85 = arith.constant 5.000000e-01 : f32
    %307 = vector.broadcast %cst_85 : f32 to vector<8x128xf32>
    %308 = arith.addf %306, %307 : vector<8x128xf32>
    %309 = arith.select %9, %304, %308 : vector<8x128xi1>, vector<8x128xf32>
    %310 = vector.extract_strided_slice %309 {offsets = [0, 0], sizes = [8, 32], strides = [1, 1]} : vector<8x128xf32> to vector<8x32xf32>
    %311 = vector.extract_strided_slice %309 {offsets = [0, 32], sizes = [8, 32], strides = [1, 1]} : vector<8x128xf32> to vector<8x32xf32>
    %312 = vector.extract_strided_slice %309 {offsets = [0, 64], sizes = [8, 32], strides = [1, 1]} : vector<8x128xf32> to vector<8x32xf32>
    %313 = vector.extract_strided_slice %309 {offsets = [0, 96], sizes = [8, 32], strides = [1, 1]} : vector<8x128xf32> to vector<8x32xf32>
    %314 = arith.mulf %311, %289 : vector<8x32xf32>
    %315 = arith.mulf %310, %312 : vector<8x32xf32>
    %316 = arith.addf %314, %315 : vector<8x32xf32>
    %317 = math.tanh %316 : vector<8x32xf32>
    %318 = arith.mulf %313, %317 : vector<8x32xf32>
    %319 = vector.broadcast %c5_i32 : i32 to vector<8x1xi32>
    %320 = vector.broadcast %290 : i32 to vector<8x1xi32>
    %321 = arith.select %3, %319, %320 : vector<8x1xi1>, vector<8x1xi32>
    %322 = arith.cmpi slt, %321, %0 : vector<8x1xi32>
    %cst_86 = arith.constant 0.000000e+00 : f32
    %323 = vector.shape_cast %322 : vector<8x1xi1> to vector<8x1xi1>
    %324 = vector.broadcast %323 : vector<8x1xi1> to vector<8x32xi1>
    %325 = vector.broadcast %cst_86 : f32 to vector<8x32xf32>
    %326 = arith.select %324, %318, %325 : vector<8x32xi1>, vector<8x32xf32>
    %327 = vector.extract_strided_slice %326 {offsets = [0, 0], sizes = [4, 32], strides = [1, 1]} : vector<8x32xf32> to vector<4x32xf32>
    %328 = arith.index_cast %c5_i32 : i32 to index
    %c0_87 = arith.constant 0 : index
    %c0_88 = arith.constant 0 : index
    %329 = vector.load %arg8[%328, %c0_87, %c0_88] : memref<8x4x64xf32, #tpu.memory_space<vmem>>, vector<1x4x32xf32>
    %330 = vector.shape_cast %329 : vector<1x4x32xf32> to vector<4x32xf32>
    %331 = vector.shape_cast %327 : vector<4x32xf32> to vector<1x4x32xf32>
    tpu.vector_store %arg8[%328, %c0_87, %c0_88], %331 {strides = array<i32>} : memref<8x4x64xf32, #tpu.memory_space<vmem>>, vector<1x4x32xf32>,
    %332 = vector.extract_strided_slice %326 {offsets = [4, 0], sizes = [4, 32], strides = [1, 1]} : vector<8x32xf32> to vector<4x32xf32>
    %333 = arith.index_cast %290 : i32 to index
    %c0_89 = arith.constant 0 : index
    %c32_90 = arith.constant 32 : index
    %334 = vector.load %arg8[%333, %c0_89, %c32_90] : memref<8x4x64xf32, #tpu.memory_space<vmem>>, vector<1x4x32xf32>
    %335 = vector.shape_cast %334 : vector<1x4x32xf32> to vector<4x32xf32>
    %336 = vector.shape_cast %332 : vector<4x32xf32> to vector<1x4x32xf32>
    tpu.vector_store %arg8[%333, %c0_89, %c32_90], %336 {strides = array<i32>} : memref<8x4x64xf32, #tpu.memory_space<vmem>>, vector<1x4x32xf32>,
    %337 = vector.shape_cast %322 : vector<8x1xi1> to vector<8x1xi1>
    %338 = vector.broadcast %337 : vector<8x1xi1> to vector<8x32xi1>
    %339 = arith.select %338, %318, %286 : vector<8x32xi1>, vector<8x32xf32>
    %340 = vector.shape_cast %322 : vector<8x1xi1> to vector<8x1xi1>
    %341 = vector.broadcast %340 : vector<8x1xi1> to vector<8x32xi1>
    %342 = arith.select %341, %316, %289 : vector<8x32xi1>, vector<8x32xf32>
    %c6_i32 = arith.constant 6 : i32
    %c7_i32_91 = arith.constant 7 : i32
    %343 = arith.subi %c7_i32_91, %c6_i32 : i32
    %344 = arith.index_cast %c6_i32 : i32 to index
    %c0_92 = arith.constant 0 : index
    %c0_93 = arith.constant 0 : index
    %345 = vector.load %arg9[%344, %c0_92, %c0_93] : memref<8x8x128xf32, #tpu.memory_space<vmem>>, vector<1x8x128xf32>
    %346 = vector.shape_cast %345 : vector<1x8x128xf32> to vector<8x128xf32>
    %cst_94 = arith.constant dense<0.000000e+00> : vector<8x256xf32>
    %347 = tpu.matmul %339, %22, %cst_94 {dimension_numbers = #tpu.dot_dimension_numbers<[1], [0], [0], [1], [0, 0, 1, 1], [], []>} : vector<8x32xf32>, vector<32x256xf32>, vector<8x256xf32> -> vector<8x256xf32>
    %348 = vector.extract_strided_slice %347 {offsets = [0, 0], sizes = [8, 128], strides = [1, 1]} : vector<8x256xf32> to vector<8x128xf32>
    %349 = vector.extract_strided_slice %347 {offsets = [0, 128], sizes = [8, 128], strides = [1, 1]} : vector<8x256xf32> to vector<8x128xf32>
    %350 = vector.shape_cast %3 : vector<8x1xi1> to vector<8x1xi1>
    %351 = vector.broadcast %350 : vector<8x1xi1> to vector<8x128xi1>
    %352 = arith.select %351, %348, %349 : vector<8x128xi1>, vector<8x128xf32>
    %353 = arith.addf %346, %352 : vector<8x128xf32>
    %cst_95 = arith.constant 5.000000e-01 : f32
    %354 = vector.broadcast %cst_95 : f32 to vector<8x128xf32>
    %355 = arith.mulf %354, %353 : vector<8x128xf32>
    %356 = arith.select %9, %353, %355 : vector<8x128xi1>, vector<8x128xf32>
    %357 = math.tanh %356 : vector<8x128xf32>
    %cst_96 = arith.constant 5.000000e-01 : f32
    %358 = vector.broadcast %cst_96 : f32 to vector<8x128xf32>
    %359 = arith.mulf %358, %357 : vector<8x128xf32>
    %cst_97 = arith.constant 5.000000e-01 : f32
    %360 = vector.broadcast %cst_97 : f32 to vector<8x128xf32>
    %361 = arith.addf %359, %360 : vector<8x128xf32>
    %362 = arith.select %9, %357, %361 : vector<8x128xi1>, vector<8x128xf32>
    %363 = vector.extract_strided_slice %362 {offsets = [0, 0], sizes = [8, 32], strides = [1, 1]} : vector<8x128xf32> to vector<8x32xf32>
    %364 = vector.extract_strided_slice %362 {offsets = [0, 32], sizes = [8, 32], strides = [1, 1]} : vector<8x128xf32> to vector<8x32xf32>
    %365 = vector.extract_strided_slice %362 {offsets = [0, 64], sizes = [8, 32], strides = [1, 1]} : vector<8x128xf32> to vector<8x32xf32>
    %366 = vector.extract_strided_slice %362 {offsets = [0, 96], sizes = [8, 32], strides = [1, 1]} : vector<8x128xf32> to vector<8x32xf32>
    %367 = arith.mulf %364, %342 : vector<8x32xf32>
    %368 = arith.mulf %363, %365 : vector<8x32xf32>
    %369 = arith.addf %367, %368 : vector<8x32xf32>
    %370 = math.tanh %369 : vector<8x32xf32>
    %371 = arith.mulf %366, %370 : vector<8x32xf32>
    %372 = vector.broadcast %c6_i32 : i32 to vector<8x1xi32>
    %373 = vector.broadcast %343 : i32 to vector<8x1xi32>
    %374 = arith.select %3, %372, %373 : vector<8x1xi1>, vector<8x1xi32>
    %375 = arith.cmpi slt, %374, %0 : vector<8x1xi32>
    %cst_98 = arith.constant 0.000000e+00 : f32
    %376 = vector.shape_cast %375 : vector<8x1xi1> to vector<8x1xi1>
    %377 = vector.broadcast %376 : vector<8x1xi1> to vector<8x32xi1>
    %378 = vector.broadcast %cst_98 : f32 to vector<8x32xf32>
    %379 = arith.select %377, %371, %378 : vector<8x32xi1>, vector<8x32xf32>
    %380 = vector.extract_strided_slice %379 {offsets = [0, 0], sizes = [4, 32], strides = [1, 1]} : vector<8x32xf32> to vector<4x32xf32>
    %381 = arith.index_cast %c6_i32 : i32 to index
    %c0_99 = arith.constant 0 : index
    %c0_100 = arith.constant 0 : index
    %382 = vector.load %arg8[%381, %c0_99, %c0_100] : memref<8x4x64xf32, #tpu.memory_space<vmem>>, vector<1x4x32xf32>
    %383 = vector.shape_cast %382 : vector<1x4x32xf32> to vector<4x32xf32>
    %384 = vector.shape_cast %380 : vector<4x32xf32> to vector<1x4x32xf32>
    tpu.vector_store %arg8[%381, %c0_99, %c0_100], %384 {strides = array<i32>} : memref<8x4x64xf32, #tpu.memory_space<vmem>>, vector<1x4x32xf32>,
    %385 = vector.extract_strided_slice %379 {offsets = [4, 0], sizes = [4, 32], strides = [1, 1]} : vector<8x32xf32> to vector<4x32xf32>
    %386 = arith.index_cast %343 : i32 to index
    %c0_101 = arith.constant 0 : index
    %c32_102 = arith.constant 32 : index
    %387 = vector.load %arg8[%386, %c0_101, %c32_102] : memref<8x4x64xf32, #tpu.memory_space<vmem>>, vector<1x4x32xf32>
    %388 = vector.shape_cast %387 : vector<1x4x32xf32> to vector<4x32xf32>
    %389 = vector.shape_cast %385 : vector<4x32xf32> to vector<1x4x32xf32>
    tpu.vector_store %arg8[%386, %c0_101, %c32_102], %389 {strides = array<i32>} : memref<8x4x64xf32, #tpu.memory_space<vmem>>, vector<1x4x32xf32>,
    %390 = vector.shape_cast %375 : vector<8x1xi1> to vector<8x1xi1>
    %391 = vector.broadcast %390 : vector<8x1xi1> to vector<8x32xi1>
    %392 = arith.select %391, %371, %339 : vector<8x32xi1>, vector<8x32xf32>
    %393 = vector.shape_cast %375 : vector<8x1xi1> to vector<8x1xi1>
    %394 = vector.broadcast %393 : vector<8x1xi1> to vector<8x32xi1>
    %395 = arith.select %394, %369, %342 : vector<8x32xi1>, vector<8x32xf32>
    %c7_i32_103 = arith.constant 7 : i32
    %c7_i32_104 = arith.constant 7 : i32
    %396 = arith.subi %c7_i32_104, %c7_i32_103 : i32
    %397 = arith.index_cast %c7_i32_103 : i32 to index
    %c0_105 = arith.constant 0 : index
    %c0_106 = arith.constant 0 : index
    %398 = vector.load %arg9[%397, %c0_105, %c0_106] : memref<8x8x128xf32, #tpu.memory_space<vmem>>, vector<1x8x128xf32>
    %399 = vector.shape_cast %398 : vector<1x8x128xf32> to vector<8x128xf32>
    %cst_107 = arith.constant dense<0.000000e+00> : vector<8x256xf32>
    %400 = tpu.matmul %392, %22, %cst_107 {dimension_numbers = #tpu.dot_dimension_numbers<[1], [0], [0], [1], [0, 0, 1, 1], [], []>} : vector<8x32xf32>, vector<32x256xf32>, vector<8x256xf32> -> vector<8x256xf32>
    %401 = vector.extract_strided_slice %400 {offsets = [0, 0], sizes = [8, 128], strides = [1, 1]} : vector<8x256xf32> to vector<8x128xf32>
    %402 = vector.extract_strided_slice %400 {offsets = [0, 128], sizes = [8, 128], strides = [1, 1]} : vector<8x256xf32> to vector<8x128xf32>
    %403 = vector.shape_cast %3 : vector<8x1xi1> to vector<8x1xi1>
    %404 = vector.broadcast %403 : vector<8x1xi1> to vector<8x128xi1>
    %405 = arith.select %404, %401, %402 : vector<8x128xi1>, vector<8x128xf32>
    %406 = arith.addf %399, %405 : vector<8x128xf32>
    %cst_108 = arith.constant 5.000000e-01 : f32
    %407 = vector.broadcast %cst_108 : f32 to vector<8x128xf32>
    %408 = arith.mulf %407, %406 : vector<8x128xf32>
    %409 = arith.select %9, %406, %408 : vector<8x128xi1>, vector<8x128xf32>
    %410 = math.tanh %409 : vector<8x128xf32>
    %cst_109 = arith.constant 5.000000e-01 : f32
    %411 = vector.broadcast %cst_109 : f32 to vector<8x128xf32>
    %412 = arith.mulf %411, %410 : vector<8x128xf32>
    %cst_110 = arith.constant 5.000000e-01 : f32
    %413 = vector.broadcast %cst_110 : f32 to vector<8x128xf32>
    %414 = arith.addf %412, %413 : vector<8x128xf32>
    %415 = arith.select %9, %410, %414 : vector<8x128xi1>, vector<8x128xf32>
    %416 = vector.extract_strided_slice %415 {offsets = [0, 0], sizes = [8, 32], strides = [1, 1]} : vector<8x128xf32> to vector<8x32xf32>
    %417 = vector.extract_strided_slice %415 {offsets = [0, 32], sizes = [8, 32], strides = [1, 1]} : vector<8x128xf32> to vector<8x32xf32>
    %418 = vector.extract_strided_slice %415 {offsets = [0, 64], sizes = [8, 32], strides = [1, 1]} : vector<8x128xf32> to vector<8x32xf32>
    %419 = vector.extract_strided_slice %415 {offsets = [0, 96], sizes = [8, 32], strides = [1, 1]} : vector<8x128xf32> to vector<8x32xf32>
    %420 = arith.mulf %417, %395 : vector<8x32xf32>
    %421 = arith.mulf %416, %418 : vector<8x32xf32>
    %422 = arith.addf %420, %421 : vector<8x32xf32>
    %423 = math.tanh %422 : vector<8x32xf32>
    %424 = arith.mulf %419, %423 : vector<8x32xf32>
    %425 = vector.broadcast %c7_i32_103 : i32 to vector<8x1xi32>
    %426 = vector.broadcast %396 : i32 to vector<8x1xi32>
    %427 = arith.select %3, %425, %426 : vector<8x1xi1>, vector<8x1xi32>
    %428 = arith.cmpi slt, %427, %0 : vector<8x1xi32>
    %cst_111 = arith.constant 0.000000e+00 : f32
    %429 = vector.shape_cast %428 : vector<8x1xi1> to vector<8x1xi1>
    %430 = vector.broadcast %429 : vector<8x1xi1> to vector<8x32xi1>
    %431 = vector.broadcast %cst_111 : f32 to vector<8x32xf32>
    %432 = arith.select %430, %424, %431 : vector<8x32xi1>, vector<8x32xf32>
    %433 = vector.extract_strided_slice %432 {offsets = [0, 0], sizes = [4, 32], strides = [1, 1]} : vector<8x32xf32> to vector<4x32xf32>
    %434 = arith.index_cast %c7_i32_103 : i32 to index
    %c0_112 = arith.constant 0 : index
    %c0_113 = arith.constant 0 : index
    %435 = vector.load %arg8[%434, %c0_112, %c0_113] : memref<8x4x64xf32, #tpu.memory_space<vmem>>, vector<1x4x32xf32>
    %436 = vector.shape_cast %435 : vector<1x4x32xf32> to vector<4x32xf32>
    %437 = vector.shape_cast %433 : vector<4x32xf32> to vector<1x4x32xf32>
    tpu.vector_store %arg8[%434, %c0_112, %c0_113], %437 {strides = array<i32>} : memref<8x4x64xf32, #tpu.memory_space<vmem>>, vector<1x4x32xf32>,
    %438 = vector.extract_strided_slice %432 {offsets = [4, 0], sizes = [4, 32], strides = [1, 1]} : vector<8x32xf32> to vector<4x32xf32>
    %439 = arith.index_cast %396 : i32 to index
    %c0_114 = arith.constant 0 : index
    %c32_115 = arith.constant 32 : index
    %440 = vector.load %arg8[%439, %c0_114, %c32_115] : memref<8x4x64xf32, #tpu.memory_space<vmem>>, vector<1x4x32xf32>
    %441 = vector.shape_cast %440 : vector<1x4x32xf32> to vector<4x32xf32>
    %442 = vector.shape_cast %438 : vector<4x32xf32> to vector<1x4x32xf32>
    tpu.vector_store %arg8[%439, %c0_114, %c32_115], %442 {strides = array<i32>} : memref<8x4x64xf32, #tpu.memory_space<vmem>>, vector<1x4x32xf32>,
    %443 = vector.shape_cast %428 : vector<8x1xi1> to vector<8x1xi1>
    %444 = vector.broadcast %443 : vector<8x1xi1> to vector<8x32xi1>
    %445 = arith.select %444, %424, %392 : vector<8x32xi1>, vector<8x32xf32>
    %446 = vector.shape_cast %428 : vector<8x1xi1> to vector<8x1xi1>
    %447 = vector.broadcast %446 : vector<8x1xi1> to vector<8x32xi1>
    %448 = arith.select %447, %422, %395 : vector<8x32xi1>, vector<8x32xf32>
    %c8_i32 = arith.constant 8 : i32
    %c0_116 = arith.constant 0 : index
    %c0_117 = arith.constant 0 : index
    %c0_118 = arith.constant 0 : index
    %449 = vector.load %arg8[%c0_116, %c0_117, %c0_118] : memref<8x4x64xf32, #tpu.memory_space<vmem>>, vector<8x4x64xf32>
    %450 = vector.shape_cast %449 : vector<8x4x64xf32> to vector<32x64xf32>
    %c0_119 = arith.constant 0 : index
    %c0_120 = arith.constant 0 : index
    %451 = vector.load %arg5[%c0_119, %c0_120] : memref<64x256xf32, #tpu.memory_space<vmem>>, vector<64x256xf32>
    %cst_121 = arith.constant dense<0.000000e+00> : vector<32x256xf32>
    %452 = tpu.matmul %450, %451, %cst_121 {dimension_numbers = #tpu.dot_dimension_numbers<[1], [0], [0], [1], [0, 0, 1, 1], [], []>} : vector<32x64xf32>, vector<64x256xf32>, vector<32x256xf32> -> vector<32x256xf32>
    %c0_122 = arith.constant 0 : index
    %c0_123 = arith.constant 0 : index
    %453 = vector.load %arg6[%c0_122, %c0_123] : memref<1x256xf32, #tpu.memory_space<vmem>>, vector<1x256xf32>
    %454 = vector.broadcast %453 : vector<1x256xf32> to vector<32x256xf32>
    %455 = arith.addf %452, %454 : vector<32x256xf32>
    %456 = vector.shape_cast %455 : vector<32x256xf32> to vector<8x4x256xf32>
    %457 = vector.extract_strided_slice %456 {offsets = [0, 0, 0], sizes = [8, 4, 128], strides = [1, 1, 1]} : vector<8x4x256xf32> to vector<8x4x128xf32>
    %c0_124 = arith.constant 0 : index
    %c0_125 = arith.constant 0 : index
    %c0_126 = arith.constant 0 : index
    %458 = vector.load %arg9[%c0_124, %c0_125, %c0_126] : memref<8x8x128xf32, #tpu.memory_space<vmem>>, vector<8x4x128xf32>
    tpu.vector_store %arg9[%c0_124, %c0_125, %c0_126], %457 {strides = array<i32>} : memref<8x8x128xf32, #tpu.memory_space<vmem>>, vector<8x4x128xf32>,
    %459 = vector.extract_strided_slice %456 {offsets = [0, 0, 128], sizes = [8, 4, 128], strides = [1, 1, 1]} : vector<8x4x256xf32> to vector<8x4x128xf32>
    %c0_127 = arith.constant 0 : index
    %c4_128 = arith.constant 4 : index
    %c0_129 = arith.constant 0 : index
    %460 = vector.load %arg9[%c0_127, %c4_128, %c0_129] : memref<8x8x128xf32, #tpu.memory_space<vmem>>, vector<8x4x128xf32>
    tpu.vector_store %arg9[%c0_127, %c4_128, %c0_129], %459 {strides = array<i32>} : memref<8x8x128xf32, #tpu.memory_space<vmem>>, vector<8x4x128xf32>,
    %c0_i32_130 = arith.constant 0 : i32
    %c4_i32_131 = arith.constant 4 : i32
    %461 = arith.addi %c0_i32_130, %c4_i32_131 : i32
    %c1_i32_132 = arith.constant 1 : i32
    scf.for %arg10 = %c0_i32_130 to %461 step %c1_i32_132  : i32 {
      %c7_i32_243 = arith.constant 7 : i32
      %889 = arith.subi %c7_i32_243, %arg10 : i32
      %890 = arith.index_cast %arg10 : i32 to index
      %c0_244 = arith.constant 0 : index
      %c0_245 = arith.constant 0 : index
      %891 = vector.load %arg9[%890, %c0_244, %c0_245] : memref<8x8x128xf32, #tpu.memory_space<vmem>>, vector<1x8x128xf32>
      %892 = vector.shape_cast %891 : vector<1x8x128xf32> to vector<8x128xf32>
      %893 = arith.index_cast %889 : i32 to index
      %c0_246 = arith.constant 0 : index
      %c0_247 = arith.constant 0 : index
      %894 = vector.load %arg9[%893, %c0_246, %c0_247] : memref<8x8x128xf32, #tpu.memory_space<vmem>>, vector<1x8x128xf32>
      %895 = vector.shape_cast %894 : vector<1x8x128xf32> to vector<8x128xf32>
      %896 = vector.shape_cast %3 : vector<8x1xi1> to vector<8x1xi1>
      %897 = vector.broadcast %896 : vector<8x1xi1> to vector<8x128xi1>
      %898 = arith.select %897, %892, %895 : vector<8x128xi1>, vector<8x128xf32>
      %899 = arith.index_cast %arg10 : i32 to index
      %c0_248 = arith.constant 0 : index
      %c0_249 = arith.constant 0 : index
      %900 = vector.load %arg9[%899, %c0_248, %c0_249] : memref<8x8x128xf32, #tpu.memory_space<vmem>>, vector<1x8x128xf32>
      %901 = vector.shape_cast %900 : vector<1x8x128xf32> to vector<8x128xf32>
      %902 = vector.shape_cast %898 : vector<8x128xf32> to vector<1x8x128xf32>
      tpu.vector_store %arg9[%899, %c0_248, %c0_249], %902 {strides = array<i32>} : memref<8x8x128xf32, #tpu.memory_space<vmem>>, vector<1x8x128xf32>,
      %903 = vector.shape_cast %3 : vector<8x1xi1> to vector<8x1xi1>
      %904 = vector.broadcast %903 : vector<8x1xi1> to vector<8x128xi1>
      %905 = arith.select %904, %895, %892 : vector<8x128xi1>, vector<8x128xf32>
      %906 = arith.index_cast %889 : i32 to index
      %c0_250 = arith.constant 0 : index
      %c0_251 = arith.constant 0 : index
      %907 = vector.load %arg9[%906, %c0_250, %c0_251] : memref<8x8x128xf32, #tpu.memory_space<vmem>>, vector<1x8x128xf32>
      %908 = vector.shape_cast %907 : vector<1x8x128xf32> to vector<8x128xf32>
      %909 = vector.shape_cast %905 : vector<8x128xf32> to vector<1x8x128xf32>
      tpu.vector_store %arg9[%906, %c0_250, %c0_251], %909 {strides = array<i32>} : memref<8x8x128xf32, #tpu.memory_space<vmem>>, vector<1x8x128xf32>,
    }
    %c4_i32_133 = arith.constant 4 : i32
    %c0_134 = arith.constant 0 : index
    %c0_135 = arith.constant 0 : index
    %462 = vector.load %arg7[%c0_134, %c0_135] : memref<32x256xf32, #tpu.memory_space<vmem>>, vector<32x256xf32>
    %cst_136 = arith.constant 0.000000e+00 : f32
    %463 = vector.broadcast %cst_136 : f32 to vector<8x32xf32>
    %cst_137 = arith.constant 0.000000e+00 : f32
    %464 = vector.broadcast %cst_137 : f32 to vector<8x32xf32>
    %c0_i32_138 = arith.constant 0 : i32
    %c7_i32_139 = arith.constant 7 : i32
    %465 = arith.subi %c7_i32_139, %c0_i32_138 : i32
    %466 = arith.index_cast %c0_i32_138 : i32 to index
    %c0_140 = arith.constant 0 : index
    %c0_141 = arith.constant 0 : index
    %467 = vector.load %arg9[%466, %c0_140, %c0_141] : memref<8x8x128xf32, #tpu.memory_space<vmem>>, vector<1x8x128xf32>
    %468 = vector.shape_cast %467 : vector<1x8x128xf32> to vector<8x128xf32>
    %cst_142 = arith.constant dense<0.000000e+00> : vector<8x256xf32>
    %469 = tpu.matmul %463, %462, %cst_142 {dimension_numbers = #tpu.dot_dimension_numbers<[1], [0], [0], [1], [0, 0, 1, 1], [], []>} : vector<8x32xf32>, vector<32x256xf32>, vector<8x256xf32> -> vector<8x256xf32>
    %470 = vector.extract_strided_slice %469 {offsets = [0, 0], sizes = [8, 128], strides = [1, 1]} : vector<8x256xf32> to vector<8x128xf32>
    %471 = vector.extract_strided_slice %469 {offsets = [0, 128], sizes = [8, 128], strides = [1, 1]} : vector<8x256xf32> to vector<8x128xf32>
    %472 = vector.shape_cast %3 : vector<8x1xi1> to vector<8x1xi1>
    %473 = vector.broadcast %472 : vector<8x1xi1> to vector<8x128xi1>
    %474 = arith.select %473, %470, %471 : vector<8x128xi1>, vector<8x128xf32>
    %475 = arith.addf %468, %474 : vector<8x128xf32>
    %cst_143 = arith.constant 5.000000e-01 : f32
    %476 = vector.broadcast %cst_143 : f32 to vector<8x128xf32>
    %477 = arith.mulf %476, %475 : vector<8x128xf32>
    %478 = arith.select %9, %475, %477 : vector<8x128xi1>, vector<8x128xf32>
    %479 = math.tanh %478 : vector<8x128xf32>
    %cst_144 = arith.constant 5.000000e-01 : f32
    %480 = vector.broadcast %cst_144 : f32 to vector<8x128xf32>
    %481 = arith.mulf %480, %479 : vector<8x128xf32>
    %cst_145 = arith.constant 5.000000e-01 : f32
    %482 = vector.broadcast %cst_145 : f32 to vector<8x128xf32>
    %483 = arith.addf %481, %482 : vector<8x128xf32>
    %484 = arith.select %9, %479, %483 : vector<8x128xi1>, vector<8x128xf32>
    %485 = vector.extract_strided_slice %484 {offsets = [0, 0], sizes = [8, 32], strides = [1, 1]} : vector<8x128xf32> to vector<8x32xf32>
    %486 = vector.extract_strided_slice %484 {offsets = [0, 32], sizes = [8, 32], strides = [1, 1]} : vector<8x128xf32> to vector<8x32xf32>
    %487 = vector.extract_strided_slice %484 {offsets = [0, 64], sizes = [8, 32], strides = [1, 1]} : vector<8x128xf32> to vector<8x32xf32>
    %488 = vector.extract_strided_slice %484 {offsets = [0, 96], sizes = [8, 32], strides = [1, 1]} : vector<8x128xf32> to vector<8x32xf32>
    %489 = arith.mulf %486, %464 : vector<8x32xf32>
    %490 = arith.mulf %485, %487 : vector<8x32xf32>
    %491 = arith.addf %489, %490 : vector<8x32xf32>
    %492 = math.tanh %491 : vector<8x32xf32>
    %493 = arith.mulf %488, %492 : vector<8x32xf32>
    %494 = vector.broadcast %c0_i32_138 : i32 to vector<8x1xi32>
    %495 = vector.broadcast %465 : i32 to vector<8x1xi32>
    %496 = arith.select %3, %494, %495 : vector<8x1xi1>, vector<8x1xi32>
    %497 = arith.cmpi slt, %496, %0 : vector<8x1xi32>
    %cst_146 = arith.constant 0.000000e+00 : f32
    %498 = vector.shape_cast %497 : vector<8x1xi1> to vector<8x1xi1>
    %499 = vector.broadcast %498 : vector<8x1xi1> to vector<8x32xi1>
    %500 = vector.broadcast %cst_146 : f32 to vector<8x32xf32>
    %501 = arith.select %499, %493, %500 : vector<8x32xi1>, vector<8x32xf32>
    %502 = vector.extract_strided_slice %501 {offsets = [0, 0], sizes = [4, 32], strides = [1, 1]} : vector<8x32xf32> to vector<4x32xf32>
    %503 = arith.index_cast %c0_i32_138 : i32 to index
    %c0_147 = arith.constant 0 : index
    %c0_148 = arith.constant 0 : index
    %504 = vector.load %arg8[%503, %c0_147, %c0_148] : memref<8x4x64xf32, #tpu.memory_space<vmem>>, vector<1x4x32xf32>
    %505 = vector.shape_cast %504 : vector<1x4x32xf32> to vector<4x32xf32>
    %506 = vector.shape_cast %502 : vector<4x32xf32> to vector<1x4x32xf32>
    tpu.vector_store %arg8[%503, %c0_147, %c0_148], %506 {strides = array<i32>} : memref<8x4x64xf32, #tpu.memory_space<vmem>>, vector<1x4x32xf32>,
    %507 = vector.extract_strided_slice %501 {offsets = [4, 0], sizes = [4, 32], strides = [1, 1]} : vector<8x32xf32> to vector<4x32xf32>
    %508 = arith.index_cast %465 : i32 to index
    %c0_149 = arith.constant 0 : index
    %c32_150 = arith.constant 32 : index
    %509 = vector.load %arg8[%508, %c0_149, %c32_150] : memref<8x4x64xf32, #tpu.memory_space<vmem>>, vector<1x4x32xf32>
    %510 = vector.shape_cast %509 : vector<1x4x32xf32> to vector<4x32xf32>
    %511 = vector.shape_cast %507 : vector<4x32xf32> to vector<1x4x32xf32>
    tpu.vector_store %arg8[%508, %c0_149, %c32_150], %511 {strides = array<i32>} : memref<8x4x64xf32, #tpu.memory_space<vmem>>, vector<1x4x32xf32>,
    %512 = vector.shape_cast %497 : vector<8x1xi1> to vector<8x1xi1>
    %513 = vector.broadcast %512 : vector<8x1xi1> to vector<8x32xi1>
    %514 = arith.select %513, %493, %463 : vector<8x32xi1>, vector<8x32xf32>
    %515 = vector.shape_cast %497 : vector<8x1xi1> to vector<8x1xi1>
    %516 = vector.broadcast %515 : vector<8x1xi1> to vector<8x32xi1>
    %517 = arith.select %516, %491, %464 : vector<8x32xi1>, vector<8x32xf32>
    %c1_i32_151 = arith.constant 1 : i32
    %c7_i32_152 = arith.constant 7 : i32
    %518 = arith.subi %c7_i32_152, %c1_i32_151 : i32
    %519 = arith.index_cast %c1_i32_151 : i32 to index
    %c0_153 = arith.constant 0 : index
    %c0_154 = arith.constant 0 : index
    %520 = vector.load %arg9[%519, %c0_153, %c0_154] : memref<8x8x128xf32, #tpu.memory_space<vmem>>, vector<1x8x128xf32>
    %521 = vector.shape_cast %520 : vector<1x8x128xf32> to vector<8x128xf32>
    %cst_155 = arith.constant dense<0.000000e+00> : vector<8x256xf32>
    %522 = tpu.matmul %514, %462, %cst_155 {dimension_numbers = #tpu.dot_dimension_numbers<[1], [0], [0], [1], [0, 0, 1, 1], [], []>} : vector<8x32xf32>, vector<32x256xf32>, vector<8x256xf32> -> vector<8x256xf32>
    %523 = vector.extract_strided_slice %522 {offsets = [0, 0], sizes = [8, 128], strides = [1, 1]} : vector<8x256xf32> to vector<8x128xf32>
    %524 = vector.extract_strided_slice %522 {offsets = [0, 128], sizes = [8, 128], strides = [1, 1]} : vector<8x256xf32> to vector<8x128xf32>
    %525 = vector.shape_cast %3 : vector<8x1xi1> to vector<8x1xi1>
    %526 = vector.broadcast %525 : vector<8x1xi1> to vector<8x128xi1>
    %527 = arith.select %526, %523, %524 : vector<8x128xi1>, vector<8x128xf32>
    %528 = arith.addf %521, %527 : vector<8x128xf32>
    %cst_156 = arith.constant 5.000000e-01 : f32
    %529 = vector.broadcast %cst_156 : f32 to vector<8x128xf32>
    %530 = arith.mulf %529, %528 : vector<8x128xf32>
    %531 = arith.select %9, %528, %530 : vector<8x128xi1>, vector<8x128xf32>
    %532 = math.tanh %531 : vector<8x128xf32>
    %cst_157 = arith.constant 5.000000e-01 : f32
    %533 = vector.broadcast %cst_157 : f32 to vector<8x128xf32>
    %534 = arith.mulf %533, %532 : vector<8x128xf32>
    %cst_158 = arith.constant 5.000000e-01 : f32
    %535 = vector.broadcast %cst_158 : f32 to vector<8x128xf32>
    %536 = arith.addf %534, %535 : vector<8x128xf32>
    %537 = arith.select %9, %532, %536 : vector<8x128xi1>, vector<8x128xf32>
    %538 = vector.extract_strided_slice %537 {offsets = [0, 0], sizes = [8, 32], strides = [1, 1]} : vector<8x128xf32> to vector<8x32xf32>
    %539 = vector.extract_strided_slice %537 {offsets = [0, 32], sizes = [8, 32], strides = [1, 1]} : vector<8x128xf32> to vector<8x32xf32>
    %540 = vector.extract_strided_slice %537 {offsets = [0, 64], sizes = [8, 32], strides = [1, 1]} : vector<8x128xf32> to vector<8x32xf32>
    %541 = vector.extract_strided_slice %537 {offsets = [0, 96], sizes = [8, 32], strides = [1, 1]} : vector<8x128xf32> to vector<8x32xf32>
    %542 = arith.mulf %539, %517 : vector<8x32xf32>
    %543 = arith.mulf %538, %540 : vector<8x32xf32>
    %544 = arith.addf %542, %543 : vector<8x32xf32>
    %545 = math.tanh %544 : vector<8x32xf32>
    %546 = arith.mulf %541, %545 : vector<8x32xf32>
    %547 = vector.broadcast %c1_i32_151 : i32 to vector<8x1xi32>
    %548 = vector.broadcast %518 : i32 to vector<8x1xi32>
    %549 = arith.select %3, %547, %548 : vector<8x1xi1>, vector<8x1xi32>
    %550 = arith.cmpi slt, %549, %0 : vector<8x1xi32>
    %cst_159 = arith.constant 0.000000e+00 : f32
    %551 = vector.shape_cast %550 : vector<8x1xi1> to vector<8x1xi1>
    %552 = vector.broadcast %551 : vector<8x1xi1> to vector<8x32xi1>
    %553 = vector.broadcast %cst_159 : f32 to vector<8x32xf32>
    %554 = arith.select %552, %546, %553 : vector<8x32xi1>, vector<8x32xf32>
    %555 = vector.extract_strided_slice %554 {offsets = [0, 0], sizes = [4, 32], strides = [1, 1]} : vector<8x32xf32> to vector<4x32xf32>
    %556 = arith.index_cast %c1_i32_151 : i32 to index
    %c0_160 = arith.constant 0 : index
    %c0_161 = arith.constant 0 : index
    %557 = vector.load %arg8[%556, %c0_160, %c0_161] : memref<8x4x64xf32, #tpu.memory_space<vmem>>, vector<1x4x32xf32>
    %558 = vector.shape_cast %557 : vector<1x4x32xf32> to vector<4x32xf32>
    %559 = vector.shape_cast %555 : vector<4x32xf32> to vector<1x4x32xf32>
    tpu.vector_store %arg8[%556, %c0_160, %c0_161], %559 {strides = array<i32>} : memref<8x4x64xf32, #tpu.memory_space<vmem>>, vector<1x4x32xf32>,
    %560 = vector.extract_strided_slice %554 {offsets = [4, 0], sizes = [4, 32], strides = [1, 1]} : vector<8x32xf32> to vector<4x32xf32>
    %561 = arith.index_cast %518 : i32 to index
    %c0_162 = arith.constant 0 : index
    %c32_163 = arith.constant 32 : index
    %562 = vector.load %arg8[%561, %c0_162, %c32_163] : memref<8x4x64xf32, #tpu.memory_space<vmem>>, vector<1x4x32xf32>
    %563 = vector.shape_cast %562 : vector<1x4x32xf32> to vector<4x32xf32>
    %564 = vector.shape_cast %560 : vector<4x32xf32> to vector<1x4x32xf32>
    tpu.vector_store %arg8[%561, %c0_162, %c32_163], %564 {strides = array<i32>} : memref<8x4x64xf32, #tpu.memory_space<vmem>>, vector<1x4x32xf32>,
    %565 = vector.shape_cast %550 : vector<8x1xi1> to vector<8x1xi1>
    %566 = vector.broadcast %565 : vector<8x1xi1> to vector<8x32xi1>
    %567 = arith.select %566, %546, %514 : vector<8x32xi1>, vector<8x32xf32>
    %568 = vector.shape_cast %550 : vector<8x1xi1> to vector<8x1xi1>
    %569 = vector.broadcast %568 : vector<8x1xi1> to vector<8x32xi1>
    %570 = arith.select %569, %544, %517 : vector<8x32xi1>, vector<8x32xf32>
    %c2_i32_164 = arith.constant 2 : i32
    %c7_i32_165 = arith.constant 7 : i32
    %571 = arith.subi %c7_i32_165, %c2_i32_164 : i32
    %572 = arith.index_cast %c2_i32_164 : i32 to index
    %c0_166 = arith.constant 0 : index
    %c0_167 = arith.constant 0 : index
    %573 = vector.load %arg9[%572, %c0_166, %c0_167] : memref<8x8x128xf32, #tpu.memory_space<vmem>>, vector<1x8x128xf32>
    %574 = vector.shape_cast %573 : vector<1x8x128xf32> to vector<8x128xf32>
    %cst_168 = arith.constant dense<0.000000e+00> : vector<8x256xf32>
    %575 = tpu.matmul %567, %462, %cst_168 {dimension_numbers = #tpu.dot_dimension_numbers<[1], [0], [0], [1], [0, 0, 1, 1], [], []>} : vector<8x32xf32>, vector<32x256xf32>, vector<8x256xf32> -> vector<8x256xf32>
    %576 = vector.extract_strided_slice %575 {offsets = [0, 0], sizes = [8, 128], strides = [1, 1]} : vector<8x256xf32> to vector<8x128xf32>
    %577 = vector.extract_strided_slice %575 {offsets = [0, 128], sizes = [8, 128], strides = [1, 1]} : vector<8x256xf32> to vector<8x128xf32>
    %578 = vector.shape_cast %3 : vector<8x1xi1> to vector<8x1xi1>
    %579 = vector.broadcast %578 : vector<8x1xi1> to vector<8x128xi1>
    %580 = arith.select %579, %576, %577 : vector<8x128xi1>, vector<8x128xf32>
    %581 = arith.addf %574, %580 : vector<8x128xf32>
    %cst_169 = arith.constant 5.000000e-01 : f32
    %582 = vector.broadcast %cst_169 : f32 to vector<8x128xf32>
    %583 = arith.mulf %582, %581 : vector<8x128xf32>
    %584 = arith.select %9, %581, %583 : vector<8x128xi1>, vector<8x128xf32>
    %585 = math.tanh %584 : vector<8x128xf32>
    %cst_170 = arith.constant 5.000000e-01 : f32
    %586 = vector.broadcast %cst_170 : f32 to vector<8x128xf32>
    %587 = arith.mulf %586, %585 : vector<8x128xf32>
    %cst_171 = arith.constant 5.000000e-01 : f32
    %588 = vector.broadcast %cst_171 : f32 to vector<8x128xf32>
    %589 = arith.addf %587, %588 : vector<8x128xf32>
    %590 = arith.select %9, %585, %589 : vector<8x128xi1>, vector<8x128xf32>
    %591 = vector.extract_strided_slice %590 {offsets = [0, 0], sizes = [8, 32], strides = [1, 1]} : vector<8x128xf32> to vector<8x32xf32>
    %592 = vector.extract_strided_slice %590 {offsets = [0, 32], sizes = [8, 32], strides = [1, 1]} : vector<8x128xf32> to vector<8x32xf32>
    %593 = vector.extract_strided_slice %590 {offsets = [0, 64], sizes = [8, 32], strides = [1, 1]} : vector<8x128xf32> to vector<8x32xf32>
    %594 = vector.extract_strided_slice %590 {offsets = [0, 96], sizes = [8, 32], strides = [1, 1]} : vector<8x128xf32> to vector<8x32xf32>
    %595 = arith.mulf %592, %570 : vector<8x32xf32>
    %596 = arith.mulf %591, %593 : vector<8x32xf32>
    %597 = arith.addf %595, %596 : vector<8x32xf32>
    %598 = math.tanh %597 : vector<8x32xf32>
    %599 = arith.mulf %594, %598 : vector<8x32xf32>
    %600 = vector.broadcast %c2_i32_164 : i32 to vector<8x1xi32>
    %601 = vector.broadcast %571 : i32 to vector<8x1xi32>
    %602 = arith.select %3, %600, %601 : vector<8x1xi1>, vector<8x1xi32>
    %603 = arith.cmpi slt, %602, %0 : vector<8x1xi32>
    %cst_172 = arith.constant 0.000000e+00 : f32
    %604 = vector.shape_cast %603 : vector<8x1xi1> to vector<8x1xi1>
    %605 = vector.broadcast %604 : vector<8x1xi1> to vector<8x32xi1>
    %606 = vector.broadcast %cst_172 : f32 to vector<8x32xf32>
    %607 = arith.select %605, %599, %606 : vector<8x32xi1>, vector<8x32xf32>
    %608 = vector.extract_strided_slice %607 {offsets = [0, 0], sizes = [4, 32], strides = [1, 1]} : vector<8x32xf32> to vector<4x32xf32>
    %609 = arith.index_cast %c2_i32_164 : i32 to index
    %c0_173 = arith.constant 0 : index
    %c0_174 = arith.constant 0 : index
    %610 = vector.load %arg8[%609, %c0_173, %c0_174] : memref<8x4x64xf32, #tpu.memory_space<vmem>>, vector<1x4x32xf32>
    %611 = vector.shape_cast %610 : vector<1x4x32xf32> to vector<4x32xf32>
    %612 = vector.shape_cast %608 : vector<4x32xf32> to vector<1x4x32xf32>
    tpu.vector_store %arg8[%609, %c0_173, %c0_174], %612 {strides = array<i32>} : memref<8x4x64xf32, #tpu.memory_space<vmem>>, vector<1x4x32xf32>,
    %613 = vector.extract_strided_slice %607 {offsets = [4, 0], sizes = [4, 32], strides = [1, 1]} : vector<8x32xf32> to vector<4x32xf32>
    %614 = arith.index_cast %571 : i32 to index
    %c0_175 = arith.constant 0 : index
    %c32_176 = arith.constant 32 : index
    %615 = vector.load %arg8[%614, %c0_175, %c32_176] : memref<8x4x64xf32, #tpu.memory_space<vmem>>, vector<1x4x32xf32>
    %616 = vector.shape_cast %615 : vector<1x4x32xf32> to vector<4x32xf32>
    %617 = vector.shape_cast %613 : vector<4x32xf32> to vector<1x4x32xf32>
    tpu.vector_store %arg8[%614, %c0_175, %c32_176], %617 {strides = array<i32>} : memref<8x4x64xf32, #tpu.memory_space<vmem>>, vector<1x4x32xf32>,
    %618 = vector.shape_cast %603 : vector<8x1xi1> to vector<8x1xi1>
    %619 = vector.broadcast %618 : vector<8x1xi1> to vector<8x32xi1>
    %620 = arith.select %619, %599, %567 : vector<8x32xi1>, vector<8x32xf32>
    %621 = vector.shape_cast %603 : vector<8x1xi1> to vector<8x1xi1>
    %622 = vector.broadcast %621 : vector<8x1xi1> to vector<8x32xi1>
    %623 = arith.select %622, %597, %570 : vector<8x32xi1>, vector<8x32xf32>
    %c3_i32_177 = arith.constant 3 : i32
    %c7_i32_178 = arith.constant 7 : i32
    %624 = arith.subi %c7_i32_178, %c3_i32_177 : i32
    %625 = arith.index_cast %c3_i32_177 : i32 to index
    %c0_179 = arith.constant 0 : index
    %c0_180 = arith.constant 0 : index
    %626 = vector.load %arg9[%625, %c0_179, %c0_180] : memref<8x8x128xf32, #tpu.memory_space<vmem>>, vector<1x8x128xf32>
    %627 = vector.shape_cast %626 : vector<1x8x128xf32> to vector<8x128xf32>
    %cst_181 = arith.constant dense<0.000000e+00> : vector<8x256xf32>
    %628 = tpu.matmul %620, %462, %cst_181 {dimension_numbers = #tpu.dot_dimension_numbers<[1], [0], [0], [1], [0, 0, 1, 1], [], []>} : vector<8x32xf32>, vector<32x256xf32>, vector<8x256xf32> -> vector<8x256xf32>
    %629 = vector.extract_strided_slice %628 {offsets = [0, 0], sizes = [8, 128], strides = [1, 1]} : vector<8x256xf32> to vector<8x128xf32>
    %630 = vector.extract_strided_slice %628 {offsets = [0, 128], sizes = [8, 128], strides = [1, 1]} : vector<8x256xf32> to vector<8x128xf32>
    %631 = vector.shape_cast %3 : vector<8x1xi1> to vector<8x1xi1>
    %632 = vector.broadcast %631 : vector<8x1xi1> to vector<8x128xi1>
    %633 = arith.select %632, %629, %630 : vector<8x128xi1>, vector<8x128xf32>
    %634 = arith.addf %627, %633 : vector<8x128xf32>
    %cst_182 = arith.constant 5.000000e-01 : f32
    %635 = vector.broadcast %cst_182 : f32 to vector<8x128xf32>
    %636 = arith.mulf %635, %634 : vector<8x128xf32>
    %637 = arith.select %9, %634, %636 : vector<8x128xi1>, vector<8x128xf32>
    %638 = math.tanh %637 : vector<8x128xf32>
    %cst_183 = arith.constant 5.000000e-01 : f32
    %639 = vector.broadcast %cst_183 : f32 to vector<8x128xf32>
    %640 = arith.mulf %639, %638 : vector<8x128xf32>
    %cst_184 = arith.constant 5.000000e-01 : f32
    %641 = vector.broadcast %cst_184 : f32 to vector<8x128xf32>
    %642 = arith.addf %640, %641 : vector<8x128xf32>
    %643 = arith.select %9, %638, %642 : vector<8x128xi1>, vector<8x128xf32>
    %644 = vector.extract_strided_slice %643 {offsets = [0, 0], sizes = [8, 32], strides = [1, 1]} : vector<8x128xf32> to vector<8x32xf32>
    %645 = vector.extract_strided_slice %643 {offsets = [0, 32], sizes = [8, 32], strides = [1, 1]} : vector<8x128xf32> to vector<8x32xf32>
    %646 = vector.extract_strided_slice %643 {offsets = [0, 64], sizes = [8, 32], strides = [1, 1]} : vector<8x128xf32> to vector<8x32xf32>
    %647 = vector.extract_strided_slice %643 {offsets = [0, 96], sizes = [8, 32], strides = [1, 1]} : vector<8x128xf32> to vector<8x32xf32>
    %648 = arith.mulf %645, %623 : vector<8x32xf32>
    %649 = arith.mulf %644, %646 : vector<8x32xf32>
    %650 = arith.addf %648, %649 : vector<8x32xf32>
    %651 = math.tanh %650 : vector<8x32xf32>
    %652 = arith.mulf %647, %651 : vector<8x32xf32>
    %653 = vector.broadcast %c3_i32_177 : i32 to vector<8x1xi32>
    %654 = vector.broadcast %624 : i32 to vector<8x1xi32>
    %655 = arith.select %3, %653, %654 : vector<8x1xi1>, vector<8x1xi32>
    %656 = arith.cmpi slt, %655, %0 : vector<8x1xi32>
    %cst_185 = arith.constant 0.000000e+00 : f32
    %657 = vector.shape_cast %656 : vector<8x1xi1> to vector<8x1xi1>
    %658 = vector.broadcast %657 : vector<8x1xi1> to vector<8x32xi1>
    %659 = vector.broadcast %cst_185 : f32 to vector<8x32xf32>
    %660 = arith.select %658, %652, %659 : vector<8x32xi1>, vector<8x32xf32>
    %661 = vector.extract_strided_slice %660 {offsets = [0, 0], sizes = [4, 32], strides = [1, 1]} : vector<8x32xf32> to vector<4x32xf32>
    %662 = arith.index_cast %c3_i32_177 : i32 to index
    %c0_186 = arith.constant 0 : index
    %c0_187 = arith.constant 0 : index
    %663 = vector.load %arg8[%662, %c0_186, %c0_187] : memref<8x4x64xf32, #tpu.memory_space<vmem>>, vector<1x4x32xf32>
    %664 = vector.shape_cast %663 : vector<1x4x32xf32> to vector<4x32xf32>
    %665 = vector.shape_cast %661 : vector<4x32xf32> to vector<1x4x32xf32>
    tpu.vector_store %arg8[%662, %c0_186, %c0_187], %665 {strides = array<i32>} : memref<8x4x64xf32, #tpu.memory_space<vmem>>, vector<1x4x32xf32>,
    %666 = vector.extract_strided_slice %660 {offsets = [4, 0], sizes = [4, 32], strides = [1, 1]} : vector<8x32xf32> to vector<4x32xf32>
    %667 = arith.index_cast %624 : i32 to index
    %c0_188 = arith.constant 0 : index
    %c32_189 = arith.constant 32 : index
    %668 = vector.load %arg8[%667, %c0_188, %c32_189] : memref<8x4x64xf32, #tpu.memory_space<vmem>>, vector<1x4x32xf32>
    %669 = vector.shape_cast %668 : vector<1x4x32xf32> to vector<4x32xf32>
    %670 = vector.shape_cast %666 : vector<4x32xf32> to vector<1x4x32xf32>
    tpu.vector_store %arg8[%667, %c0_188, %c32_189], %670 {strides = array<i32>} : memref<8x4x64xf32, #tpu.memory_space<vmem>>, vector<1x4x32xf32>,
    %671 = vector.shape_cast %656 : vector<8x1xi1> to vector<8x1xi1>
    %672 = vector.broadcast %671 : vector<8x1xi1> to vector<8x32xi1>
    %673 = arith.select %672, %652, %620 : vector<8x32xi1>, vector<8x32xf32>
    %674 = vector.shape_cast %656 : vector<8x1xi1> to vector<8x1xi1>
    %675 = vector.broadcast %674 : vector<8x1xi1> to vector<8x32xi1>
    %676 = arith.select %675, %650, %623 : vector<8x32xi1>, vector<8x32xf32>
    %c4_i32_190 = arith.constant 4 : i32
    %c7_i32_191 = arith.constant 7 : i32
    %677 = arith.subi %c7_i32_191, %c4_i32_190 : i32
    %678 = arith.index_cast %c4_i32_190 : i32 to index
    %c0_192 = arith.constant 0 : index
    %c0_193 = arith.constant 0 : index
    %679 = vector.load %arg9[%678, %c0_192, %c0_193] : memref<8x8x128xf32, #tpu.memory_space<vmem>>, vector<1x8x128xf32>
    %680 = vector.shape_cast %679 : vector<1x8x128xf32> to vector<8x128xf32>
    %cst_194 = arith.constant dense<0.000000e+00> : vector<8x256xf32>
    %681 = tpu.matmul %673, %462, %cst_194 {dimension_numbers = #tpu.dot_dimension_numbers<[1], [0], [0], [1], [0, 0, 1, 1], [], []>} : vector<8x32xf32>, vector<32x256xf32>, vector<8x256xf32> -> vector<8x256xf32>
    %682 = vector.extract_strided_slice %681 {offsets = [0, 0], sizes = [8, 128], strides = [1, 1]} : vector<8x256xf32> to vector<8x128xf32>
    %683 = vector.extract_strided_slice %681 {offsets = [0, 128], sizes = [8, 128], strides = [1, 1]} : vector<8x256xf32> to vector<8x128xf32>
    %684 = vector.shape_cast %3 : vector<8x1xi1> to vector<8x1xi1>
    %685 = vector.broadcast %684 : vector<8x1xi1> to vector<8x128xi1>
    %686 = arith.select %685, %682, %683 : vector<8x128xi1>, vector<8x128xf32>
    %687 = arith.addf %680, %686 : vector<8x128xf32>
    %cst_195 = arith.constant 5.000000e-01 : f32
    %688 = vector.broadcast %cst_195 : f32 to vector<8x128xf32>
    %689 = arith.mulf %688, %687 : vector<8x128xf32>
    %690 = arith.select %9, %687, %689 : vector<8x128xi1>, vector<8x128xf32>
    %691 = math.tanh %690 : vector<8x128xf32>
    %cst_196 = arith.constant 5.000000e-01 : f32
    %692 = vector.broadcast %cst_196 : f32 to vector<8x128xf32>
    %693 = arith.mulf %692, %691 : vector<8x128xf32>
    %cst_197 = arith.constant 5.000000e-01 : f32
    %694 = vector.broadcast %cst_197 : f32 to vector<8x128xf32>
    %695 = arith.addf %693, %694 : vector<8x128xf32>
    %696 = arith.select %9, %691, %695 : vector<8x128xi1>, vector<8x128xf32>
    %697 = vector.extract_strided_slice %696 {offsets = [0, 0], sizes = [8, 32], strides = [1, 1]} : vector<8x128xf32> to vector<8x32xf32>
    %698 = vector.extract_strided_slice %696 {offsets = [0, 32], sizes = [8, 32], strides = [1, 1]} : vector<8x128xf32> to vector<8x32xf32>
    %699 = vector.extract_strided_slice %696 {offsets = [0, 64], sizes = [8, 32], strides = [1, 1]} : vector<8x128xf32> to vector<8x32xf32>
    %700 = vector.extract_strided_slice %696 {offsets = [0, 96], sizes = [8, 32], strides = [1, 1]} : vector<8x128xf32> to vector<8x32xf32>
    %701 = arith.mulf %698, %676 : vector<8x32xf32>
    %702 = arith.mulf %697, %699 : vector<8x32xf32>
    %703 = arith.addf %701, %702 : vector<8x32xf32>
    %704 = math.tanh %703 : vector<8x32xf32>
    %705 = arith.mulf %700, %704 : vector<8x32xf32>
    %706 = vector.broadcast %c4_i32_190 : i32 to vector<8x1xi32>
    %707 = vector.broadcast %677 : i32 to vector<8x1xi32>
    %708 = arith.select %3, %706, %707 : vector<8x1xi1>, vector<8x1xi32>
    %709 = arith.cmpi slt, %708, %0 : vector<8x1xi32>
    %cst_198 = arith.constant 0.000000e+00 : f32
    %710 = vector.shape_cast %709 : vector<8x1xi1> to vector<8x1xi1>
    %711 = vector.broadcast %710 : vector<8x1xi1> to vector<8x32xi1>
    %712 = vector.broadcast %cst_198 : f32 to vector<8x32xf32>
    %713 = arith.select %711, %705, %712 : vector<8x32xi1>, vector<8x32xf32>
    %714 = vector.extract_strided_slice %713 {offsets = [0, 0], sizes = [4, 32], strides = [1, 1]} : vector<8x32xf32> to vector<4x32xf32>
    %715 = arith.index_cast %c4_i32_190 : i32 to index
    %c0_199 = arith.constant 0 : index
    %c0_200 = arith.constant 0 : index
    %716 = vector.load %arg8[%715, %c0_199, %c0_200] : memref<8x4x64xf32, #tpu.memory_space<vmem>>, vector<1x4x32xf32>
    %717 = vector.shape_cast %716 : vector<1x4x32xf32> to vector<4x32xf32>
    %718 = vector.shape_cast %714 : vector<4x32xf32> to vector<1x4x32xf32>
    tpu.vector_store %arg8[%715, %c0_199, %c0_200], %718 {strides = array<i32>} : memref<8x4x64xf32, #tpu.memory_space<vmem>>, vector<1x4x32xf32>,
    %719 = vector.extract_strided_slice %713 {offsets = [4, 0], sizes = [4, 32], strides = [1, 1]} : vector<8x32xf32> to vector<4x32xf32>
    %720 = arith.index_cast %677 : i32 to index
    %c0_201 = arith.constant 0 : index
    %c32_202 = arith.constant 32 : index
    %721 = vector.load %arg8[%720, %c0_201, %c32_202] : memref<8x4x64xf32, #tpu.memory_space<vmem>>, vector<1x4x32xf32>
    %722 = vector.shape_cast %721 : vector<1x4x32xf32> to vector<4x32xf32>
    %723 = vector.shape_cast %719 : vector<4x32xf32> to vector<1x4x32xf32>
    tpu.vector_store %arg8[%720, %c0_201, %c32_202], %723 {strides = array<i32>} : memref<8x4x64xf32, #tpu.memory_space<vmem>>, vector<1x4x32xf32>,
    %724 = vector.shape_cast %709 : vector<8x1xi1> to vector<8x1xi1>
    %725 = vector.broadcast %724 : vector<8x1xi1> to vector<8x32xi1>
    %726 = arith.select %725, %705, %673 : vector<8x32xi1>, vector<8x32xf32>
    %727 = vector.shape_cast %709 : vector<8x1xi1> to vector<8x1xi1>
    %728 = vector.broadcast %727 : vector<8x1xi1> to vector<8x32xi1>
    %729 = arith.select %728, %703, %676 : vector<8x32xi1>, vector<8x32xf32>
    %c5_i32_203 = arith.constant 5 : i32
    %c7_i32_204 = arith.constant 7 : i32
    %730 = arith.subi %c7_i32_204, %c5_i32_203 : i32
    %731 = arith.index_cast %c5_i32_203 : i32 to index
    %c0_205 = arith.constant 0 : index
    %c0_206 = arith.constant 0 : index
    %732 = vector.load %arg9[%731, %c0_205, %c0_206] : memref<8x8x128xf32, #tpu.memory_space<vmem>>, vector<1x8x128xf32>
    %733 = vector.shape_cast %732 : vector<1x8x128xf32> to vector<8x128xf32>
    %cst_207 = arith.constant dense<0.000000e+00> : vector<8x256xf32>
    %734 = tpu.matmul %726, %462, %cst_207 {dimension_numbers = #tpu.dot_dimension_numbers<[1], [0], [0], [1], [0, 0, 1, 1], [], []>} : vector<8x32xf32>, vector<32x256xf32>, vector<8x256xf32> -> vector<8x256xf32>
    %735 = vector.extract_strided_slice %734 {offsets = [0, 0], sizes = [8, 128], strides = [1, 1]} : vector<8x256xf32> to vector<8x128xf32>
    %736 = vector.extract_strided_slice %734 {offsets = [0, 128], sizes = [8, 128], strides = [1, 1]} : vector<8x256xf32> to vector<8x128xf32>
    %737 = vector.shape_cast %3 : vector<8x1xi1> to vector<8x1xi1>
    %738 = vector.broadcast %737 : vector<8x1xi1> to vector<8x128xi1>
    %739 = arith.select %738, %735, %736 : vector<8x128xi1>, vector<8x128xf32>
    %740 = arith.addf %733, %739 : vector<8x128xf32>
    %cst_208 = arith.constant 5.000000e-01 : f32
    %741 = vector.broadcast %cst_208 : f32 to vector<8x128xf32>
    %742 = arith.mulf %741, %740 : vector<8x128xf32>
    %743 = arith.select %9, %740, %742 : vector<8x128xi1>, vector<8x128xf32>
    %744 = math.tanh %743 : vector<8x128xf32>
    %cst_209 = arith.constant 5.000000e-01 : f32
    %745 = vector.broadcast %cst_209 : f32 to vector<8x128xf32>
    %746 = arith.mulf %745, %744 : vector<8x128xf32>
    %cst_210 = arith.constant 5.000000e-01 : f32
    %747 = vector.broadcast %cst_210 : f32 to vector<8x128xf32>
    %748 = arith.addf %746, %747 : vector<8x128xf32>
    %749 = arith.select %9, %744, %748 : vector<8x128xi1>, vector<8x128xf32>
    %750 = vector.extract_strided_slice %749 {offsets = [0, 0], sizes = [8, 32], strides = [1, 1]} : vector<8x128xf32> to vector<8x32xf32>
    %751 = vector.extract_strided_slice %749 {offsets = [0, 32], sizes = [8, 32], strides = [1, 1]} : vector<8x128xf32> to vector<8x32xf32>
    %752 = vector.extract_strided_slice %749 {offsets = [0, 64], sizes = [8, 32], strides = [1, 1]} : vector<8x128xf32> to vector<8x32xf32>
    %753 = vector.extract_strided_slice %749 {offsets = [0, 96], sizes = [8, 32], strides = [1, 1]} : vector<8x128xf32> to vector<8x32xf32>
    %754 = arith.mulf %751, %729 : vector<8x32xf32>
    %755 = arith.mulf %750, %752 : vector<8x32xf32>
    %756 = arith.addf %754, %755 : vector<8x32xf32>
    %757 = math.tanh %756 : vector<8x32xf32>
    %758 = arith.mulf %753, %757 : vector<8x32xf32>
    %759 = vector.broadcast %c5_i32_203 : i32 to vector<8x1xi32>
    %760 = vector.broadcast %730 : i32 to vector<8x1xi32>
    %761 = arith.select %3, %759, %760 : vector<8x1xi1>, vector<8x1xi32>
    %762 = arith.cmpi slt, %761, %0 : vector<8x1xi32>
    %cst_211 = arith.constant 0.000000e+00 : f32
    %763 = vector.shape_cast %762 : vector<8x1xi1> to vector<8x1xi1>
    %764 = vector.broadcast %763 : vector<8x1xi1> to vector<8x32xi1>
    %765 = vector.broadcast %cst_211 : f32 to vector<8x32xf32>
    %766 = arith.select %764, %758, %765 : vector<8x32xi1>, vector<8x32xf32>
    %767 = vector.extract_strided_slice %766 {offsets = [0, 0], sizes = [4, 32], strides = [1, 1]} : vector<8x32xf32> to vector<4x32xf32>
    %768 = arith.index_cast %c5_i32_203 : i32 to index
    %c0_212 = arith.constant 0 : index
    %c0_213 = arith.constant 0 : index
    %769 = vector.load %arg8[%768, %c0_212, %c0_213] : memref<8x4x64xf32, #tpu.memory_space<vmem>>, vector<1x4x32xf32>
    %770 = vector.shape_cast %769 : vector<1x4x32xf32> to vector<4x32xf32>
    %771 = vector.shape_cast %767 : vector<4x32xf32> to vector<1x4x32xf32>
    tpu.vector_store %arg8[%768, %c0_212, %c0_213], %771 {strides = array<i32>} : memref<8x4x64xf32, #tpu.memory_space<vmem>>, vector<1x4x32xf32>,
    %772 = vector.extract_strided_slice %766 {offsets = [4, 0], sizes = [4, 32], strides = [1, 1]} : vector<8x32xf32> to vector<4x32xf32>
    %773 = arith.index_cast %730 : i32 to index
    %c0_214 = arith.constant 0 : index
    %c32_215 = arith.constant 32 : index
    %774 = vector.load %arg8[%773, %c0_214, %c32_215] : memref<8x4x64xf32, #tpu.memory_space<vmem>>, vector<1x4x32xf32>
    %775 = vector.shape_cast %774 : vector<1x4x32xf32> to vector<4x32xf32>
    %776 = vector.shape_cast %772 : vector<4x32xf32> to vector<1x4x32xf32>
    tpu.vector_store %arg8[%773, %c0_214, %c32_215], %776 {strides = array<i32>} : memref<8x4x64xf32, #tpu.memory_space<vmem>>, vector<1x4x32xf32>,
    %777 = vector.shape_cast %762 : vector<8x1xi1> to vector<8x1xi1>
    %778 = vector.broadcast %777 : vector<8x1xi1> to vector<8x32xi1>
    %779 = arith.select %778, %758, %726 : vector<8x32xi1>, vector<8x32xf32>
    %780 = vector.shape_cast %762 : vector<8x1xi1> to vector<8x1xi1>
    %781 = vector.broadcast %780 : vector<8x1xi1> to vector<8x32xi1>
    %782 = arith.select %781, %756, %729 : vector<8x32xi1>, vector<8x32xf32>
    %c6_i32_216 = arith.constant 6 : i32
    %c7_i32_217 = arith.constant 7 : i32
    %783 = arith.subi %c7_i32_217, %c6_i32_216 : i32
    %784 = arith.index_cast %c6_i32_216 : i32 to index
    %c0_218 = arith.constant 0 : index
    %c0_219 = arith.constant 0 : index
    %785 = vector.load %arg9[%784, %c0_218, %c0_219] : memref<8x8x128xf32, #tpu.memory_space<vmem>>, vector<1x8x128xf32>
    %786 = vector.shape_cast %785 : vector<1x8x128xf32> to vector<8x128xf32>
    %cst_220 = arith.constant dense<0.000000e+00> : vector<8x256xf32>
    %787 = tpu.matmul %779, %462, %cst_220 {dimension_numbers = #tpu.dot_dimension_numbers<[1], [0], [0], [1], [0, 0, 1, 1], [], []>} : vector<8x32xf32>, vector<32x256xf32>, vector<8x256xf32> -> vector<8x256xf32>
    %788 = vector.extract_strided_slice %787 {offsets = [0, 0], sizes = [8, 128], strides = [1, 1]} : vector<8x256xf32> to vector<8x128xf32>
    %789 = vector.extract_strided_slice %787 {offsets = [0, 128], sizes = [8, 128], strides = [1, 1]} : vector<8x256xf32> to vector<8x128xf32>
    %790 = vector.shape_cast %3 : vector<8x1xi1> to vector<8x1xi1>
    %791 = vector.broadcast %790 : vector<8x1xi1> to vector<8x128xi1>
    %792 = arith.select %791, %788, %789 : vector<8x128xi1>, vector<8x128xf32>
    %793 = arith.addf %786, %792 : vector<8x128xf32>
    %cst_221 = arith.constant 5.000000e-01 : f32
    %794 = vector.broadcast %cst_221 : f32 to vector<8x128xf32>
    %795 = arith.mulf %794, %793 : vector<8x128xf32>
    %796 = arith.select %9, %793, %795 : vector<8x128xi1>, vector<8x128xf32>
    %797 = math.tanh %796 : vector<8x128xf32>
    %cst_222 = arith.constant 5.000000e-01 : f32
    %798 = vector.broadcast %cst_222 : f32 to vector<8x128xf32>
    %799 = arith.mulf %798, %797 : vector<8x128xf32>
    %cst_223 = arith.constant 5.000000e-01 : f32
    %800 = vector.broadcast %cst_223 : f32 to vector<8x128xf32>
    %801 = arith.addf %799, %800 : vector<8x128xf32>
    %802 = arith.select %9, %797, %801 : vector<8x128xi1>, vector<8x128xf32>
    %803 = vector.extract_strided_slice %802 {offsets = [0, 0], sizes = [8, 32], strides = [1, 1]} : vector<8x128xf32> to vector<8x32xf32>
    %804 = vector.extract_strided_slice %802 {offsets = [0, 32], sizes = [8, 32], strides = [1, 1]} : vector<8x128xf32> to vector<8x32xf32>
    %805 = vector.extract_strided_slice %802 {offsets = [0, 64], sizes = [8, 32], strides = [1, 1]} : vector<8x128xf32> to vector<8x32xf32>
    %806 = vector.extract_strided_slice %802 {offsets = [0, 96], sizes = [8, 32], strides = [1, 1]} : vector<8x128xf32> to vector<8x32xf32>
    %807 = arith.mulf %804, %782 : vector<8x32xf32>
    %808 = arith.mulf %803, %805 : vector<8x32xf32>
    %809 = arith.addf %807, %808 : vector<8x32xf32>
    %810 = math.tanh %809 : vector<8x32xf32>
    %811 = arith.mulf %806, %810 : vector<8x32xf32>
    %812 = vector.broadcast %c6_i32_216 : i32 to vector<8x1xi32>
    %813 = vector.broadcast %783 : i32 to vector<8x1xi32>
    %814 = arith.select %3, %812, %813 : vector<8x1xi1>, vector<8x1xi32>
    %815 = arith.cmpi slt, %814, %0 : vector<8x1xi32>
    %cst_224 = arith.constant 0.000000e+00 : f32
    %816 = vector.shape_cast %815 : vector<8x1xi1> to vector<8x1xi1>
    %817 = vector.broadcast %816 : vector<8x1xi1> to vector<8x32xi1>
    %818 = vector.broadcast %cst_224 : f32 to vector<8x32xf32>
    %819 = arith.select %817, %811, %818 : vector<8x32xi1>, vector<8x32xf32>
    %820 = vector.extract_strided_slice %819 {offsets = [0, 0], sizes = [4, 32], strides = [1, 1]} : vector<8x32xf32> to vector<4x32xf32>
    %821 = arith.index_cast %c6_i32_216 : i32 to index
    %c0_225 = arith.constant 0 : index
    %c0_226 = arith.constant 0 : index
    %822 = vector.load %arg8[%821, %c0_225, %c0_226] : memref<8x4x64xf32, #tpu.memory_space<vmem>>, vector<1x4x32xf32>
    %823 = vector.shape_cast %822 : vector<1x4x32xf32> to vector<4x32xf32>
    %824 = vector.shape_cast %820 : vector<4x32xf32> to vector<1x4x32xf32>
    tpu.vector_store %arg8[%821, %c0_225, %c0_226], %824 {strides = array<i32>} : memref<8x4x64xf32, #tpu.memory_space<vmem>>, vector<1x4x32xf32>,
    %825 = vector.extract_strided_slice %819 {offsets = [4, 0], sizes = [4, 32], strides = [1, 1]} : vector<8x32xf32> to vector<4x32xf32>
    %826 = arith.index_cast %783 : i32 to index
    %c0_227 = arith.constant 0 : index
    %c32_228 = arith.constant 32 : index
    %827 = vector.load %arg8[%826, %c0_227, %c32_228] : memref<8x4x64xf32, #tpu.memory_space<vmem>>, vector<1x4x32xf32>
    %828 = vector.shape_cast %827 : vector<1x4x32xf32> to vector<4x32xf32>
    %829 = vector.shape_cast %825 : vector<4x32xf32> to vector<1x4x32xf32>
    tpu.vector_store %arg8[%826, %c0_227, %c32_228], %829 {strides = array<i32>} : memref<8x4x64xf32, #tpu.memory_space<vmem>>, vector<1x4x32xf32>,
    %830 = vector.shape_cast %815 : vector<8x1xi1> to vector<8x1xi1>
    %831 = vector.broadcast %830 : vector<8x1xi1> to vector<8x32xi1>
    %832 = arith.select %831, %811, %779 : vector<8x32xi1>, vector<8x32xf32>
    %833 = vector.shape_cast %815 : vector<8x1xi1> to vector<8x1xi1>
    %834 = vector.broadcast %833 : vector<8x1xi1> to vector<8x32xi1>
    %835 = arith.select %834, %809, %782 : vector<8x32xi1>, vector<8x32xf32>
    %c7_i32_229 = arith.constant 7 : i32
    %c7_i32_230 = arith.constant 7 : i32
    %836 = arith.subi %c7_i32_230, %c7_i32_229 : i32
    %837 = arith.index_cast %c7_i32_229 : i32 to index
    %c0_231 = arith.constant 0 : index
    %c0_232 = arith.constant 0 : index
    %838 = vector.load %arg9[%837, %c0_231, %c0_232] : memref<8x8x128xf32, #tpu.memory_space<vmem>>, vector<1x8x128xf32>
    %839 = vector.shape_cast %838 : vector<1x8x128xf32> to vector<8x128xf32>
    %cst_233 = arith.constant dense<0.000000e+00> : vector<8x256xf32>
    %840 = tpu.matmul %832, %462, %cst_233 {dimension_numbers = #tpu.dot_dimension_numbers<[1], [0], [0], [1], [0, 0, 1, 1], [], []>} : vector<8x32xf32>, vector<32x256xf32>, vector<8x256xf32> -> vector<8x256xf32>
    %841 = vector.extract_strided_slice %840 {offsets = [0, 0], sizes = [8, 128], strides = [1, 1]} : vector<8x256xf32> to vector<8x128xf32>
    %842 = vector.extract_strided_slice %840 {offsets = [0, 128], sizes = [8, 128], strides = [1, 1]} : vector<8x256xf32> to vector<8x128xf32>
    %843 = vector.shape_cast %3 : vector<8x1xi1> to vector<8x1xi1>
    %844 = vector.broadcast %843 : vector<8x1xi1> to vector<8x128xi1>
    %845 = arith.select %844, %841, %842 : vector<8x128xi1>, vector<8x128xf32>
    %846 = arith.addf %839, %845 : vector<8x128xf32>
    %cst_234 = arith.constant 5.000000e-01 : f32
    %847 = vector.broadcast %cst_234 : f32 to vector<8x128xf32>
    %848 = arith.mulf %847, %846 : vector<8x128xf32>
    %849 = arith.select %9, %846, %848 : vector<8x128xi1>, vector<8x128xf32>
    %850 = math.tanh %849 : vector<8x128xf32>
    %cst_235 = arith.constant 5.000000e-01 : f32
    %851 = vector.broadcast %cst_235 : f32 to vector<8x128xf32>
    %852 = arith.mulf %851, %850 : vector<8x128xf32>
    %cst_236 = arith.constant 5.000000e-01 : f32
    %853 = vector.broadcast %cst_236 : f32 to vector<8x128xf32>
    %854 = arith.addf %852, %853 : vector<8x128xf32>
    %855 = arith.select %9, %850, %854 : vector<8x128xi1>, vector<8x128xf32>
    %856 = vector.extract_strided_slice %855 {offsets = [0, 0], sizes = [8, 32], strides = [1, 1]} : vector<8x128xf32> to vector<8x32xf32>
    %857 = vector.extract_strided_slice %855 {offsets = [0, 32], sizes = [8, 32], strides = [1, 1]} : vector<8x128xf32> to vector<8x32xf32>
    %858 = vector.extract_strided_slice %855 {offsets = [0, 64], sizes = [8, 32], strides = [1, 1]} : vector<8x128xf32> to vector<8x32xf32>
    %859 = vector.extract_strided_slice %855 {offsets = [0, 96], sizes = [8, 32], strides = [1, 1]} : vector<8x128xf32> to vector<8x32xf32>
    %860 = arith.mulf %857, %835 : vector<8x32xf32>
    %861 = arith.mulf %856, %858 : vector<8x32xf32>
    %862 = arith.addf %860, %861 : vector<8x32xf32>
    %863 = math.tanh %862 : vector<8x32xf32>
    %864 = arith.mulf %859, %863 : vector<8x32xf32>
    %865 = vector.broadcast %c7_i32_229 : i32 to vector<8x1xi32>
    %866 = vector.broadcast %836 : i32 to vector<8x1xi32>
    %867 = arith.select %3, %865, %866 : vector<8x1xi1>, vector<8x1xi32>
    %868 = arith.cmpi slt, %867, %0 : vector<8x1xi32>
    %cst_237 = arith.constant 0.000000e+00 : f32
    %869 = vector.shape_cast %868 : vector<8x1xi1> to vector<8x1xi1>
    %870 = vector.broadcast %869 : vector<8x1xi1> to vector<8x32xi1>
    %871 = vector.broadcast %cst_237 : f32 to vector<8x32xf32>
    %872 = arith.select %870, %864, %871 : vector<8x32xi1>, vector<8x32xf32>
    %873 = vector.extract_strided_slice %872 {offsets = [0, 0], sizes = [4, 32], strides = [1, 1]} : vector<8x32xf32> to vector<4x32xf32>
    %874 = arith.index_cast %c7_i32_229 : i32 to index
    %c0_238 = arith.constant 0 : index
    %c0_239 = arith.constant 0 : index
    %875 = vector.load %arg8[%874, %c0_238, %c0_239] : memref<8x4x64xf32, #tpu.memory_space<vmem>>, vector<1x4x32xf32>
    %876 = vector.shape_cast %875 : vector<1x4x32xf32> to vector<4x32xf32>
    %877 = vector.shape_cast %873 : vector<4x32xf32> to vector<1x4x32xf32>
    tpu.vector_store %arg8[%874, %c0_238, %c0_239], %877 {strides = array<i32>} : memref<8x4x64xf32, #tpu.memory_space<vmem>>, vector<1x4x32xf32>,
    %878 = vector.extract_strided_slice %872 {offsets = [4, 0], sizes = [4, 32], strides = [1, 1]} : vector<8x32xf32> to vector<4x32xf32>
    %879 = arith.index_cast %836 : i32 to index
    %c0_240 = arith.constant 0 : index
    %c32_241 = arith.constant 32 : index
    %880 = vector.load %arg8[%879, %c0_240, %c32_241] : memref<8x4x64xf32, #tpu.memory_space<vmem>>, vector<1x4x32xf32>
    %881 = vector.shape_cast %880 : vector<1x4x32xf32> to vector<4x32xf32>
    %882 = vector.shape_cast %878 : vector<4x32xf32> to vector<1x4x32xf32>
    tpu.vector_store %arg8[%879, %c0_240, %c32_241], %882 {strides = array<i32>} : memref<8x4x64xf32, #tpu.memory_space<vmem>>, vector<1x4x32xf32>,
    %883 = vector.shape_cast %868 : vector<8x1xi1> to vector<8x1xi1>
    %884 = vector.broadcast %883 : vector<8x1xi1> to vector<8x32xi1>
    %885 = arith.select %884, %864, %832 : vector<8x32xi1>, vector<8x32xf32>
    %886 = vector.shape_cast %868 : vector<8x1xi1> to vector<8x1xi1>
    %887 = vector.broadcast %886 : vector<8x1xi1> to vector<8x32xi1>
    %888 = arith.select %887, %862, %835 : vector<8x32xi1>, vector<8x32xf32>
    %c8_i32_242 = arith.constant 8 : i32
    return
  }
}

</mosaic_0001>

<bundles_post_ra>
// kernel: tpu_custom_call.1
= control target key start
LH: loop header
LB: loop body
LE: loop exit
PB: predicated region body
PF: predicated region fallthrough
CT: control target
= control target key end

     0   :  { %13 = vsyncpa [#allocation4], 0  ;;  %s2943_s0 = inlined_call_operand.vmem [shape: s32[8,1], index: 0, kind: input, shape index: {}]   ;;  %s2944_s1 = inlined_call_operand.vmem [shape: f32[32,16], index: 1, kind: input, shape index: {}]   ;;  %s2945_s2 = inlined_call_operand.vmem [shape: f32[16,256], index: 2, kind: input, shape index: {}]   ;;  %s2946_s3 = inlined_call_operand.vmem [shape: f32[1,256], index: 3, kind: input, shape index: {}]   ;;  %s2947_s4 = inlined_call_operand.hbm [shape: f32[32,256], index: 4, kind: input, shape index: {}]   ;;  %s2948_s5 = inlined_call_operand.hbm [shape: f32[64,256], index: 5, kind: input, shape index: {}]   ;;  %s2949_s6 = inlined_call_operand.vmem [shape: f32[1,256], index: 6, kind: input, shape index: {}]   ;;  %s2950_s7 = inlined_call_operand.hbm [shape: f32[32,256], index: 7, kind: input, shape index: {}]   ;;  %s2951_s8 = inlined_call_operand.hbm [shape: f32[8,4,64], index: 8, kind: output, shape index: {}]  }
   0x1   :  { %14 = vsyncpa [#allocation7], 0 }
   0x2   :  { %15 = vsyncpa [#allocation5], 0  ;;  %s41_s29 = sshll.u32 %s2948_s5, 4  ;;  %s2187_s30 = smov [#allocation6]   ;;  %s42_s29 = int_to_ptr.hbm [resolvable:$true] %s41_s29 }
   0x3   :  { %s43_s9 = sshll.u32 %s2187_s30, 4  ;;  %s28_s12 = sshll.u32 %s2947_s4, 4  ;;  %s44_s9 = int_to_ptr.vmem [resolvable:$true] %s43_s9  ;;  %s29_s12 = int_to_ptr.hbm [resolvable:$true] %s28_s12 }
   0x4   :  { %s2188_s13 = smov 256   ;;  %s2189_s14 = smov 16  }
   0x5   :  { %49 = dma.hbm_to_vmem [thread:$0]  %s42_s29, 2048, %s44_s9, [#allocation7], %s2188_s13, %s2188_s13, %s2189_s14  }
   0x6   :  { %s2190_s15 = smov [#allocation3]   ;;  %s56_s19 = sshll.u32 %s2950_s7, 4  ;;  %s57_s19 = int_to_ptr.hbm [resolvable:$true] %s56_s19 }
   0x7   :  { %s30_s16 = sshll.u32 %s2190_s15, 4  ;;  %s2191_s5 = smov [#allocation8]   ;;  %s31_s16 = int_to_ptr.vmem [resolvable:$true] %s30_s16 }
   0x8   :  { %36 = dma.hbm_to_vmem [thread:$0]  %s29_s12, 1024, %s31_s16, [#allocation4], %s2188_s13, %s2188_s13, %s2189_s14  }
   0x9   :  { %s58_s20 = sshll.u32 %s2191_s5, 4  ;;  %s59_s20 = int_to_ptr.vmem [resolvable:$true] %s58_s20 }
   0xa   :  { %64 = dma.hbm_to_vmem [thread:$0]  %s57_s19, 1024, %s59_s20, [#allocation7], %s2188_s13, %s2188_s13, %s2189_s14  }
   0xb   :  { %2173 = dma.done.wait [#allocation4], 1024  }
   0xc   :  { %2174 = vsyncadd [#allocation4], 4294966272 }
   0xd   :  { %2175 = dma.done.wait [#allocation7], 3072  }
   0xe   :  { %2176 = vsyncadd [#allocation7], 4294964224  ;;  %v78_v0 = vlaneseq  ;;  %v2269_v4 = vld [vmem:[%s2943_s0] sm:$0xff]  ;;  %v93_v5 = vld [vmem:[%s2945_s2 + $0x18] sm:$0xff]  ;;  %vm100_vm4 = vcmask 130048   ;;  %vm183_vm5 = vcmask 1043456  }
   0xf   :  { %v92_v6 = vld [vmem:[%s2945_s2 + $0x10] sm:$0xff]  ;;  %156 = vmatpush.msra.mxu1 %v93_v5  ;;  %v91_v7 = vld [vmem:[%s2945_s2 + $0x8] sm:$0xff]  ;;  %v86_v8 = vld [vmem:[%s2944_s1] sm:$0xff] }
  0x10   :  { %v2259_v1 = vshrl.u32 %v78_v0, 7  ;;  %v82_v2 = vand.u32 127, %v78_v0  ;;  %127 = vmatpush.msra.mxu0 %v92_v6  ;;  %v90_v9 = vld [vmem:[%s2945_s2] sm:$0xff]  ;;  %v87_v10 = vld [vmem:[%s2944_s1 + $0x8] sm:$0xff]  ;;  %v88_v11 = vld [vmem:[%s2944_s1 + $0x10] sm:$0xff] }
  0x11   :  { %157 = vmatpush.msra.mxu1 %v91_v7  ;;  %v89_v12 = vld [vmem:[%s2944_s1 + $0x18] sm:$0xff]  ;;  %v94_v13 = vld [vmem:[%s2946_s3] sm:$0x3]  ;;  %s2179_s1 = smov 0  }
  0x12   :  { %vm80_vm0 = vcmp.lt.s32.totalorder %v2259_v1, 4  ;;  %vm83_vm1 = vcmp.ge.s32.totalorder %v82_v2, 64  ;;  %vm84_vm2 = vcmp.lt.s32.totalorder %v82_v2, 96  ;;  %128 = vmatpush.msra.mxu0 %v90_v9  ;;  %1924 = vmatmul.msk.f32.vlgmr.msra.gmra.mxu1 %vm100_vm4, %v86_v8  ;;  %v97_v14 = vperm.slane %v94_v13, 1 }
  0x13   :  { %vm2262_vm3 = vmand %vm83_vm1, %vm84_vm2  ;;  %1920 = vmatmul.msk.f32.vlgmr.msra.gmra.mxu0 %vm100_vm4, %v86_v8  ;;  %v96_v15 = vperm.slane %v94_v13, 0 }
  0x1a   :  { %1925 = vmatmul.msk.f32.gmra.mxu1 %vm100_vm4, %v87_v10 }
  0x1b   :  { %1921 = vmatmul.msk.f32.gmra.mxu0 %vm100_vm4, %v87_v10 }
  0x22   :  { %1926 = vmatmul.msk.f32.gmra.mxu1 %vm100_vm4, %v88_v11 }
  0x23   :  { %1922 = vmatmul.msk.f32.gmra.mxu0 %vm100_vm4, %v88_v11 }
  0x2a   :  { %1927 = vmatmul.msk.f32.gmra.mxu1 %vm100_vm4, %v89_v12 }
  0x2b   :  { %1923 = vmatmul.msk.f32.gmra.mxu0 %vm100_vm4, %v89_v12 }
  0x8f   :  { %v159_v16 = vpop.f32.mrf.mxu1 }
  0x90   :  { %v130_v17 = vpop.f32.mrf.mxu0  ;;  %v160_v18 = vadd.f32 %v159_v16, %v97_v14 }
  0x91   :  { %v131_v19 = vadd.f32 %v130_v17, %v96_v15 }
  0x92   :  { %v179_v20 = vrot.slane %v160_v18, 4 }
  0x94   :  { %v184_v21 = vsel %vm183_vm5, %v131_v19, %v179_v20  ;;  %v185_v22 = vsel %vm183_vm5, %v179_v20, %v131_v19 }
  0x95   :  { %v186_v23 = vrot.slane %v185_v22, 4  ;;  %204 = vst [vmem:[#allocation2] sm:$0xf] %v184_v21 }
  0x96   :  { %212 = vst [vmem:[#allocation1] ss:$2 sm:$0xff] %v184_v21 }
  0x97   :  { %205 = vst [vmem:[#allocation2 + $0x8] sm:$0xf] %v186_v23  ;;  %v162_v24 = vpop.f32.mrf.mxu1 }
  0x98   :  { %v133_v25 = vpop.f32.mrf.mxu0  ;;  %215 = vst [vmem:[#allocation1 + $0x10] ss:$2 sm:$0xff] %v186_v23  ;;  %v163_v26 = vadd.f32 %v162_v24, %v97_v14 }
  0x99   :  { %v134_v27 = vadd.f32 %v133_v25, %v96_v15 }
  0x9a   :  { %v180_v28 = vrot.slane %v163_v26, 4 }
  0x9c   :  { %v187_v29 = vsel %vm183_vm5, %v134_v27, %v180_v28  ;;  %v188_v30 = vsel %vm183_vm5, %v180_v28, %v134_v27 }
  0x9d   :  { %v189_v31 = vrot.slane %v188_v30, 4  ;;  %206 = vst [vmem:[#allocation2 + $0x10] sm:$0xf] %v187_v29  ;;  %v213_v32 = vld.sshfl [vmem:[#allocation1 + $0x8] sm:$0xff pattern:$0x75316420] }
  0x9e   :  { %218 = vst [vmem:[#allocation1 + $0x20] ss:$2 sm:$0xff] %v187_v29 }
  0x9f   :  { %207 = vst [vmem:[#allocation2 + $0x18] sm:$0xf] %v189_v31  ;;  %v165_v33 = vpop.f32.mrf.mxu1  ;;  %v216_v35 = vld.sshfl [vmem:[#allocation1 + $0x18] sm:$0xff pattern:$0x75316420] }
  0xa0   :  { %v136_v34 = vpop.f32.mrf.mxu0  ;;  %221 = vst [vmem:[#allocation1 + $0x30] ss:$2 sm:$0xff] %v189_v31  ;;  %v166_v36 = vadd.f32 %v165_v33, %v97_v14 }
  0xa1   :  { %v137_v37 = vadd.f32 %v136_v34, %v96_v15  ;;  %239 = vst [vmem:[#allocation2 + $0x4] sm:$0xf] %v213_v32 }
  0xa2   :  { %v181_v38 = vrot.slane %v166_v36, 4  ;;  %240 = vst [vmem:[#allocation2 + $0xc] sm:$0xf] %v216_v35 }
  0xa4   :  { %v190_v39 = vsel %vm183_vm5, %v137_v37, %v181_v38  ;;  %v191_v40 = vsel %vm183_vm5, %v181_v38, %v137_v37 }
  0xa5   :  { %v192_v41 = vrot.slane %v191_v40, 4  ;;  %208 = vst [vmem:[#allocation2 + $0x20] sm:$0xf] %v190_v39  ;;  %v219_v42 = vld.sshfl [vmem:[#allocation1 + $0x28] sm:$0xff pattern:$0x75316420] }
  0xa6   :  { %223 = vst [vmem:[#allocation1] ss:$2 sm:$0xff] %v190_v39 }
  0xa7   :  { %209 = vst [vmem:[#allocation2 + $0x28] sm:$0xf] %v192_v41  ;;  %v168_v43 = vpop.f32.mrf.mxu1  ;;  %v222_v45 = vld.sshfl [vmem:[#allocation1 + $0x38] sm:$0xff pattern:$0x75316420] }
  0xa8   :  { %v139_v44 = vpop.f32.mrf.mxu0  ;;  %225 = vst [vmem:[#allocation1 + $0x10] ss:$2 sm:$0xff] %v192_v41  ;;  %v169_v46 = vadd.f32 %v168_v43, %v97_v14 }
  0xa9   :  { %v140_v47 = vadd.f32 %v139_v44, %v96_v15  ;;  %241 = vst [vmem:[#allocation2 + $0x14] sm:$0xf] %v219_v42 }
  0xaa   :  { %v182_v48 = vrot.slane %v169_v46, 4  ;;  %242 = vst [vmem:[#allocation2 + $0x1c] sm:$0xf] %v222_v45 }
  0xac   :  { %v193_v49 = vsel %vm183_vm5, %v140_v47, %v182_v48  ;;  %v194_v50 = vsel %vm183_vm5, %v182_v48, %v140_v47 }
  0xad   :  { %v224_v51 = vld.sshfl [vmem:[#allocation1 + $0x8] sm:$0xff pattern:$0x75316420]  ;;  %v195_v52 = vrot.slane %v194_v50, 4  ;;  %210 = vst [vmem:[#allocation2 + $0x30] sm:$0xf] %v193_v49 }
  0xae   :  { %243 = vst [vmem:[#allocation2 + $0x24] sm:$0xf] %v224_v51 }
  0xaf   :  { %v226_v53 = vld.sshfl [vmem:[#allocation1 + $0x18] sm:$0xff pattern:$0x75316420]  ;;  %211 = vst [vmem:[#allocation2 + $0x38] sm:$0xf] %v195_v52 }
  0xb0   :  { %244 = vst [vmem:[#allocation2 + $0x2c] sm:$0xf] %v226_v53 }
  0xb1   :  { %227 = vst [vmem:[#allocation1 + $0x20] ss:$2 sm:$0xff] %v193_v49 }
  0xb2   :  { %229 = vst [vmem:[#allocation1 + $0x30] ss:$2 sm:$0xff] %v195_v52 }
  0xb8   :  { %v228_v54 = vld.sshfl [vmem:[#allocation1 + $0x28] sm:$0xff pattern:$0x75316420] }
  0xb9   :  { %v230_v55 = vld.sshfl [vmem:[#allocation1 + $0x38] sm:$0xff pattern:$0x75316420]  ;;  %245 = vst [vmem:[#allocation2 + $0x34] sm:$0xf] %v228_v54 }
  0xba   :  { %246 = vst [vmem:[#allocation2 + $0x3c] sm:$0xf] %v230_v55 }
  0xbb LB: > { %s253_s3 = ssub.s32 7, %s2181_s1  ;;  %s1928_s15 = sshll.u32 %s2181_s1, 3  ;;  %s2181_s1 = sphi %s2179_s1, %s252_s1  }
  0xbc   : > { %s1929_s16 = sshll.u32 %s253_s3, 3  ;;  %s255_s17 = scalar_lea.vmem [#allocation2], %s1928_s15 }
  0xbd   : > { %s258_s18 = scalar_lea.vmem [#allocation2], %s1929_s16  ;;  %s252_s1 = sadd.s32 1, %s2181_s1  }
  0xbe   : > { %p249_p0 = scmp.ge.s32.totalorder %s252_s1, 4  }
  0xbf   :  { %v2310_v60 = vld [vmem:[#allocation3 + $0x30] sm:$0xff] (%p249_p0)  ;;  %v2312_v61 = vld [vmem:[#allocation3 + $0x38] sm:$0xff] (%p249_p0)  ;;  %v2314_v62 = vld [vmem:[#allocation3 + $0x20] sm:$0xff] (%p249_p0)  ;;  %v2192_v7 = vmov (%p249_p0), 0.0   ;;  %s2193_s19 = smov (%p249_p0), 64   ;;  %s2194_s5 = smov (%p249_p0), 32  }
  0xc0   :  { %291 = vmatpush.msra.mxu2 (%p249_p0), %v2310_v60  ;;  %311 = vmatpush.msra.mxu3 (%p249_p0), %v2312_v61  ;;  %v2318_v63 = vld [vmem:[#allocation3 + $0x28] sm:$0xff] (%p249_p0)  ;;  %v2320_v0 = vld [vmem:[#allocation3 + $0x10] sm:$0xff] (%p249_p0)  ;;  %v2322_v2 = vld [vmem:[#allocation3 + $0x18] sm:$0xff] (%p249_p0)  ;;  %v2195_v21 = vmov (%p249_p0), 0   ;;  %v2196_v26 = vmov (%p249_p0), 7   ;;  %vm358_vm8 = vcmask (%p249_p0), 257024  }
  0xc1   : > { %v256_v56 = vld [vmem:[%s255_s17] sm:$0xff]  ;;  %251 = sbr.rel (!%p249_p0) target bundleno = 187 (0xbb), region = 109  ;;  %662 = vmatpush.msrb.mxu0 (%p249_p0), %v2310_v60  ;;  %682 = vmatpush.msrb.mxu1 (%p249_p0), %v2312_v61  ;;  %v2328_v5 = vld [vmem:[#allocation3] sm:$0xff] (%p249_p0)  ;;  %v2330_v6 = vld [vmem:[#allocation3 + $0x8] sm:$0xff] (%p249_p0)  ;;  %v346_v27 = vsel (%p249_p0), %vm80_vm0, 0, %v2196_v26  ;;  %vm275_vm9 = vcmask (%p249_p0), 261120  }
  0xc2   : > { %v259_v57 = vld [vmem:[%s258_s18] sm:$0xff]  ;;  %292 = vmatpush.msra.mxu2 (%p249_p0), %v2314_v62  ;;  %312 = vmatpush.msra.mxu3 (%p249_p0), %v2318_v63  ;;  %vm347_vm6 = vcmp.lt.s32.totalorder (%p249_p0), %v346_v27, %v2269_v4  ;;  %v2197_v45 = vmov (%p249_p0), 6  }
  0xc3   : > { %v262_v58 = vsel %vm80_vm0, %v256_v56, %v259_v57  ;;  %v264_v59 = vsel %vm80_vm0, %v259_v57, %v256_v56  ;;  %663 = vmatpush.msrb.mxu0 (%p249_p0), %v2314_v62  ;;  %683 = vmatpush.msrb.mxu1 (%p249_p0), %v2318_v63  ;;  %v348_v28 = vsel (%p249_p0), %vm347_vm6, 1, %v2195_v21  ;;  %v436_v46 = vsel (%p249_p0), %vm80_vm0, 1, %v2197_v45 }
  0xc4   : > { %263 = vst [vmem:[%s255_s17] sm:$0xff] %v262_v58  ;;  %293 = vmatpush.msra.mxu2 (%p249_p0), %v2320_v0  ;;  %313 = vmatpush.msra.mxu3 (%p249_p0), %v2322_v2  ;;  %vm437_vm10 = vcmp.lt.s32.totalorder (%p249_p0), %v436_v46, %v2269_v4 }
  0xc5   : > { %265 = vst [vmem:[%s258_s18] sm:$0xff] %v264_v59  ;;  %664 = vmatpush.msrb.mxu0 (%p249_p0), %v2320_v0  ;;  %684 = vmatpush.msrb.mxu1 (%p249_p0), %v2322_v2  ;;  %v438_v47 = vsel (%p249_p0), %vm437_vm10, 1, %v2195_v21 }
  0xc6   :  { %294 = vmatpush.msra.mxu2 %v2328_v5  ;;  %314 = vmatpush.msra.mxu3 %v2330_v6 }
  0xc7   :  { %295 = vmatmul.f32.vlgmr.msra.gmra.mxu2 %v2192_v7  ;;  %315 = vmatmul.f32.vlgmr.msra.gmra.mxu3 %v2192_v7 }
  0xc8   :  { %383 = vmatpush.msrb.mxu2 %v2310_v60  ;;  %403 = vmatpush.msrb.mxu3 %v2312_v61 }
  0xc9   :  { %665 = vmatpush.msrb.mxu0 %v2328_v5  ;;  %685 = vmatpush.msrb.mxu1 %v2330_v6 }
  0xca   :  { %384 = vmatpush.msrb.mxu2 %v2314_v62  ;;  %404 = vmatpush.msrb.mxu3 %v2318_v63 }
  0xcb   :  { %844 = vmatpush.msra.mxu0 %v2310_v60  ;;  %864 = vmatpush.msra.mxu1 %v2312_v61 }
  0xcc   :  { %385 = vmatpush.msrb.mxu2 %v2320_v0  ;;  %405 = vmatpush.msrb.mxu3 %v2322_v2  ;;  %v274_v8 = vld [vmem:[#allocation2] sm:$0xff]  ;;  %v368_v34 = vld [vmem:[#allocation2 + $0x8] sm:$0xff] }
  0xcd   :  { %845 = vmatpush.msra.mxu0 %v2314_v62  ;;  %865 = vmatpush.msra.mxu1 %v2318_v63 }
  0xce   :  { %386 = vmatpush.msrb.mxu2 %v2328_v5  ;;  %406 = vmatpush.msrb.mxu3 %v2330_v6 }
  0xcf   :  { %846 = vmatpush.msra.mxu0 %v2320_v0  ;;  %866 = vmatpush.msra.mxu1 %v2322_v2 }
  0xd0   :  { %476 = vmatpush.msra.mxu2 %v2310_v60  ;;  %496 = vmatpush.msra.mxu3 %v2312_v61 }
  0xd1   :  { %847 = vmatpush.msra.mxu0 %v2328_v5  ;;  %867 = vmatpush.msra.mxu1 %v2330_v6 }
  0xd2   :  { %477 = vmatpush.msra.mxu2 %v2314_v62  ;;  %497 = vmatpush.msra.mxu3 %v2318_v63 }
  0xd3   :  { %2002 = vset.pattern.permute.xlu1 %v2195_v21  ;;  %2003 = vset.pattern.permute.xlu2 %v2195_v21 }
  0xd4   :  { %478 = vmatpush.msra.mxu2 %v2320_v0  ;;  %498 = vmatpush.msra.mxu3 %v2322_v2 }
  0xd5   :  { %2004 = vset.pattern.permute.xlu0 %v2195_v21 }
  0xd6   :  { %479 = vmatpush.msra.mxu2 %v2328_v5  ;;  %499 = vmatpush.msra.mxu3 %v2330_v6 }
 0x14a   :  { %v296_v9 = vpop.f32.mrf.mxu2  ;;  %v316_v10 = vpop.f32.mrf.mxu3 }
 0x14b   :  { %v321_v11 = vsel %vm80_vm0, %v296_v9, %v316_v10 }
 0x14c   :  { %v322_v12 = vadd.f32 %v321_v11, %v274_v8  ;;  %v458_v8 = vld [vmem:[#allocation2 + $0x10] sm:$0xff] }
 0x14e   :  { %v323_v13 = vmul.f32 0.5, %v322_v12 }
 0x150   :  { %v324_v14 = vsel %vm2262_vm3, %v322_v12, %v323_v13 }
 0x151   :  { %2005 = vtanh.f32 %v324_v14 }
 0x157   :  { %v2006_v15 = vpop.eup %2005 }
 0x158   :  { %v326_v16 = vmul.f32 0.5, %v2006_v15 }
 0x15a   :  { %v327_v17 = vadd.f32 0.5, %v326_v16 }
 0x15c   :  { %v328_v18 = vsel %vm2262_vm3, %v2006_v15, %v327_v17 }
 0x15d   :  { %331 = vrot.lane.b32.xlu0 %v328_v18, %s2193_s19  ;;  %v329_v22 = vmul.f32 0.0, %v328_v18 }
 0x1cf   :  { %v332_v19 = vpop.permute.xlu0 %331 }
 0x1d0   :  { %v334_v20 = vmul.f32 %v332_v19, %v328_v18  ;;  %v2198_v19 = vmov 5  }
 0x1d2   :  { %336 = vrot.lane.b32.xlu0 %v334_v20, %s2194_s5  ;;  %v529_v20 = vsel %vm80_vm0, 2, %v2198_v19 }
 0x1d3   :  { %vm530_vm12 = vcmp.lt.s32.totalorder %v529_v20, %v2269_v4 }
 0x244   :  { %v337_v23 = vpop.permute.xlu0 %336 }
 0x245   :  { %v339_v24 = vadd.f32 %v337_v23, %v329_v22  ;;  %v531_v22 = vsel %vm530_vm12, 1, %v2195_v21 }
 0x247   :  { %2007 = vtanh.f32 %v339_v24 }
 0x24d   :  { %v2008_v25 = vpop.eup %2007 }
 0x24e   :  { %342 = vrot.lane.b32.xlu1 %v2008_v25, %s2193_s19 }
 0x256   :  { %350 = vperm.xlu1 %2002, %v348_v28  }
 0x2c0   :  { %v343_v29 = vpop.permute.xlu1 %342 }
 0x2c1   :  { %v345_v30 = vmul.f32 %v343_v29, %v328_v18 }
 0x2c8   :  { %v2384_v31 = vpop.permute.xlu1 %350 }
 0x2c9   :  { %vm352_vm7 = vcmp.eq.s32.totalorder %v2384_v31, 1 }
 0x2ca   :  { %v2389_v32 = vsel %vm352_vm7, %v345_v30, 0.0  ;;  %v366_v50 = vsel %vm352_vm7, %v339_v24, 0.0 }
 0x2cb   :  { %355 = vrot.lane.b32.xlu2 %v2389_v32, %s2194_s5 }
 0x325   :  { %v356_v33 = vpop.permute.xlu2 %355 }
 0x326   :  { %359 = vst.msk [vmem:[#allocation9] sm:$0xf] %vm358_vm8, %v356_v33  ;;  %1930 = vmatmul.msk.f32.vlgmr.msrb.gmra.mxu2 %vm275_vm9, %v356_v33  ;;  %1931 = vmatmul.msk.f32.vlgmr.msrb.gmra.mxu3 %vm275_vm9, %v356_v33 }
 0x327   :  { %569 = vmatpush.msrb.mxu2 %v2310_v60  ;;  %589 = vmatpush.msrb.mxu3 %v2312_v61 }
 0x329   :  { %570 = vmatpush.msrb.mxu2 %v2314_v62  ;;  %590 = vmatpush.msrb.mxu3 %v2318_v63 }
 0x32b   :  { %571 = vmatpush.msrb.mxu2 %v2320_v0  ;;  %591 = vmatpush.msrb.mxu3 %v2322_v2 }
 0x32d   :  { %572 = vmatpush.msrb.mxu2 %v2328_v5  ;;  %592 = vmatpush.msrb.mxu3 %v2330_v6 }
 0x3a9   :  { %v388_v35 = vpop.f32.mrf.mxu2  ;;  %v408_v36 = vpop.f32.mrf.mxu3 }
 0x3aa   :  { %v411_v37 = vsel %vm80_vm0, %v388_v35, %v408_v36 }
 0x3ab   :  { %v412_v38 = vadd.f32 %v411_v37, %v368_v34  ;;  %v551_v37 = vld [vmem:[#allocation2 + $0x18] sm:$0xff] }
 0x3ad   :  { %v413_v39 = vmul.f32 0.5, %v412_v38 }
 0x3af   :  { %v414_v40 = vsel %vm2262_vm3, %v412_v38, %v413_v39 }
 0x3b0   :  { %2009 = vtanh.f32 %v414_v40 }
 0x3b6   :  { %v2010_v41 = vpop.eup %2009 }
 0x3b7   :  { %v416_v42 = vmul.f32 0.5, %v2010_v41 }
 0x3b9   :  { %v417_v43 = vadd.f32 0.5, %v416_v42 }
 0x3bb   :  { %v418_v44 = vsel %vm2262_vm3, %v2010_v41, %v417_v43  ;;  %v2200_v43 = vmov 3  }
 0x3bc   :  { %421 = vrot.lane.b32.xlu2 %v418_v44, %s2193_s19  ;;  %v419_v51 = vmul.f32 %v418_v44, %v366_v50 }
 0x3c4   :  { %440 = vperm.xlu2 %2003, %v438_v47  }
 0x416   :  { %v422_v48 = vpop.permute.xlu2 %421 }
 0x417   :  { %v424_v49 = vmul.f32 %v422_v48, %v418_v44 }
 0x419   :  { %426 = vrot.lane.b32.xlu0 %v424_v49, %s2194_s5 }
 0x41e   :  { %v2419_v55 = vpop.permute.xlu2 %440 }
 0x41f   :  { %vm442_vm11 = vcmp.eq.s32.totalorder %v2419_v55, 1 }
 0x48b   :  { %v427_v52 = vpop.permute.xlu0 %426 }
 0x48c   :  { %v429_v53 = vadd.f32 %v427_v52, %v419_v51 }
 0x48e   :  { %2011 = vtanh.f32 %v429_v53  ;;  %v456_v25 = vsel %vm442_vm11, %v429_v53, %v366_v50 }
 0x494   :  { %v2012_v54 = vpop.eup %2011 }
 0x495   :  { %432 = vrot.lane.b32.xlu1 %v2012_v54, %s2193_s19 }
 0x507   :  { %v433_v56 = vpop.permute.xlu1 %432 }
 0x508   :  { %v2421_v57 = vmul.f32 %v433_v56, %v418_v44  ;;  %v715_v44 = vsel %vm80_vm0, 4, %v2200_v43 }
 0x509   :  { %vm716_vm15 = vcmp.lt.s32.totalorder %v715_v44, %v2269_v4 }
 0x50a   :  { %v455_v58 = vsel %vm442_vm11, %v2421_v57, %v2389_v32  ;;  %v717_v45 = vsel %vm716_vm15, 1, %v2195_v21  ;;  %vm364_vm15 = vcmask 523524  }
 0x50b   :  { %460 = vrot.lane.b32.xlu0 %v455_v58, %s2194_s5 }
 0x57d   :  { %v461_v59 = vpop.permute.xlu0 %460 }
 0x57e   :  { %1932 = vmatmul.msk.f32.vlgmr.msra.gmra.mxu2 %vm275_vm9, %v461_v59  ;;  %1933 = vmatmul.msk.f32.vlgmr.msra.gmra.mxu3 %vm275_vm9, %v461_v59 }
 0x57f   :  { %753 = vmatpush.msra.mxu2 %v2310_v60  ;;  %773 = vmatpush.msra.mxu3 %v2312_v61 }
 0x581   :  { %754 = vmatpush.msra.mxu2 %v2314_v62  ;;  %774 = vmatpush.msra.mxu3 %v2318_v63 }
 0x583   :  { %755 = vmatpush.msra.mxu2 %v2320_v0  ;;  %775 = vmatpush.msra.mxu3 %v2322_v2 }
 0x585   :  { %756 = vmatpush.msra.mxu2 %v2328_v5  ;;  %776 = vmatpush.msra.mxu3 %v2330_v6 }
 0x601   :  { %v481_v9 = vpop.f32.mrf.mxu2  ;;  %v501_v10 = vpop.f32.mrf.mxu3 }
 0x602   :  { %v504_v11 = vsel %vm80_vm0, %v481_v9, %v501_v10 }
 0x603   :  { %v505_v12 = vadd.f32 %v504_v11, %v458_v8  ;;  %v644_v8 = vld [vmem:[#allocation2 + $0x20] sm:$0xff] }
 0x605   :  { %v506_v13 = vmul.f32 0.5, %v505_v12 }
 0x607   :  { %v507_v14 = vsel %vm2262_vm3, %v505_v12, %v506_v13 }
 0x608   :  { %2013 = vtanh.f32 %v507_v14 }
 0x60e   :  { %v2014_v15 = vpop.eup %2013 }
 0x60f   :  { %v509_v16 = vmul.f32 0.5, %v2014_v15 }
 0x611   :  { %v510_v17 = vadd.f32 0.5, %v509_v16 }
 0x613   :  { %v511_v18 = vsel %vm2262_vm3, %v2014_v15, %v510_v17 }
 0x614   :  { %514 = vrot.lane.b32.xlu1 %v511_v18, %s2193_s19  ;;  %v512_v26 = vmul.f32 %v511_v18, %v456_v25 }
 0x61c   :  { %533 = vperm.xlu1 %2002, %v531_v22  }
 0x686   :  { %v515_v23 = vpop.permute.xlu1 %514 }
 0x687   :  { %v517_v24 = vmul.f32 %v515_v23, %v511_v18 }
 0x689   :  { %519 = vrot.lane.b32.xlu2 %v517_v24, %s2194_s5 }
 0x68e   :  { %v2454_v30 = vpop.permute.xlu1 %533 }
 0x68f   :  { %vm535_vm13 = vcmp.eq.s32.totalorder %v2454_v30, 1 }
 0x6e3   :  { %v520_v27 = vpop.permute.xlu2 %519 }
 0x6e4   :  { %v522_v28 = vadd.f32 %v520_v27, %v512_v26 }
 0x6e6   :  { %2015 = vtanh.f32 %v522_v28  ;;  %v549_v48 = vsel %vm535_vm13, %v522_v28, %v456_v25 }
 0x6ec   :  { %v2016_v29 = vpop.eup %2015 }
 0x6ed   :  { %525 = vrot.lane.b32.xlu0 %v2016_v29, %s2193_s19 }
 0x75f   :  { %v526_v33 = vpop.permute.xlu0 %525 }
 0x760   :  { %v2456_v34 = vmul.f32 %v526_v33, %v511_v18 }
 0x762   :  { %v548_v35 = vsel %vm535_vm13, %v2456_v34, %v455_v58 }
 0x763   :  { %553 = vrot.lane.b32.xlu2 %v548_v35, %s2194_s5 }
 0x7bd   :  { %v554_v36 = vpop.permute.xlu2 %553 }
 0x7be   :  { %1934 = vmatmul.msk.f32.vlgmr.msrb.gmra.mxu2 %vm275_vm9, %v554_v36  ;;  %1935 = vmatmul.msk.f32.vlgmr.msrb.gmra.mxu3 %vm275_vm9, %v554_v36  ;;  %v735_v36 = vld [vmem:[#allocation2 + $0x28] sm:$0xff] }
 0x7bf   :  { %935 = vmatpush.msrb.mxu2 %v2310_v60  ;;  %955 = vmatpush.msrb.mxu3 %v2312_v61 }
 0x7c1   :  { %936 = vmatpush.msrb.mxu2 %v2314_v62  ;;  %956 = vmatpush.msrb.mxu3 %v2318_v63 }
 0x7c3   :  { %937 = vmatpush.msrb.mxu2 %v2320_v0  ;;  %957 = vmatpush.msrb.mxu3 %v2322_v2 }
 0x7c5   :  { %938 = vmatpush.msrb.mxu2 %v2328_v5  ;;  %958 = vmatpush.msrb.mxu3 %v2330_v6  ;;  %v2199_v5 = vmov 4  }
 0x7c6   :  { %v622_v6 = vsel %vm80_vm0, 3, %v2199_v5 }
 0x7c7   :  { %vm623_vm14 = vcmp.lt.s32.totalorder %v622_v6, %v2269_v4 }
 0x7c8   :  { %v624_v42 = vsel %vm623_vm14, 1, %v2195_v21 }
 0x841   :  { %v574_v38 = vpop.f32.mrf.mxu2  ;;  %v594_v39 = vpop.f32.mrf.mxu3 }
 0x842   :  { %v597_v60 = vsel %vm80_vm0, %v574_v38, %v594_v39 }
 0x843   :  { %v598_v40 = vadd.f32 %v597_v60, %v551_v37 }
 0x845   :  { %v599_v61 = vmul.f32 0.5, %v598_v40 }
 0x847   :  { %v600_v62 = vsel %vm2262_vm3, %v598_v40, %v599_v61 }
 0x848   :  { %2017 = vtanh.f32 %v600_v62 }
 0x84e   :  { %v2018_v63 = vpop.eup %2017 }
 0x84f   :  { %v602_v0 = vmul.f32 0.5, %v2018_v63 }
 0x851   :  { %v603_v41 = vadd.f32 0.5, %v602_v0 }
 0x853   :  { %v604_v2 = vsel %vm2262_vm3, %v2018_v63, %v603_v41 }
 0x854   :  { %607 = vrot.lane.b32.xlu0 %v604_v2, %s2193_s19  ;;  %v605_v49 = vmul.f32 %v604_v2, %v549_v48 }
 0x85c   :  { %626 = vperm.xlu0 %2004, %v624_v42  }
 0x864   :  { %719 = vperm.xlu0 %2004, %v717_v45  }
 0x8c6   :  { %v608_v46 = vpop.permute.xlu0 %607 }
 0x8c7   :  { %v610_v47 = vmul.f32 %v608_v46, %v604_v2 }
 0x8c9   :  { %612 = vrot.lane.b32.xlu1 %v610_v47, %s2194_s5 }
 0x8ce   :  { %v2492_v53 = vpop.permute.xlu0 %626 }
 0x8cf   :  { %vm628_vm1 = vcmp.eq.s32.totalorder %v2492_v53, 1 }
 0x8d6   :  { %v2514_v27 = vpop.permute.xlu0 %719 }
 0x8d7   :  { %vm721_vm2 = vcmp.eq.s32.totalorder %v2514_v27, 1 }
 0x93b   :  { %v613_v50 = vpop.permute.xlu1 %612 }
 0x93c   :  { %v615_v51 = vadd.f32 %v613_v50, %v605_v49 }
 0x93e   :  { %2019 = vtanh.f32 %v615_v51  ;;  %v642_v22 = vsel %vm628_vm1, %v615_v51, %v549_v48 }
 0x944   :  { %v2020_v52 = vpop.eup %2019 }
 0x945   :  { %618 = vrot.lane.b32.xlu2 %v2020_v52, %s2193_s19 }
 0x99f   :  { %v619_v54 = vpop.permute.xlu2 %618 }
 0x9a0   :  { %v2494_v56 = vmul.f32 %v619_v54, %v604_v2  ;;  %v2201_v2 = vmov 2  }
 0x9a1   :  { %v806_v5 = vsel %vm80_vm0, 5, %v2201_v2 }
 0x9a2   :  { %v641_v58 = vsel %vm628_vm1, %v2494_v56, %v548_v35  ;;  %vm807_vm4 = vcmp.lt.s32.totalorder %v806_v5, %v2269_v4 }
 0x9a3   :  { %646 = vrot.lane.b32.xlu1 %v641_v58, %s2194_s5  ;;  %v808_v6 = vsel %vm807_vm4, 1, %v2195_v21 }
 0xa15   :  { %v647_v59 = vpop.permute.xlu1 %646 }
 0xa16   :  { %1936 = vmatmul.msk.f32.vlgmr.msrb.gmra.mxu0 %vm275_vm9, %v647_v59  ;;  %1937 = vmatmul.msk.f32.vlgmr.msrb.gmra.mxu1 %vm275_vm9, %v647_v59 }
 0xa93   :  { %v667_v9 = vpop.f32.mrf.mxu0  ;;  %v687_v10 = vpop.f32.mrf.mxu1 }
 0xa94   :  { %v690_v11 = vsel %vm80_vm0, %v667_v9, %v687_v10 }
 0xa95   :  { %v691_v12 = vadd.f32 %v690_v11, %v644_v8 }
 0xa97   :  { %v692_v13 = vmul.f32 0.5, %v691_v12 }
 0xa99   :  { %v693_v14 = vsel %vm2262_vm3, %v691_v12, %v692_v13 }
 0xa9a   :  { %2021 = vtanh.f32 %v693_v14 }
 0xaa0   :  { %v2022_v15 = vpop.eup %2021 }
 0xaa1   :  { %v695_v16 = vmul.f32 0.5, %v2022_v15 }
 0xaa3   :  { %v696_v17 = vadd.f32 0.5, %v695_v16 }
 0xaa5   :  { %v697_v18 = vsel %vm2262_vm3, %v2022_v15, %v696_v17  ;;  %v2202_v17 = vmov 1  }
 0xaa6   :  { %700 = vrot.lane.b32.xlu2 %v697_v18, %s2193_s19  ;;  %v698_v23 = vmul.f32 %v697_v18, %v642_v22 }
 0xb00   :  { %v701_v19 = vpop.permute.xlu2 %700 }
 0xb01   :  { %v703_v20 = vmul.f32 %v701_v19, %v697_v18 }
 0xb03   :  { %705 = vrot.lane.b32.xlu1 %v703_v20, %s2194_s5 }
 0xb75   :  { %v706_v24 = vpop.permute.xlu1 %705 }
 0xb76   :  { %v708_v25 = vadd.f32 %v706_v24, %v698_v23 }
 0xb78   :  { %2023 = vtanh.f32 %v708_v25  ;;  %v733_v44 = vsel %vm721_vm2, %v708_v25, %v642_v22 }
 0xb7e   :  { %v2024_v26 = vpop.eup %2023 }
 0xb7f   :  { %711 = vrot.lane.b32.xlu2 %v2024_v26, %s2193_s19 }
 0xbd9   :  { %v712_v28 = vpop.permute.xlu2 %711 }
 0xbda   :  { %v2516_v29 = vmul.f32 %v712_v28, %v697_v18  ;;  %v897_v18 = vsel %vm80_vm0, 6, %v2202_v17 }
 0xbdb   :  { %vm898_vm10 = vcmp.lt.s32.totalorder %v897_v18, %v2269_v4 }
 0xbdc   :  { %v732_v33 = vsel %vm721_vm2, %v2516_v29, %v641_v58  ;;  %v826_v58 = vld [vmem:[#allocation2 + $0x30] sm:$0xff]  ;;  %v899_v19 = vsel %vm898_vm10, 1, %v2195_v21  ;;  %vm1062_vm10 = vcmask 523264  }
 0xbdd   :  { %737 = vrot.lane.b32.xlu1 %v732_v33, %s2194_s5 }
 0xc4f   :  { %v738_v35 = vpop.permute.xlu1 %737 }
 0xc50   :  { %1938 = vmatmul.msk.f32.vlgmr.msra.gmra.mxu2 %vm275_vm9, %v738_v35  ;;  %1939 = vmatmul.msk.f32.vlgmr.msra.gmra.mxu3 %vm275_vm9, %v738_v35 }
 0xcd3   :  { %v758_v37 = vpop.f32.mrf.mxu2  ;;  %v778_v38 = vpop.f32.mrf.mxu3 }
 0xcd4   :  { %v781_v39 = vsel %vm80_vm0, %v758_v37, %v778_v38 }
 0xcd5   :  { %v782_v60 = vadd.f32 %v781_v39, %v735_v36  ;;  %v917_v39 = vld [vmem:[#allocation2 + $0x38] sm:$0xff] }
 0xcd7   :  { %v783_v40 = vmul.f32 0.5, %v782_v60 }
 0xcd9   :  { %v784_v61 = vsel %vm2262_vm3, %v782_v60, %v783_v40 }
 0xcda   :  { %2025 = vtanh.f32 %v784_v61 }
 0xce0   :  { %v2026_v62 = vpop.eup %2025 }
 0xce1   :  { %v786_v63 = vmul.f32 0.5, %v2026_v62 }
 0xce3   :  { %v787_v0 = vadd.f32 0.5, %v786_v63 }
 0xce5   :  { %v788_v41 = vsel %vm2262_vm3, %v2026_v62, %v787_v0 }
 0xce6   :  { %791 = vrot.lane.b32.xlu2 %v788_v41, %s2193_s19  ;;  %v789_v45 = vmul.f32 %v788_v41, %v733_v44 }
 0xcee   :  { %810 = vperm.xlu2 %2003, %v808_v6  }
 0xd40   :  { %v792_v42 = vpop.permute.xlu2 %791 }
 0xd41   :  { %v794_v43 = vmul.f32 %v792_v42, %v788_v41  ;;  %v988_v42 = vsel %vm80_vm0, 7, %v2195_v21 }
 0xd42   :  { %vm989_vm14 = vcmp.lt.s32.totalorder %v988_v42, %v2269_v4  ;;  %v536_v4 = vsel %vm535_vm13, %v2456_v34, 0.0 }
 0xd43   :  { %796 = vrot.lane.b32.xlu0 %v794_v43, %s2194_s5  ;;  %v990_v43 = vsel %vm989_vm14, 1, %v2195_v21 }
 0xd48   :  { %v2540_v49 = vpop.permute.xlu2 %810 }
 0xd49   :  { %vm812_vm6 = vcmp.eq.s32.totalorder %v2540_v49, 1 }
 0xdb5   :  { %v797_v46 = vpop.permute.xlu0 %796 }
 0xdb6   :  { %v799_v47 = vadd.f32 %v797_v46, %v789_v45 }
 0xdb8   :  { %2027 = vtanh.f32 %v799_v47  ;;  %v824_v23 = vsel %vm812_vm6, %v799_v47, %v733_v44  ;;  %v722_v44 = vsel %vm721_vm2, %v2516_v29, 0.0  ;;  %v443_v47 = vsel %vm442_vm11, %v2421_v57, 0.0 }
 0xdbe   :  { %v2028_v48 = vpop.eup %2027 }
 0xdbf   :  { %802 = vrot.lane.b32.xlu1 %v2028_v48, %s2193_s19 }
 0xe31   :  { %v803_v50 = vpop.permute.xlu1 %802 }
 0xe32   :  { %v2542_v51 = vmul.f32 %v803_v50, %v788_v41 }
 0xe34   :  { %v823_v52 = vsel %vm812_vm6, %v2542_v51, %v732_v33  ;;  %v813_v21 = vsel %vm812_vm6, %v2542_v51, 0.0 }
 0xe35   :  { %828 = vrot.lane.b32.xlu0 %v823_v52, %s2194_s5 }
 0xea7   :  { %v829_v54 = vpop.permute.xlu0 %828 }
 0xea8   :  { %1940 = vmatmul.msk.f32.vlgmr.msra.gmra.mxu0 %vm275_vm9, %v829_v54  ;;  %1941 = vmatmul.msk.f32.vlgmr.msra.gmra.mxu1 %vm275_vm9, %v829_v54 }
 0xf25   :  { %v849_v59 = vpop.f32.mrf.mxu0  ;;  %v869_v8 = vpop.f32.mrf.mxu1 }
 0xf26   :  { %v872_v9 = vsel %vm80_vm0, %v849_v59, %v869_v8  ;;  %v629_v59 = vsel %vm628_vm1, %v2494_v56, 0.0 }
 0xf27   :  { %v873_v10 = vadd.f32 %v872_v9, %v826_v58 }
 0xf29   :  { %v874_v11 = vmul.f32 0.5, %v873_v10 }
 0xf2b   :  { %v875_v12 = vsel %vm2262_vm3, %v873_v10, %v874_v11 }
 0xf2c   :  { %2029 = vtanh.f32 %v875_v12 }
 0xf32   :  { %v2030_v13 = vpop.eup %2029 }
 0xf33   :  { %v877_v14 = vmul.f32 0.5, %v2030_v13 }
 0xf35   :  { %v878_v15 = vadd.f32 0.5, %v877_v14 }
 0xf37   :  { %v879_v16 = vsel %vm2262_vm3, %v2030_v13, %v878_v15 }
 0xf38   :  { %882 = vrot.lane.b32.xlu1 %v879_v16, %s2193_s19  ;;  %v880_v24 = vmul.f32 %v879_v16, %v824_v23 }
 0xf40   :  { %901 = vperm.xlu1 %2002, %v899_v19  }
 0xfaa   :  { %v883_v20 = vpop.permute.xlu1 %882 }
 0xfab   :  { %v885_v22 = vmul.f32 %v883_v20, %v879_v16 }
 0xfad   :  { %887 = vrot.lane.b32.xlu2 %v885_v22, %s2194_s5 }
 0xfb2   :  { %v2566_v33 = vpop.permute.xlu1 %901 }
 0xfb3   :  { %vm903_vm12 = vcmp.eq.s32.totalorder %v2566_v33, 1 }
0x1007   :  { %v888_v25 = vpop.permute.xlu2 %887 }
0x1008   :  { %v890_v26 = vadd.f32 %v888_v25, %v880_v24  ;;  %v1027_v25 = vld [vmem:[#allocation6 + $0x70] sm:$0xff] }
0x1009   :  { %1079 = vmatpush.msrb.mxu0 %v1027_v25 }
0x100a   :  { %2031 = vtanh.f32 %v890_v26  ;;  %v915_v57 = vsel %vm903_vm12, %v890_v26, %v824_v23  ;;  %v1028_v26 = vld [vmem:[#allocation6 + $0x78] sm:$0xff] }
0x100b   :  { %1108 = vmatpush.msrb.mxu1 %v1028_v26 }
0x1010   :  { %v2032_v28 = vpop.eup %2031 }
0x1011   :  { %893 = vrot.lane.b32.xlu0 %v2032_v28, %s2193_s19  ;;  %v1026_v28 = vld [vmem:[#allocation6 + $0x68] sm:$0xff] }
0x1012   :  { %1109 = vmatpush.msrb.mxu1 %v1026_v28 }
0x1083   :  { %v894_v35 = vpop.permute.xlu0 %893 }
0x1084   :  { %v896_v36 = vmul.f32 %v894_v35, %v879_v16  ;;  %v1023_v35 = vld [vmem:[#allocation6 + $0x50] sm:$0xff] }
0x1086   :  { %v914_v37 = vsel %vm903_vm12, %v896_v36, %v823_v52  ;;  %v904_v54 = vsel %vm903_vm12, %v896_v36, 0.0  ;;  %v1024_v36 = vld [vmem:[#allocation6 + $0x58] sm:$0xff] }
0x1087   :  { %919 = vrot.lane.b32.xlu2 %v914_v37, %s2194_s5  ;;  %1110 = vmatpush.msrb.mxu1 %v1024_v36  ;;  %v1021_v37 = vld [vmem:[#allocation6 + $0x40] sm:$0xff] }
0x10e1   :  { %v920_v38 = vpop.permute.xlu2 %919 }
0x10e2   :  { %1942 = vmatmul.msk.f32.vlgmr.msrb.gmra.mxu2 %vm275_vm9, %v920_v38  ;;  %1943 = vmatmul.msk.f32.vlgmr.msrb.gmra.mxu3 %vm275_vm9, %v920_v38  ;;  %v1022_v38 = vld [vmem:[#allocation6 + $0x48] sm:$0xff] }
0x10e3   :  { %1111 = vmatpush.msrb.mxu1 %v1022_v38 }
0x1165   :  { %v940_v60 = vpop.f32.mrf.mxu2  ;;  %v960_v40 = vpop.f32.mrf.mxu3 }
0x1166   :  { %v963_v61 = vsel %vm80_vm0, %v940_v60, %v960_v40  ;;  %v1020_v60 = vld [vmem:[#allocation6 + $0x38] sm:$0xff]  ;;  %v1017_v40 = vld [vmem:[#allocation6 + $0x20] sm:$0xff] }
0x1167   :  { %v964_v62 = vadd.f32 %v963_v61, %v917_v39  ;;  %v1019_v39 = vld [vmem:[#allocation6 + $0x30] sm:$0xff]  ;;  %1112 = vmatpush.msrb.mxu1 %v1020_v60  ;;  %v1018_v61 = vld [vmem:[#allocation6 + $0x28] sm:$0xff] }
0x1169   :  { %v965_v63 = vmul.f32 0.5, %v964_v62  ;;  %1113 = vmatpush.msrb.mxu1 %v1018_v61 }
0x116b   :  { %v966_v0 = vsel %vm2262_vm3, %v964_v62, %v965_v63  ;;  %v1015_v62 = vld [vmem:[#allocation6 + $0x10] sm:$0xff]  ;;  %v1016_v63 = vld [vmem:[#allocation6 + $0x18] sm:$0xff] }
0x116c   :  { %2033 = vtanh.f32 %v966_v0  ;;  %1114 = vmatpush.msrb.mxu1 %v1016_v63  ;;  %v1013_v0 = vld [vmem:[#allocation6] sm:$0xff] }
0x1172   :  { %v2034_v41 = vpop.eup %2033 }
0x1173   :  { %v968_v2 = vmul.f32 0.5, %v2034_v41 }
0x1175   :  { %v969_v5 = vadd.f32 0.5, %v968_v2 }
0x1177   :  { %v970_v6 = vsel %vm2262_vm3, %v2034_v41, %v969_v5  ;;  %v1014_v41 = vld [vmem:[#allocation6 + $0x8] sm:$0xff] }
0x1178   :  { %973 = vrot.lane.b32.xlu0 %v970_v6, %s2193_s19  ;;  %v971_v29 = vmul.f32 %v970_v6, %v915_v57  ;;  %1115 = vmatpush.msrb.mxu1 %v1014_v41  ;;  %v1029_v57 = vld [vmem:[%s2949_s6] sm:$0x3]  ;;  %s2183_s6 = smov 0  }
0x1180   :  { %992 = vperm.xlu0 %2004, %v990_v43  }
0x1188   :  { %728 = vrot.lane.b32.xlu0 %v722_v44, %s2193_s19 }
0x11ea   :  { %v974_v45 = vpop.permute.xlu0 %973 }
0x11eb   :  { %v976_v46 = vmul.f32 %v974_v45, %v970_v6 }
0x11ed   :  { %978 = vrot.lane.b32.xlu1 %v976_v46, %s2194_s5 }
0x11f2   :  { %v2624_v11 = vpop.permute.xlu0 %992 }
0x11f3   :  { %vm994_vm4 = vcmp.eq.s32.totalorder %v2624_v11, 1 }
0x11f5   :  { %445 = vrot.lane.b32.xlu1 %v443_v47, %s2194_s5 }
0x11fa   :  { %v729_v17 = vpop.permute.xlu0 %728 }
0x11fd   :  { %538 = vrot.lane.b32.xlu1 %v536_v4, %s2194_s5 }
0x1205   :  { %819 = vrot.lane.b32.xlu1 %v813_v21, %s2193_s19 }
0x120d   :  { %724 = vrot.lane.b32.xlu1 %v722_v44, %s2194_s5 }
0x1215   :  { %450 = vrot.lane.b32.xlu1 %v443_v47, %s2193_s19 }
0x125f   :  { %v979_v48 = vpop.permute.xlu1 %978 }
0x1260   :  { %v981_v50 = vadd.f32 %v979_v48, %v971_v29  ;;  %v1032_v29 = vperm.slane %v1029_v57, 1  ;;  %v1031_v48 = vperm.slane %v1029_v57, 0 }
0x1262   :  { %2035 = vtanh.f32 %v981_v50 }
0x1267   :  { %v446_v34 = vpop.permute.xlu1 %445 }
0x1268   :  { %v2036_v52 = vpop.eup %2035  ;;  %449 = vst.msk [vmem:[#allocation9 + $0x4] sm:$0xf] %vm358_vm8, %v446_v34 }
0x1269   :  { %984 = vrot.lane.b32.xlu2 %v2036_v52, %s2193_s19 }
0x126f   :  { %v539_v51 = vpop.permute.xlu1 %538 }
0x1270   :  { %542 = vst.msk [vmem:[#allocation9 + $0x8] sm:$0xf] %vm358_vm8, %v539_v51 }
0x1271   :  { %910 = vrot.lane.b32.xlu2 %v904_v54, %s2193_s19 }
0x1277   :  { %v820_v58 = vpop.permute.xlu1 %819 }
0x1278   :  { %822 = vst.msk [vmem:[#allocation9 + $0x4] sm:$0xf0] %vm364_vm15, %v820_v58 }
0x1279   :  { %631 = vrot.lane.b32.xlu2 %v629_v59, %s2194_s5 }
0x127f   :  { %v1007_v8 = vld [vmem:[#allocation9 + $0x8] sm:$0xf]  ;;  %v2618_v9 = vpop.permute.xlu1 %724 }
0x1280   :  { %1047 = vst [vmem:[#allocation1 + $0x10] ss:$2 sm:$0xff] %v1007_v8 }
0x1281   :  { %543 = vrot.lane.b32.xlu2 %v536_v4, %s2193_s19 }
0x1287   :  { %v451_v10 = vpop.permute.xlu1 %450 }
0x1288   :  { %454 = vst.msk [vmem:[#allocation9 + $0x14] sm:$0xf0] %vm364_vm15, %v451_v10 }
0x1289   :  { %815 = vrot.lane.b32.xlu2 %v813_v21, %s2194_s5 }
0x1291   :  { %906 = vrot.lane.b32.xlu2 %v904_v54, %s2194_s5 }
0x12c3   :  { %v985_v12 = vpop.permute.xlu2 %984 }
0x12c4   :  { %v987_v13 = vmul.f32 %v985_v12, %v970_v6 }
0x12c6   :  { %v995_v56 = vsel %vm994_vm4, %v987_v13, 0.0 }
0x12c7   :  { %1001 = vrot.lane.b32.xlu0 %v995_v56, %s2193_s19 }
0x12cb   :  { %v911_v14 = vpop.permute.xlu2 %910 }
0x12cc   :  { %913 = vst.msk [vmem:[#allocation9] sm:$0xf0] %vm364_vm15, %v911_v14 }
0x12cf   :  { %636 = vrot.lane.b32.xlu0 %v629_v59, %s2193_s19 }
0x12d3   :  { %v1006_v15 = vld [vmem:[#allocation9 + $0x4] sm:$0xf]  ;;  %v632_v16 = vpop.permute.xlu2 %631 }
0x12d4   :  { %1045 = vst [vmem:[#allocation1 + $0x1] ss:$2 sm:$0xff] %v1006_v15 }
0x12d5   :  { %635 = vst.msk [vmem:[#allocation9 + $0xc] sm:$0xf] %vm358_vm8, %v632_v16 }
0x12d6   :  { %731 = vst.msk [vmem:[#allocation9 + $0x8] sm:$0xf0] %vm364_vm15, %v729_v17 }
0x12d7   :  { %360 = vrot.lane.b32.xlu0 %v2389_v32, %s2193_s19  ;;  %v1025_v32 = vld [vmem:[#allocation6 + $0x60] sm:$0xff] }
0x12d8   :  { %1080 = vmatpush.msrb.mxu0 %v1025_v32 }
0x12da   :  { %1081 = vmatpush.msrb.mxu0 %v1023_v35 }
0x12db   :  { %v544_v18 = vpop.permute.xlu2 %543 }
0x12dc   :  { %547 = vst.msk [vmem:[#allocation9 + $0x10] sm:$0xf0] %vm364_vm15, %v544_v18  ;;  %1082 = vmatpush.msrb.mxu0 %v1021_v37 }
0x12dd   :  { %v1008_v19 = vld [vmem:[#allocation9 + $0xc] sm:$0xf] }
0x12de   :  { %1049 = vst [vmem:[#allocation1 + $0x11] ss:$2 sm:$0xff] %v1008_v19  ;;  %1083 = vmatpush.msrb.mxu0 %v1019_v39 }
0x12df   :  { %997 = vrot.lane.b32.xlu0 %v995_v56, %s2194_s5 }
0x12e0   :  { %1084 = vmatpush.msrb.mxu0 %v1017_v40 }
0x12e2   :  { %1085 = vmatpush.msrb.mxu0 %v1015_v62 }
0x12e3   :  { %v816_v20 = vpop.permute.xlu2 %815 }
0x12e4   :  { %818 = vst.msk [vmem:[#allocation9 + $0x14] sm:$0xf] %vm358_vm8, %v816_v20  ;;  %1086 = vmatpush.msrb.mxu0 %v1013_v0 }
0x12e5   :  { %v1059_v46 = vld.sshfl [vmem:[#allocation1 + $0x10] sm:$0xff pattern:$0x75316420] }
0x12eb   :  { %v1010_v22 = vld [vmem:[#allocation9 + $0x14] sm:$0xf]  ;;  %v907_v23 = vpop.permute.xlu2 %906 }
0x12ec   :  { %1053 = vst [vmem:[#allocation1 + $0x21] ss:$2 sm:$0xff] %v1010_v22 }
0x12ed   :  { %909 = vst.msk [vmem:[#allocation9 + $0x18] sm:$0xf] %vm358_vm8, %v907_v23 }
0x12f4   :  { %v1011_v24 = vld [vmem:[#allocation9 + $0x18] sm:$0xf] }
0x12f5   :  { %1055 = vst [vmem:[#allocation1 + $0x30] ss:$2 sm:$0xff] %v1011_v24 }
0x1339   :  { %v1002_v2 = vpop.permute.xlu0 %1001 }
0x133a   :  { %1004 = vst.msk [vmem:[#allocation9 - $0x4] sm:$0xf0] %vm364_vm15, %v1002_v2 }
0x1341   :  { %v1005_v5 = vld [vmem:[#allocation9] sm:$0xf]  ;;  %v637_v6 = vpop.permute.xlu0 %636 }
0x1342   :  { %1043 = vst [vmem:[#allocation1] ss:$2 sm:$0xff] %v1005_v5 }
0x1343   :  { %640 = vst.msk [vmem:[#allocation9 + $0xc] sm:$0xf0] %vm364_vm15, %v637_v6 }
0x1344   :  { %727 = vst.msk [vmem:[#allocation9 + $0x10] sm:$0xf] %vm358_vm8, %v2618_v9 }
0x1349   :  { %v361_v42 = vpop.permute.xlu0 %360  ;;  %v1058_v43 = vld.sshfl [vmem:[#allocation1] sm:$0xff pattern:$0x75316420] }
0x134a   :  { %365 = vst.msk [vmem:[#allocation9 + $0x18] sm:$0xf0] %vm364_vm15, %v361_v42  ;;  %1944 = vmatmul.msk.f32.vlgmr.msrb.gmra.mxu0 %vm1062_vm10, %v1058_v43  ;;  %1948 = vmatmul.msk.f32.vlgmr.msrb.gmra.mxu1 %vm1062_vm10, %v1058_v43 }
0x134b   :  { %v1009_v44 = vld [vmem:[#allocation9 + $0x10] sm:$0xf] }
0x134c   :  { %1051 = vst [vmem:[#allocation1 + $0x20] ss:$2 sm:$0xff] %v1009_v44 }
0x1351   :  { %v998_v45 = vpop.permute.xlu0 %997 }
0x1352   :  { %1000 = vst.msk [vmem:[#allocation9 + $0x1c] sm:$0xf] %vm358_vm8, %v998_v45  ;;  %1945 = vmatmul.msk.f32.gmra.mxu0 %vm1062_vm10, %v1059_v46  ;;  %1949 = vmatmul.msk.f32.gmra.mxu1 %vm1062_vm10, %v1059_v46 }
0x1353   :  { %v1060_v4 = vld.sshfl [vmem:[#allocation1 + $0x20] sm:$0xff pattern:$0x75316420] }
0x1359   :  { %v1012_v47 = vld [vmem:[#allocation9 + $0x1c] sm:$0xf] }
0x135a   :  { %1057 = vst [vmem:[#allocation1 + $0x31] ss:$2 sm:$0xff] %v1012_v47  ;;  %1946 = vmatmul.msk.f32.gmra.mxu0 %vm1062_vm10, %v1060_v4  ;;  %1950 = vmatmul.msk.f32.gmra.mxu1 %vm1062_vm10, %v1060_v4 }
0x1361   :  { %v1061_v21 = vld.sshfl [vmem:[#allocation1 + $0x30] sm:$0xff pattern:$0x75316420] }
0x1362   :  { %1947 = vmatmul.msk.f32.gmra.mxu0 %vm1062_vm10, %v1061_v21  ;;  %1951 = vmatmul.msk.f32.gmra.mxu1 %vm1062_vm10, %v1061_v21 }
0x13c7   :  { %v1088_v50 = vpop.f32.mrf.mxu0  ;;  %v1117_v34 = vpop.f32.mrf.mxu1 }
0x13c8   :  { %v1118_v52 = vadd.f32 %v1117_v34, %v1032_v29  ;;  %v1089_v51 = vadd.f32 %v1088_v50, %v1031_v48 }
0x13ca   :  { %v1137_v54 = vrot.slane %v1118_v52, 4 }
0x13cc   :  { %v1141_v58 = vsel %vm183_vm5, %v1089_v51, %v1137_v54  ;;  %v1142_v59 = vsel %vm183_vm5, %v1137_v54, %v1089_v51 }
0x13cd   :  { %v1143_v8 = vrot.slane %v1142_v59, 4  ;;  %1161 = vst [vmem:[#allocation2] sm:$0xf] %v1141_v58 }
0x13ce   :  { %1169 = vst [vmem:[#allocation1] ss:$2 sm:$0xff] %v1141_v58 }
0x13cf   :  { %1162 = vst [vmem:[#allocation2 + $0x8] sm:$0xf] %v1143_v8  ;;  %v1091_v9 = vpop.f32.mrf.mxu0  ;;  %v1120_v10 = vpop.f32.mrf.mxu1 }
0x13d0   :  { %1172 = vst [vmem:[#allocation1 + $0x10] ss:$2 sm:$0xff] %v1143_v8  ;;  %v1121_v12 = vadd.f32 %v1120_v10, %v1032_v29  ;;  %v1092_v13 = vadd.f32 %v1091_v9, %v1031_v48 }
0x13d2   :  { %v1138_v56 = vrot.slane %v1121_v12, 4 }
0x13d4   :  { %v1144_v14 = vsel %vm183_vm5, %v1092_v13, %v1138_v56  ;;  %v1145_v15 = vsel %vm183_vm5, %v1138_v56, %v1092_v13 }
0x13d5   :  { %v1146_v16 = vrot.slane %v1145_v15, 4  ;;  %1163 = vst [vmem:[#allocation2 + $0x10] sm:$0xf] %v1144_v14  ;;  %v1170_v17 = vld.sshfl [vmem:[#allocation1 + $0x8] sm:$0xff pattern:$0x75316420] }
0x13d6   :  { %1175 = vst [vmem:[#allocation1 + $0x20] ss:$2 sm:$0xff] %v1144_v14 }
0x13d7   :  { %1164 = vst [vmem:[#allocation2 + $0x18] sm:$0xf] %v1146_v16  ;;  %v1094_v18 = vpop.f32.mrf.mxu0  ;;  %v1123_v19 = vpop.f32.mrf.mxu1  ;;  %v1173_v20 = vld.sshfl [vmem:[#allocation1 + $0x18] sm:$0xff pattern:$0x75316420] }
0x13d8   :  { %1178 = vst [vmem:[#allocation1 + $0x30] ss:$2 sm:$0xff] %v1146_v16  ;;  %v1124_v22 = vadd.f32 %v1123_v19, %v1032_v29  ;;  %v1095_v23 = vadd.f32 %v1094_v18, %v1031_v48 }
0x13d9   :  { %1196 = vst [vmem:[#allocation2 + $0x4] sm:$0xf] %v1170_v17 }
0x13da   :  { %v1139_v24 = vrot.slane %v1124_v22, 4  ;;  %1197 = vst [vmem:[#allocation2 + $0xc] sm:$0xf] %v1173_v20 }
0x13dc   :  { %v1147_v25 = vsel %vm183_vm5, %v1095_v23, %v1139_v24  ;;  %v1148_v26 = vsel %vm183_vm5, %v1139_v24, %v1095_v23 }
0x13dd   :  { %v1149_v32 = vrot.slane %v1148_v26, 4  ;;  %1165 = vst [vmem:[#allocation2 + $0x20] sm:$0xf] %v1147_v25  ;;  %v1176_v28 = vld.sshfl [vmem:[#allocation1 + $0x28] sm:$0xff pattern:$0x75316420] }
0x13de   :  { %1180 = vst [vmem:[#allocation1] ss:$2 sm:$0xff] %v1147_v25 }
0x13df   :  { %1166 = vst [vmem:[#allocation2 + $0x28] sm:$0xf] %v1149_v32  ;;  %v1097_v35 = vpop.f32.mrf.mxu0  ;;  %v1126_v36 = vpop.f32.mrf.mxu1  ;;  %v1179_v37 = vld.sshfl [vmem:[#allocation1 + $0x38] sm:$0xff pattern:$0x75316420] }
0x13e0   :  { %1182 = vst [vmem:[#allocation1 + $0x10] ss:$2 sm:$0xff] %v1149_v32  ;;  %v1127_v38 = vadd.f32 %v1126_v36, %v1032_v29  ;;  %v1098_v39 = vadd.f32 %v1097_v35, %v1031_v48 }
0x13e1   :  { %1198 = vst [vmem:[#allocation2 + $0x14] sm:$0xf] %v1176_v28 }
0x13e2   :  { %v1140_v60 = vrot.slane %v1127_v38, 4  ;;  %1199 = vst [vmem:[#allocation2 + $0x1c] sm:$0xf] %v1179_v37 }
0x13e4   :  { %v1150_v40 = vsel %vm183_vm5, %v1098_v39, %v1140_v60  ;;  %v1151_v61 = vsel %vm183_vm5, %v1140_v60, %v1098_v39 }
0x13e5   :  { %v1181_v62 = vld.sshfl [vmem:[#allocation1 + $0x8] sm:$0xff pattern:$0x75316420]  ;;  %v1152_v63 = vrot.slane %v1151_v61, 4  ;;  %1167 = vst [vmem:[#allocation2 + $0x30] sm:$0xf] %v1150_v40 }
0x13e6   :  { %1200 = vst [vmem:[#allocation2 + $0x24] sm:$0xf] %v1181_v62 }
0x13e7   :  { %v1183_v0 = vld.sshfl [vmem:[#allocation1 + $0x18] sm:$0xff pattern:$0x75316420]  ;;  %1168 = vst [vmem:[#allocation2 + $0x38] sm:$0xf] %v1152_v63 }
0x13e8   :  { %1201 = vst [vmem:[#allocation2 + $0x2c] sm:$0xf] %v1183_v0 }
0x13e9   :  { %1184 = vst [vmem:[#allocation1 + $0x20] ss:$2 sm:$0xff] %v1150_v40 }
0x13ea   :  { %1186 = vst [vmem:[#allocation1 + $0x30] ss:$2 sm:$0xff] %v1152_v63 }
0x13f0   :  { %v1185_v41 = vld.sshfl [vmem:[#allocation1 + $0x28] sm:$0xff pattern:$0x75316420] }
0x13f1   :  { %v1187_v2 = vld.sshfl [vmem:[#allocation1 + $0x38] sm:$0xff pattern:$0x75316420]  ;;  %1202 = vst [vmem:[#allocation2 + $0x34] sm:$0xf] %v1185_v41 }
0x13f2   :  { %1203 = vst [vmem:[#allocation2 + $0x3c] sm:$0xf] %v1187_v2 }
0x13f3 LB: > { %s1210_s7 = ssub.s32 7, %s2185_s6  ;;  %s1952_s21 = sshll.u32 %s2185_s6, 3  ;;  %s2185_s6 = sphi %s2183_s6, %s1209_s6  }
0x13f4   : > { %s1953_s22 = sshll.u32 %s1210_s7, 3  ;;  %s1212_s23 = scalar_lea.vmem [#allocation2], %s1952_s21 }
0x13f5   : > { %s1215_s24 = scalar_lea.vmem [#allocation2], %s1953_s22  ;;  %s1209_s6 = sadd.s32 1, %s2185_s6  }
0x13f6   : > { %p1206_p1 = scmp.ge.s32.totalorder %s1209_s6, 4  }
0x13f7   :  { %v2669_v44 = vld [vmem:[#allocation8 + $0x30] sm:$0xff] (%p1206_p1)  ;;  %v2671_v45 = vld [vmem:[#allocation8 + $0x38] sm:$0xff] (%p1206_p1)  ;;  %v2673_v46 = vld [vmem:[#allocation8 + $0x20] sm:$0xff] (%p1206_p1)  ;;  %s2203_s25 = smov (%p1206_p1), [#allocation9]   ;;  %s1888_s0 = sshll.u32 (%p1206_p1), %s2951_s8, 4  ;;  %s1889_s0 = int_to_ptr.hbm [resolvable:$true] %s1888_s0 }
0x13f8   :  { %1242 = vmatpush.msra.mxu2 (%p1206_p1), %v2669_v44  ;;  %1262 = vmatpush.msra.mxu3 (%p1206_p1), %v2671_v45  ;;  %v2677_v47 = vld [vmem:[#allocation8 + $0x28] sm:$0xff] (%p1206_p1)  ;;  %v2679_v4 = vld [vmem:[#allocation8 + $0x10] sm:$0xff] (%p1206_p1)  ;;  %v2681_v21 = vld [vmem:[#allocation8 + $0x18] sm:$0xff] (%p1206_p1)  ;;  %s1886_s26 = sshll.u32 (%p1206_p1), %s2203_s25, 4  ;;  %s2204_s29 = smov (%p1206_p1), 4   ;;  %s1887_s26 = int_to_ptr.vmem [resolvable:$true] %s1886_s26 }
0x13f9   : > { %v1213_v5 = vld [vmem:[%s1212_s23] sm:$0xff]  ;;  %1208 = sbr.rel (!%p1206_p1) target bundleno = 5107 (0x13f3), region = 120  ;;  %1653 = vmatpush.msra.mxu0 (%p1206_p1), %v2669_v44  ;;  %1673 = vmatpush.msra.mxu1 (%p1206_p1), %v2671_v45  ;;  %v2687_v57 = vld [vmem:[#allocation8] sm:$0xff] (%p1206_p1)  ;;  %v2689_v29 = vld [vmem:[#allocation8 + $0x8] sm:$0xff] (%p1206_p1) }
0x13fa   : > { %v1216_v6 = vld [vmem:[%s1215_s24] sm:$0xff]  ;;  %1243 = vmatpush.msra.mxu2 (%p1206_p1), %v2673_v46  ;;  %1263 = vmatpush.msra.mxu3 (%p1206_p1), %v2677_v47 }
0x13fb   : > { %v1217_v42 = vsel %vm80_vm0, %v1213_v5, %v1216_v6  ;;  %v1219_v43 = vsel %vm80_vm0, %v1216_v6, %v1213_v5  ;;  %1654 = vmatpush.msra.mxu0 (%p1206_p1), %v2673_v46  ;;  %1674 = vmatpush.msra.mxu1 (%p1206_p1), %v2677_v47 }
0x13fc   : > { %1218 = vst [vmem:[%s1212_s23] sm:$0xff] %v1217_v42  ;;  %1244 = vmatpush.msra.mxu2 (%p1206_p1), %v2679_v4  ;;  %1264 = vmatpush.msra.mxu3 (%p1206_p1), %v2681_v21 }
0x13fd   : > { %1220 = vst [vmem:[%s1215_s24] sm:$0xff] %v1219_v43  ;;  %1655 = vmatpush.msra.mxu0 (%p1206_p1), %v2679_v4  ;;  %1675 = vmatpush.msra.mxu1 (%p1206_p1), %v2681_v21 }
0x13fe   :  { %1245 = vmatpush.msra.mxu2 %v2687_v57  ;;  %1265 = vmatpush.msra.mxu3 %v2689_v29 }
0x13ff   :  { %1246 = vmatmul.f32.vlgmr.msra.gmra.mxu2 %v2192_v7  ;;  %1266 = vmatmul.f32.vlgmr.msra.gmra.mxu3 %v2192_v7 }
0x1400   :  { %1321 = vmatpush.msrb.mxu2 %v2669_v44  ;;  %1341 = vmatpush.msrb.mxu3 %v2671_v45 }
0x1401   :  { %1656 = vmatpush.msra.mxu0 %v2687_v57  ;;  %1676 = vmatpush.msra.mxu1 %v2689_v29 }
0x1402   :  { %1322 = vmatpush.msrb.mxu2 %v2673_v46  ;;  %1342 = vmatpush.msrb.mxu3 %v2677_v47 }
0x1403   :  { %1819 = vmatpush.msrb.mxu0 %v2669_v44  ;;  %1839 = vmatpush.msrb.mxu1 %v2671_v45 }
0x1404   :  { %1323 = vmatpush.msrb.mxu2 %v2679_v4  ;;  %1343 = vmatpush.msrb.mxu3 %v2681_v21  ;;  %v1229_v7 = vld [vmem:[#allocation2] sm:$0xff]  ;;  %v1306_v20 = vld [vmem:[#allocation2 + $0x8] sm:$0xff]  ;;  %v1386_v31 = vld [vmem:[#allocation2 + $0x10] sm:$0xff] }
0x1405   :  { %1820 = vmatpush.msrb.mxu0 %v2673_v46  ;;  %1840 = vmatpush.msrb.mxu1 %v2677_v47 }
0x1406   :  { %1324 = vmatpush.msrb.mxu2 %v2687_v57  ;;  %1344 = vmatpush.msrb.mxu3 %v2689_v29 }
0x1407   :  { %1821 = vmatpush.msrb.mxu0 %v2679_v4  ;;  %1841 = vmatpush.msrb.mxu1 %v2681_v21 }
0x1408   :  { %1404 = vmatpush.msra.mxu2 %v2669_v44  ;;  %1424 = vmatpush.msra.mxu3 %v2671_v45 }
0x1409   :  { %1822 = vmatpush.msrb.mxu0 %v2687_v57  ;;  %1842 = vmatpush.msrb.mxu1 %v2689_v29 }
0x140a   :  { %1405 = vmatpush.msra.mxu2 %v2673_v46  ;;  %1425 = vmatpush.msra.mxu3 %v2677_v47 }
0x140c   :  { %1406 = vmatpush.msra.mxu2 %v2679_v4  ;;  %1426 = vmatpush.msra.mxu3 %v2681_v21 }
0x140e   :  { %1407 = vmatpush.msra.mxu2 %v2687_v57  ;;  %1427 = vmatpush.msra.mxu3 %v2689_v29 }
0x1482   :  { %v1247_v48 = vpop.f32.mrf.mxu2  ;;  %v1267_v50 = vpop.f32.mrf.mxu3 }
0x1483   :  { %v1270_v34 = vsel %vm80_vm0, %v1247_v48, %v1267_v50 }
0x1484   :  { %v1271_v52 = vadd.f32 %v1270_v34, %v1229_v7 }
0x1486   :  { %v1272_v51 = vmul.f32 0.5, %v1271_v52 }
0x1488   :  { %v1273_v54 = vsel %vm2262_vm3, %v1271_v52, %v1272_v51 }
0x1489   :  { %2037 = vtanh.f32 %v1273_v54 }
0x148f   :  { %v2038_v58 = vpop.eup %2037 }
0x1490   :  { %v1275_v59 = vmul.f32 0.5, %v2038_v58 }
0x1492   :  { %v1276_v8 = vadd.f32 0.5, %v1275_v59 }
0x1494   :  { %v1277_v9 = vsel %vm2262_vm3, %v2038_v58, %v1276_v8 }
0x1495   :  { %1280 = vrot.lane.b32.xlu0 %v1277_v9, %s2193_s19  ;;  %v1278_v13 = vmul.f32 0.0, %v1277_v9 }
0x1507   :  { %v1281_v10 = vpop.permute.xlu0 %1280 }
0x1508   :  { %v1283_v12 = vmul.f32 %v1281_v10, %v1277_v9 }
0x150a   :  { %1285 = vrot.lane.b32.xlu0 %v1283_v12, %s2194_s5 }
0x157c   :  { %v1286_v56 = vpop.permute.xlu0 %1285 }
0x157d   :  { %v1288_v14 = vadd.f32 %v1286_v56, %v1278_v13 }
0x157f   :  { %2039 = vtanh.f32 %v1288_v14  ;;  %v1305_v60 = vsel %vm352_vm7, %v1288_v14, 0.0 }
0x1585   :  { %v2040_v15 = vpop.eup %2039 }
0x1586   :  { %1291 = vrot.lane.b32.xlu1 %v2040_v15, %s2193_s19 }
0x15f8   :  { %v1292_v16 = vpop.permute.xlu1 %1291 }
0x15f9   :  { %v1294_v17 = vmul.f32 %v1292_v16, %v1277_v9 }
0x15fb   :  { %v2738_v18 = vsel %vm352_vm7, %v1294_v17, 0.0  ;;  %v1469_v17 = vld [vmem:[#allocation2 + $0x18] sm:$0xff] }
0x15fc   :  { %1297 = vrot.lane.b32.xlu1 %v2738_v18, %s2194_s5 }
0x166e   :  { %v1298_v19 = vpop.permute.xlu1 %1297 }
0x166f   :  { %1300 = vst.msk [vmem:[#allocation9] sm:$0xf] %vm358_vm8, %v1298_v19  ;;  %1954 = vmatmul.msk.f32.vlgmr.msrb.gmra.mxu2 %vm275_vm9, %v1298_v19  ;;  %1955 = vmatmul.msk.f32.vlgmr.msrb.gmra.mxu3 %vm275_vm9, %v1298_v19 }
0x1670   :  { %1487 = vmatpush.msrb.mxu2 %v2669_v44  ;;  %1507 = vmatpush.msrb.mxu3 %v2671_v45 }
0x1672   :  { %1488 = vmatpush.msrb.mxu2 %v2673_v46  ;;  %1508 = vmatpush.msrb.mxu3 %v2677_v47 }
0x1674   :  { %1489 = vmatpush.msrb.mxu2 %v2679_v4  ;;  %1509 = vmatpush.msrb.mxu3 %v2681_v21 }
0x1676   :  { %1490 = vmatpush.msrb.mxu2 %v2687_v57  ;;  %1510 = vmatpush.msrb.mxu3 %v2689_v29 }
0x16f2   :  { %v1326_v22 = vpop.f32.mrf.mxu2  ;;  %v1346_v23 = vpop.f32.mrf.mxu3 }
0x16f3   :  { %v1349_v24 = vsel %vm80_vm0, %v1326_v22, %v1346_v23 }
0x16f4   :  { %v1350_v25 = vadd.f32 %v1349_v24, %v1306_v20 }
0x16f6   :  { %v1351_v26 = vmul.f32 0.5, %v1350_v25 }
0x16f8   :  { %v1352_v32 = vsel %vm2262_vm3, %v1350_v25, %v1351_v26 }
0x16f9   :  { %2041 = vtanh.f32 %v1352_v32 }
0x16ff   :  { %v2042_v28 = vpop.eup %2041 }
0x1700   :  { %v1354_v35 = vmul.f32 0.5, %v2042_v28 }
0x1702   :  { %v1355_v36 = vadd.f32 0.5, %v1354_v35 }
0x1704   :  { %v1356_v37 = vsel %vm2262_vm3, %v2042_v28, %v1355_v36 }
0x1705   :  { %1359 = vrot.lane.b32.xlu2 %v1356_v37, %s2193_s19  ;;  %v1357_v40 = vmul.f32 %v1356_v37, %v1305_v60 }
0x175f   :  { %v1360_v38 = vpop.permute.xlu2 %1359 }
0x1760   :  { %v1362_v39 = vmul.f32 %v1360_v38, %v1356_v37 }
0x1762   :  { %1364 = vrot.lane.b32.xlu2 %v1362_v39, %s2194_s5  ;;  %v1552_v39 = vld [vmem:[#allocation2 + $0x20] sm:$0xff] }
0x17bc   :  { %v1365_v61 = vpop.permute.xlu2 %1364 }
0x17bd   :  { %v1367_v62 = vadd.f32 %v1365_v61, %v1357_v40 }
0x17bf   :  { %2043 = vtanh.f32 %v1367_v62  ;;  %v1385_v8 = vsel %vm442_vm11, %v1367_v62, %v1305_v60 }
0x17c5   :  { %v2044_v63 = vpop.eup %2043 }
0x17c6   :  { %1370 = vrot.lane.b32.xlu0 %v2044_v63, %s2193_s19 }
0x1838   :  { %v1371_v0 = vpop.permute.xlu0 %1370 }
0x1839   :  { %v2764_v41 = vmul.f32 %v1371_v0, %v1356_v37 }
0x183b   :  { %v1384_v2 = vsel %vm442_vm11, %v2764_v41, %v2738_v18  ;;  %v1374_v53 = vsel %vm442_vm11, %v2764_v41, 0.0 }
0x183c   :  { %1388 = vrot.lane.b32.xlu1 %v1384_v2, %s2194_s5 }
0x18ae   :  { %v1389_v5 = vpop.permute.xlu1 %1388 }
0x18af   :  { %1956 = vmatmul.msk.f32.vlgmr.msra.gmra.mxu2 %vm275_vm9, %v1389_v5  ;;  %1957 = vmatmul.msk.f32.vlgmr.msra.gmra.mxu3 %vm275_vm9, %v1389_v5 }
0x18b0   :  { %1570 = vmatpush.msra.mxu2 %v2669_v44  ;;  %1590 = vmatpush.msra.mxu3 %v2671_v45 }
0x18b2   :  { %1571 = vmatpush.msra.mxu2 %v2673_v46  ;;  %1591 = vmatpush.msra.mxu3 %v2677_v47 }
0x18b4   :  { %1572 = vmatpush.msra.mxu2 %v2679_v4  ;;  %1592 = vmatpush.msra.mxu3 %v2681_v21 }
0x18b6   :  { %1573 = vmatpush.msra.mxu2 %v2687_v57  ;;  %1593 = vmatpush.msra.mxu3 %v2689_v29 }
0x1932   :  { %v1409_v6 = vpop.f32.mrf.mxu2  ;;  %v1429_v42 = vpop.f32.mrf.mxu3 }
0x1933   :  { %v1432_v43 = vsel %vm80_vm0, %v1409_v6, %v1429_v42 }
0x1934   :  { %v1433_v7 = vadd.f32 %v1432_v43, %v1386_v31 }
0x1936   :  { %v1434_v48 = vmul.f32 0.5, %v1433_v7 }
0x1938   :  { %v1435_v50 = vsel %vm2262_vm3, %v1433_v7, %v1434_v48 }
0x1939   :  { %2045 = vtanh.f32 %v1435_v50 }
0x193f   :  { %v2046_v34 = vpop.eup %2045 }
0x1940   :  { %v1437_v52 = vmul.f32 0.5, %v2046_v34 }
0x1942   :  { %v1438_v51 = vadd.f32 0.5, %v1437_v52 }
0x1944   :  { %v1439_v54 = vsel %vm2262_vm3, %v2046_v34, %v1438_v51 }
0x1945   :  { %1442 = vrot.lane.b32.xlu2 %v1439_v54, %s2193_s19  ;;  %v1440_v9 = vmul.f32 %v1439_v54, %v1385_v8 }
0x199f   :  { %v1443_v58 = vpop.permute.xlu2 %1442 }
0x19a0   :  { %v1445_v59 = vmul.f32 %v1443_v58, %v1439_v54 }
0x19a2   :  { %1447 = vrot.lane.b32.xlu0 %v1445_v59, %s2194_s5 }
0x1a14   :  { %v1448_v10 = vpop.permute.xlu0 %1447 }
0x1a15   :  { %v1450_v12 = vadd.f32 %v1448_v10, %v1440_v9 }
0x1a17   :  { %2047 = vtanh.f32 %v1450_v12  ;;  %v1468_v24 = vsel %vm535_vm13, %v1450_v12, %v1385_v8  ;;  %v1635_v8 = vld [vmem:[#allocation2 + $0x28] sm:$0xff] }
0x1a1d   :  { %v2048_v13 = vpop.eup %2047 }
0x1a1e   :  { %1453 = vrot.lane.b32.xlu1 %v2048_v13, %s2193_s19 }
0x1a90   :  { %v1454_v56 = vpop.permute.xlu1 %1453 }
0x1a91   :  { %v2792_v14 = vmul.f32 %v1454_v56, %v1439_v54 }
0x1a93   :  { %v1467_v15 = vsel %vm535_vm13, %v2792_v14, %v1384_v2  ;;  %v1457_v1 = vsel %vm535_vm13, %v2792_v14, 0.0 }
0x1a94   :  { %1471 = vrot.lane.b32.xlu2 %v1467_v15, %s2194_s5 }
0x1aee   :  { %v1472_v16 = vpop.permute.xlu2 %1471 }
0x1aef   :  { %1958 = vmatmul.msk.f32.vlgmr.msrb.gmra.mxu2 %vm275_vm9, %v1472_v16  ;;  %1959 = vmatmul.msk.f32.vlgmr.msrb.gmra.mxu3 %vm275_vm9, %v1472_v16 }
0x1af0   :  { %1736 = vmatpush.msrb.mxu2 %v2669_v44  ;;  %1756 = vmatpush.msrb.mxu3 %v2671_v45 }
0x1af2   :  { %1737 = vmatpush.msrb.mxu2 %v2673_v46  ;;  %1757 = vmatpush.msrb.mxu3 %v2677_v47 }
0x1af4   :  { %1738 = vmatpush.msrb.mxu2 %v2679_v4  ;;  %1758 = vmatpush.msrb.mxu3 %v2681_v21 }
0x1af6   :  { %1739 = vmatpush.msrb.mxu2 %v2687_v57  ;;  %1759 = vmatpush.msrb.mxu3 %v2689_v29 }
0x1b72   :  { %v1492_v19 = vpop.f32.mrf.mxu2  ;;  %v1512_v20 = vpop.f32.mrf.mxu3 }
0x1b73   :  { %v1515_v44 = vsel %vm80_vm0, %v1492_v19, %v1512_v20 }
0x1b74   :  { %v1516_v22 = vadd.f32 %v1515_v44, %v1469_v17 }
0x1b76   :  { %v1517_v45 = vmul.f32 0.5, %v1516_v22 }
0x1b78   :  { %v1518_v46 = vsel %vm2262_vm3, %v1516_v22, %v1517_v45 }
0x1b79   :  { %2049 = vtanh.f32 %v1518_v46 }
0x1b7f   :  { %v2050_v47 = vpop.eup %2049 }
0x1b80   :  { %v1520_v4 = vmul.f32 0.5, %v2050_v47 }
0x1b82   :  { %v1521_v23 = vadd.f32 0.5, %v1520_v4 }
0x1b84   :  { %v1522_v21 = vsel %vm2262_vm3, %v2050_v47, %v1521_v23 }
0x1b85   :  { %1525 = vrot.lane.b32.xlu0 %v1522_v21, %s2193_s19  ;;  %v1523_v25 = vmul.f32 %v1522_v21, %v1468_v24 }
0x1bf7   :  { %v1526_v57 = vpop.permute.xlu0 %1525 }
0x1bf8   :  { %v1528_v29 = vmul.f32 %v1526_v57, %v1522_v21 }
0x1bfa   :  { %1530 = vrot.lane.b32.xlu1 %v1528_v29, %s2194_s5 }
0x1c6c   :  { %v1531_v26 = vpop.permute.xlu1 %1530 }
0x1c6d   :  { %v1533_v32 = vadd.f32 %v1531_v26, %v1523_v25  ;;  %v1718_v25 = vld [vmem:[#allocation2 + $0x30] sm:$0xff] }
0x1c6f   :  { %2051 = vtanh.f32 %v1533_v32  ;;  %v1551_v7 = vsel %vm628_vm1, %v1533_v32, %v1468_v24 }
0x1c75   :  { %v2052_v28 = vpop.eup %2051 }
0x1c76   :  { %1536 = vrot.lane.b32.xlu2 %v2052_v28, %s2193_s19 }
0x1cd0   :  { %v1537_v35 = vpop.permute.xlu2 %1536 }
0x1cd1   :  { %v2819_v36 = vmul.f32 %v1537_v35, %v1522_v21 }
0x1cd3   :  { %v1550_v37 = vsel %vm628_vm1, %v2819_v36, %v1467_v15 }
0x1cd4   :  { %1554 = vrot.lane.b32.xlu0 %v1550_v37, %s2194_s5 }
0x1d46   :  { %v1555_v38 = vpop.permute.xlu0 %1554 }
0x1d47   :  { %1960 = vmatmul.msk.f32.vlgmr.msra.gmra.mxu2 %vm275_vm9, %v1555_v38  ;;  %1961 = vmatmul.msk.f32.vlgmr.msra.gmra.mxu3 %vm275_vm9, %v1555_v38 }
0x1dca   :  { %v1575_v60 = vpop.f32.mrf.mxu2  ;;  %v1595_v40 = vpop.f32.mrf.mxu3 }
0x1dcb   :  { %v1598_v61 = vsel %vm80_vm0, %v1575_v60, %v1595_v40 }
0x1dcc   :  { %v1599_v62 = vadd.f32 %v1598_v61, %v1552_v39 }
0x1dce   :  { %v1600_v63 = vmul.f32 0.5, %v1599_v62 }
0x1dd0   :  { %v1601_v0 = vsel %vm2262_vm3, %v1599_v62, %v1600_v63 }
0x1dd1   :  { %2053 = vtanh.f32 %v1601_v0 }
0x1dd7   :  { %v2054_v2 = vpop.eup %2053 }
0x1dd8   :  { %v1603_v5 = vmul.f32 0.5, %v2054_v2 }
0x1dda   :  { %v1604_v31 = vadd.f32 0.5, %v1603_v5 }
0x1ddc   :  { %v1605_v6 = vsel %vm2262_vm3, %v2054_v2, %v1604_v31 }
0x1ddd   :  { %1608 = vrot.lane.b32.xlu1 %v1605_v6, %s2193_s19  ;;  %v1606_v48 = vmul.f32 %v1605_v6, %v1551_v7 }
0x1e4f   :  { %v1609_v42 = vpop.permute.xlu1 %1608 }
0x1e50   :  { %v1611_v43 = vmul.f32 %v1609_v42, %v1605_v6 }
0x1e52   :  { %1613 = vrot.lane.b32.xlu2 %v1611_v43, %s2194_s5 }
0x1eac   :  { %v1614_v50 = vpop.permute.xlu2 %1613 }
0x1ead   :  { %v1616_v34 = vadd.f32 %v1614_v50, %v1606_v48  ;;  %v1801_v50 = vld [vmem:[#allocation2 + $0x38] sm:$0xff] }
0x1eaf   :  { %2055 = vtanh.f32 %v1616_v34  ;;  %v1634_v45 = vsel %vm721_vm2, %v1616_v34, %v1551_v7 }
0x1eb5   :  { %v2056_v52 = vpop.eup %2055 }
0x1eb6   :  { %1619 = vrot.lane.b32.xlu0 %v2056_v52, %s2193_s19 }
0x1f28   :  { %v1620_v51 = vpop.permute.xlu0 %1619 }
0x1f29   :  { %v2838_v54 = vmul.f32 %v1620_v51, %v1605_v6 }
0x1f2b   :  { %v1633_v58 = vsel %vm721_vm2, %v2838_v54, %v1550_v37 }
0x1f2c   :  { %1637 = vrot.lane.b32.xlu1 %v1633_v58, %s2194_s5 }
0x1f9e   :  { %v1638_v59 = vpop.permute.xlu1 %1637 }
0x1f9f   :  { %1962 = vmatmul.msk.f32.vlgmr.msra.gmra.mxu0 %vm275_vm9, %v1638_v59  ;;  %1963 = vmatmul.msk.f32.vlgmr.msra.gmra.mxu1 %vm275_vm9, %v1638_v59 }
0x201c   :  { %v1658_v9 = vpop.f32.mrf.mxu0  ;;  %v1678_v10 = vpop.f32.mrf.mxu1 }
0x201d   :  { %v1681_v12 = vsel %vm80_vm0, %v1658_v9, %v1678_v10 }
0x201e   :  { %v1682_v13 = vadd.f32 %v1681_v12, %v1635_v8 }
0x2020   :  { %v1683_v56 = vmul.f32 0.5, %v1682_v13 }
0x2022   :  { %v1684_v15 = vsel %vm2262_vm3, %v1682_v13, %v1683_v56  ;;  %v1540_v56 = vsel %vm628_vm1, %v2819_v36, 0.0 }
0x2023   :  { %2057 = vtanh.f32 %v1684_v15 }
0x2029   :  { %v2058_v16 = vpop.eup %2057 }
0x202a   :  { %v1686_v17 = vmul.f32 0.5, %v2058_v16 }
0x202c   :  { %v1687_v19 = vadd.f32 0.5, %v1686_v17 }
0x202e   :  { %v1688_v20 = vsel %vm2262_vm3, %v2058_v16, %v1687_v19  ;;  %v1623_v16 = vsel %vm721_vm2, %v2838_v54, 0.0 }
0x202f   :  { %1691 = vrot.lane.b32.xlu2 %v1688_v20, %s2193_s19  ;;  %v1689_v46 = vmul.f32 %v1688_v20, %v1634_v45 }
0x2089   :  { %v1692_v44 = vpop.permute.xlu2 %1691 }
0x208a   :  { %v1694_v22 = vmul.f32 %v1692_v44, %v1688_v20 }
0x208c   :  { %1696 = vrot.lane.b32.xlu0 %v1694_v22, %s2194_s5 }
0x20fe   :  { %v1697_v47 = vpop.permute.xlu0 %1696 }
0x20ff   :  { %v1699_v4 = vadd.f32 %v1697_v47, %v1689_v46 }
0x2101   :  { %2059 = vtanh.f32 %v1699_v4  ;;  %v1717_v0 = vsel %vm812_vm6, %v1699_v4, %v1634_v45 }
0x2107   :  { %v2060_v23 = vpop.eup %2059 }
0x2108   :  { %1702 = vrot.lane.b32.xlu1 %v2060_v23, %s2193_s19 }
0x217a   :  { %v1703_v21 = vpop.permute.xlu1 %1702 }
0x217b   :  { %v1705_v57 = vmul.f32 %v1703_v21, %v1688_v20 }
0x217d   :  { %v1716_v29 = vsel %vm812_vm6, %v1705_v57, %v1633_v58  ;;  %v1706_v3 = vsel %vm812_vm6, %v1705_v57, 0.0 }
0x217e   :  { %1720 = vrot.lane.b32.xlu2 %v1716_v29, %s2194_s5 }
0x21d8   :  { %v1721_v24 = vpop.permute.xlu2 %1720 }
0x21d9   :  { %1964 = vmatmul.msk.f32.vlgmr.msrb.gmra.mxu2 %vm275_vm9, %v1721_v24  ;;  %1965 = vmatmul.msk.f32.vlgmr.msrb.gmra.mxu3 %vm275_vm9, %v1721_v24 }
0x225c   :  { %v1741_v26 = vpop.f32.mrf.mxu2  ;;  %v1761_v32 = vpop.f32.mrf.mxu3 }
0x225d   :  { %v1764_v28 = vsel %vm80_vm0, %v1741_v26, %v1761_v32 }
0x225e   :  { %v1765_v35 = vadd.f32 %v1764_v28, %v1718_v25 }
0x2260   :  { %v1766_v37 = vmul.f32 0.5, %v1765_v35 }
0x2262   :  { %v1767_v38 = vsel %vm2262_vm3, %v1765_v35, %v1766_v37 }
0x2263   :  { %2061 = vtanh.f32 %v1767_v38 }
0x2269   :  { %v2062_v39 = vpop.eup %2061 }
0x226a   :  { %v1769_v60 = vmul.f32 0.5, %v2062_v39 }
0x226c   :  { %v1770_v40 = vadd.f32 0.5, %v1769_v60 }
0x226e   :  { %v1771_v61 = vsel %vm2262_vm3, %v2062_v39, %v1770_v40 }
0x226f   :  { %1774 = vrot.lane.b32.xlu0 %v1771_v61, %s2193_s19  ;;  %v1772_v2 = vmul.f32 %v1771_v61, %v1717_v0 }
0x22e1   :  { %v1775_v62 = vpop.permute.xlu0 %1774 }
0x22e2   :  { %v1777_v63 = vmul.f32 %v1775_v62, %v1771_v61 }
0x22e4   :  { %1779 = vrot.lane.b32.xlu1 %v1777_v63, %s2194_s5 }
0x2356   :  { %v1780_v5 = vpop.permute.xlu1 %1779 }
0x2357   :  { %v1782_v31 = vadd.f32 %v1780_v5, %v1772_v2 }
0x2359   :  { %2063 = vtanh.f32 %v1782_v31  ;;  %v1800_v55 = vsel %vm903_vm12, %v1782_v31, %v1717_v0 }
0x235f   :  { %v2064_v6 = vpop.eup %2063 }
0x2360   :  { %1785 = vrot.lane.b32.xlu2 %v2064_v6, %s2193_s19 }
0x23ba   :  { %v1786_v42 = vpop.permute.xlu2 %1785 }
0x23bb   :  { %v1788_v43 = vmul.f32 %v1786_v42, %v1771_v61 }
0x23bd   :  { %v1799_v7 = vsel %vm903_vm12, %v1788_v43, %v1716_v29 }
0x23be   :  { %1803 = vrot.lane.b32.xlu0 %v1799_v7, %s2194_s5 }
0x2430   :  { %v1804_v48 = vpop.permute.xlu0 %1803 }
0x2431   :  { %1966 = vmatmul.msk.f32.vlgmr.msrb.gmra.mxu0 %vm275_vm9, %v1804_v48  ;;  %1967 = vmatmul.msk.f32.vlgmr.msrb.gmra.mxu1 %vm275_vm9, %v1804_v48 }
0x24ae   :  { %v1824_v34 = vpop.f32.mrf.mxu0  ;;  %v1844_v52 = vpop.f32.mrf.mxu1 }
0x24af   :  { %v1847_v51 = vsel %vm80_vm0, %v1824_v34, %v1844_v52 }
0x24b0   :  { %v1848_v58 = vadd.f32 %v1847_v51, %v1801_v50 }
0x24b2   :  { %v1849_v59 = vmul.f32 0.5, %v1848_v58 }
0x24b4   :  { %v1850_v8 = vsel %vm2262_vm3, %v1848_v58, %v1849_v59 }
0x24b5   :  { %2065 = vtanh.f32 %v1850_v8 }
0x24bb   :  { %v2066_v9 = vpop.eup %2065 }
0x24bc   :  { %v1852_v10 = vmul.f32 0.5, %v2066_v9 }
0x24be   :  { %v1853_v12 = vadd.f32 0.5, %v1852_v10 }
0x24c0   :  { %v1854_v13 = vsel %vm2262_vm3, %v2066_v9, %v1853_v12 }
0x24c1   :  { %1857 = vrot.lane.b32.xlu1 %v1854_v13, %s2193_s19  ;;  %v1855_v17 = vmul.f32 %v1854_v13, %v1800_v55 }
0x24c9   :  { %1301 = vrot.lane.b32.xlu1 %v2738_v18, %s2193_s19  ;;  %v1789_v18 = vsel %vm903_vm12, %v1788_v43, 0.0 }
0x24d1   :  { %1459 = vrot.lane.b32.xlu1 %v1457_v1, %s2194_s5 }
0x24d9   :  { %1546 = vrot.lane.b32.xlu1 %v1540_v56, %s2193_s19 }
0x24e1   :  { %1708 = vrot.lane.b32.xlu1 %v1706_v3, %s2194_s5 }
0x24e9   :  { %1795 = vrot.lane.b32.xlu1 %v1789_v18, %s2193_s19 }
0x2533   :  { %v1858_v30 = vpop.permute.xlu1 %1857 }
0x2534   :  { %v1860_v14 = vmul.f32 %v1858_v30, %v1854_v13 }
0x2536   :  { %1862 = vrot.lane.b32.xlu2 %v1860_v14, %s2194_s5 }
0x253b   :  { %v1302_v15 = vpop.permute.xlu1 %1301 }
0x253c   :  { %1304 = vst.msk [vmem:[#allocation9 + $0x18] sm:$0xf0] %vm364_vm15, %v1302_v15 }
0x253e   :  { %1376 = vrot.lane.b32.xlu2 %v1374_v53, %s2194_s5 }
0x2543   :  { %v1460_v49 = vpop.permute.xlu1 %1459 }
0x2544   :  { %1462 = vst.msk [vmem:[#allocation9 + $0x8] sm:$0xf] %vm358_vm8, %v1460_v49 }
0x2546   :  { %1463 = vrot.lane.b32.xlu2 %v1457_v1, %s2193_s19 }
0x254b   :  { %v1547_v36 = vpop.permute.xlu1 %1546 }
0x254c   :  { %1549 = vst.msk [vmem:[#allocation9 + $0xc] sm:$0xf0] %vm364_vm15, %v1547_v36 }
0x254e   :  { %1625 = vrot.lane.b32.xlu2 %v1623_v16, %s2194_s5 }
0x2553   :  { %v1709_v41 = vpop.permute.xlu1 %1708 }
0x2556   :  { %1712 = vrot.lane.b32.xlu2 %v1706_v3, %s2193_s19 }
0x255b   :  { %v1796_v45 = vpop.permute.xlu1 %1795 }
0x2590   :  { %v1863_v19 = vpop.permute.xlu2 %1862 }
0x2591   :  { %v1865_v20 = vadd.f32 %v1863_v19, %v1855_v17 }
0x2593   :  { %2067 = vtanh.f32 %v1865_v20 }
0x2598   :  { %v1377_v44 = vpop.permute.xlu2 %1376 }
0x2599   :  { %v2068_v22 = vpop.eup %2067  ;;  %1379 = vst.msk [vmem:[#allocation9 + $0x4] sm:$0xf] %vm358_vm8, %v1377_v44 }
0x259a   :  { %1798 = vst.msk [vmem:[#allocation9] sm:$0xf0] %vm364_vm15, %v1796_v45  ;;  %1868 = vrot.lane.b32.xlu0 %v2068_v22, %s2193_s19 }
0x25a0   :  { %v1464_v27 = vpop.permute.xlu2 %1463 }
0x25a1   :  { %1466 = vst.msk [vmem:[#allocation9 + $0x10] sm:$0xf0] %vm364_vm15, %v1464_v27 }
0x25a2   :  { %1711 = vst.msk [vmem:[#allocation9 + $0x14] sm:$0xf] %vm358_vm8, %v1709_v41  ;;  %1380 = vrot.lane.b32.xlu0 %v1374_v53, %s2193_s19 }
0x25a8   :  { %v1626_v33 = vpop.permute.xlu2 %1625 }
0x25a9   :  { %1628 = vst.msk [vmem:[#allocation9 + $0x10] sm:$0xf] %vm358_vm8, %v1626_v33 }
0x25aa   :  { %1542 = vrot.lane.b32.xlu0 %v1540_v56, %s2194_s5 }
0x25b0   :  { %v1713_v54 = vpop.permute.xlu2 %1712 }
0x25b1   :  { %1715 = vst.msk [vmem:[#allocation9 + $0x4] sm:$0xf0] %vm364_vm15, %v1713_v54 }
0x25b2   :  { %1629 = vrot.lane.b32.xlu0 %v1623_v16, %s2193_s19 }
0x25ba   :  { %1791 = vrot.lane.b32.xlu0 %v1789_v18, %s2194_s5 }
0x260c   :  { %v1869_v46 = vpop.permute.xlu0 %1868 }
0x260d   :  { %v1871_v47 = vmul.f32 %v1869_v46, %v1854_v13 }
0x260f   :  { %v1872_v4 = vsel %vm994_vm4, %v1871_v47, 0.0 }
0x2610   :  { %1878 = vrot.lane.b32.xlu0 %v1872_v4, %s2193_s19  ;;  %1874 = vrot.lane.b32.xlu2 %v1872_v4, %s2194_s5 }
0x2614   :  { %v1381_v23 = vpop.permute.xlu0 %1380 }
0x2615   :  { %1383 = vst.msk [vmem:[#allocation9 + $0x14] sm:$0xf0] %vm364_vm15, %v1381_v23 }
0x261c   :  { %v1543_v21 = vpop.permute.xlu0 %1542 }
0x261d   :  { %1545 = vst.msk [vmem:[#allocation9 + $0xc] sm:$0xf] %vm358_vm8, %v1543_v21 }
0x2624   :  { %v1630_v57 = vpop.permute.xlu0 %1629 }
0x2625   :  { %1632 = vst.msk [vmem:[#allocation9 + $0x8] sm:$0xf0] %vm364_vm15, %v1630_v57 }
0x262c   :  { %v1792_v29 = vpop.permute.xlu0 %1791 }
0x262d   :  { %1794 = vst.msk [vmem:[#allocation9 + $0x18] sm:$0xf] %vm358_vm8, %v1792_v29 }
0x266a   :  { %v1875_v24 = vpop.permute.xlu2 %1874 }
0x266b   :  { %1877 = vst.msk [vmem:[#allocation9 + $0x1c] sm:$0xf] %vm358_vm8, %v1875_v24 }
0x2682   :  { %v1879_v11 = vpop.permute.xlu0 %1878 }
0x2683   :  { %1881 = vst.msk [vmem:[#allocation9 - $0x4] sm:$0xf0] %vm364_vm15, %v1879_v11 }
0x2684   :  { %1894 = dma.vmem_to_hbm [thread:$0]  %s1887_s26, 512, %s1889_s0, [#allocation5], %s2193_s19, %s2193_s19, %s2204_s29  }
0x2685   :  { %2177 = dma.done.wait [#allocation5], 512  }
0x2686   :  { %2178 = vsyncadd [#allocation5], 4294966784 }
0x2687   :  { %1899 = vsyncpa [#allocation4], 1 }
0x2688   :  { %1900 = vsyncpa [#allocation7], 1 }
0x2689   :  { %1901 = vsyncpa [#allocation5], 1 }

</bundles_post_ra>
